<compile_context>
chip_gen: v7x
topology: tpu7x:2x2x1
jax: 0.10.0
libtpu: 0.0.40
codegen_flags: <defaults>
</compile_context>

<pallas_src>
import jax
import jax.numpy as jnp
from jax.experimental import pallas as pl
from jax.experimental.pallas import tpu as pltpu  # noqa: F401  (TPU backend)

PAD = 0
N_HEADS = 2
NEG_INF = -1e9
PRED_PAD = 128     # lane-dense padded width of fused predictor output (area_num + shot_num <= 128)

CONFIG = dict(
    area_dim=32, shot_dim=32, player_dim=32, encode_dim=32,
    shot_num=12, player_num=6, area_num=10,
    encode_length=4, max_ball_round=16,
)


# ---------------------------------------------------------------------------
# in-kernel helpers (traced inside the Pallas kernel)
# ---------------------------------------------------------------------------
def _mm(a, b):
    # a @ b  (contract last dim of a with first dim of b), f32 accumulate on the MXU
    return jax.lax.dot_general(a, b, (((1,), (0,)), ((), ())),
                               preferred_element_type=jnp.float32)


def _mmT(a, b):
    # a @ b.T (contract last dims) -- avoids an explicit transpose
    return jax.lax.dot_general(a, b, (((1,), (1,)), ((), ())),
                               preferred_element_type=jnp.float32)


def _softmax(x):
    m = jnp.max(x, axis=-1, keepdims=True)
    e = jnp.exp(x - m)
    return e * pl.reciprocal(jnp.sum(e, axis=-1, keepdims=True), approx=True)


def _layernorm(x, g, b, eps=1e-6):
    mu = jnp.mean(x, axis=-1, keepdims=True)
    var = jnp.mean((x - mu) ** 2, axis=-1, keepdims=True)
    return (x - mu) * jax.lax.rsqrt(var + eps) * g + b


# ---------------------------------------------------------------------------
# The single fused kernel:
#   player-branch DecoderModule (A and B sub-sequences stacked along rows)
#   + rally-branch DecoderModule
#   + alternatemerge (constant selection matmuls)
#   + GatedFusionLayer + PredictorLayer
# ---------------------------------------------------------------------------
def shotgen_fused_kernel(
        # player-branch activations/masks (rows = [A_b0..A_b(B-1), B_b0..B_b(B-1)] x L/2)
        dp_a_ref, dp_s_ref, bias_p_self_ref, enc_p_ref, bias_p_ed_ref,
        # rally-branch activations/masks (rows = batch x L)
        dr_a_ref, dr_s_ref, bias_r_self_ref, enc_r_ref, bias_r_ed_ref,
        # decoder params, leading axis 0=playerDecode, 1=rallyDecode, lane-packed
        ta_aw_ref, ta_sw_ref, ta_fc_ref, mq_w_ref, mkv_w_ref, m_fc_ref,
        ffn_w1_ref, ffn_b1_ref, ffn_w2_ref, ffn_b2_ref, ln_g_ref, ln_b_ref,
        # alternatemerge / de-interleave selection matrices
        mA_ref, mB_ref,
        # gated fusion + predictor
        gh_w_ref, w_cat_ref, sum3_ref, tp_ref, pred_w_ref,
        # output: (B*L, PRED_PAD) padded logits, sliced in the wrapper
        out_ref):
    D = dp_a_ref.shape[-1]
    HD = N_HEADS * D

    def decoder_block(da, ds, enc, bias_self, bias_ed, idx):
        ln_g = ln_g_ref[idx]          # (3, D)
        ln_b = ln_b_ref[idx]

        # ---- TypeAreaMultiHeadAttention (disentangled masked self-attention) ----
        # qa@ka^T + qs@ks^T + qa@ks^T + qs@ka^T == (qa+qs)@(ka+ks)^T; 1/sqrt(d_k) folded into q-cols.
        residual = da + ds
        p = _mm(da, ta_aw_ref[idx]) + _mm(ds, ta_sw_ref[idx])   # (N, 3*HD) = [q | k | v]
        q = p[:, 0:HD]
        k = p[:, HD:2 * HD]
        v = p[:, 2 * HD:3 * HD]
        x = residual
        for h in range(N_HEADS):
            attn = _softmax(_mmT(q[:, h * D:(h + 1) * D], k[:, h * D:(h + 1) * D]) + bias_self)
            # accumulate head straight through its fc row-block (no head concat)
            x = x + _mm(_mm(attn, v[:, h * D:(h + 1) * D]), ta_fc_ref[idx, h * D:(h + 1) * D, :])
        x = _layernorm(x, ln_g[0], ln_b[0])

        # ---- MultiHeadAttention over encoder output (bias only blocks cross-batch) ----
        residual = x
        q = _mm(x, mq_w_ref[idx])                 # (N, HD), scale folded into weights
        kv = _mm(enc, mkv_w_ref[idx])             # (M, 2*HD) = [k | v]
        x = residual
        for h in range(N_HEADS):
            attn = _softmax(_mmT(q[:, h * D:(h + 1) * D], kv[:, h * D:(h + 1) * D]) + bias_ed)
            x = x + _mm(_mm(attn, kv[:, HD + h * D:HD + (h + 1) * D]),
                        m_fc_ref[idx, h * D:(h + 1) * D, :])
        x = _layernorm(x, ln_g[1], ln_b[1])

        # ---- PositionwiseFeedForward ----
        residual = x
        hdn = jnp.maximum(_mm(x, ffn_w1_ref[idx]) + ffn_b1_ref[idx], 0.0)
        x = _mm(hdn, ffn_w2_ref[idx]) + ffn_b2_ref[idx] + residual
        return _layernorm(x, ln_g[2], ln_b[2])

    out_p = decoder_block(dp_a_ref[...], dp_s_ref[...], enc_p_ref[...],
                          bias_p_self_ref[...], bias_p_ed_ref[...], 0)
    out_r = decoder_block(dr_a_ref[...], dr_s_ref[...], enc_r_ref[...],
                          bias_r_self_ref[...], bias_r_ed_ref[...], 1)

    # ---- alternatemerge + batch de-interleave as constant selection matmuls ----
    xA = _mm(mA_ref[...], out_p)      # (Nr, D)
    xB = _mm(mB_ref[...], out_p)
    xL = out_r

    # ---- GatedFusionLayer ----
    # pre = cat([xA,xB,xL]) @ gh_w, computed as three row-block matmuls (no lane concat).
    pre = (_mm(xA, gh_w_ref[0:D, :]) + _mm(xB, gh_w_ref[D:2 * D, :])
           + _mm(xL, gh_w_ref[2 * D:3 * D, :]))                         # (Nr, 6D) = [g1|g2|g3|h1|h2|h3]
    z = jax.nn.sigmoid(pre[:, :3 * D]) * jnp.tanh(pre[:, 3 * D:])        # (Nr, 3D) = [z1|z2|z3]
    # w_A*z1 + w_B*z2 + w_L*z3 as an elementwise mul followed by a stacked-identity matmul (MXU).
    fused = jax.nn.sigmoid(_mm(z * w_cat_ref[...], sum3_ref[...]))       # (Nr, D)

    # ---- PredictorLayer: single lane-dense padded matmul; wrapper slices area/shot logits ----
    out_ref[...] = _mm(fused + tp_ref[...], pred_w_ref[...])


# ---------------------------------------------------------------------------
# plain-JAX glue: embeddings, masks, positional table, weight packing
# ---------------------------------------------------------------------------
def sinusoid_pos_table(n_position, d_hid):
    position = jnp.arange(n_position, dtype=jnp.float32)[:, None]
    hid = jnp.arange(d_hid, dtype=jnp.float32)[None, :]
    angle = position / jnp.power(10000.0, 2.0 * jnp.floor(hid / 2.0) / d_hid)
    even = (jnp.arange(d_hid) % 2 == 0)[None, :]
    return jnp.where(even, jnp.sin(angle), jnp.cos(angle)).astype(jnp.float32)


def make_mask_bool(seq):
    # get_pad_mask(seq) & get_subsequent_mask(seq)  -> (B, L, L) bool, True = attend
    _, L = seq.shape
    pad = (seq != PAD)[:, None, :]
    sub = jnp.tril(jnp.ones((L, L), dtype=bool))[None]
    return pad & sub


def block_diag_bias(mask_bool):
    # (G, L, L) bool per-group mask -> (G*L, G*L) additive bias, cross-group = -inf
    G, L, _ = mask_bool.shape
    eye = jnp.eye(G, dtype=bool)[:, None, :, None]                     # (G,1,G,1)
    big = (eye & mask_bool[:, :, None, :]).reshape(G * L, G * L)       # (G,L,G,L)
    return jnp.where(big, 0.0, NEG_INF).astype(jnp.float32)


def block_ed_bias(G, Lq, Lk):
    # block-diagonal "same batch" additive bias for the enc-dec attention
    big = jnp.kron(jnp.eye(G, dtype=jnp.float32), jnp.ones((Lq, Lk), jnp.float32))
    return jnp.where(big > 0, 0.0, NEG_INF).astype(jnp.float32)


def build_merge_matrices(B, S):
    # alternatemerge(decode_A, decode_A, S, 'A') / (decode_B, decode_B, S, 'B') as selection
    # matrices acting on the stacked player-branch rows
    # (rows [0, B*Lh) = A sub-batches, rows [B*Lh, 2*B*Lh) = B sub-batches).
    Lh = S // 2
    Np = 2 * B * Lh
    Nr = B * S
    r = jnp.arange(Nr)
    b_idx, t_idx = r // S, r % S
    colA = b_idx * Lh + t_idx // 2                       # merged_A[t] = decode_A[t//2]
    mA = jax.nn.one_hot(colA, Np, dtype=jnp.float32)
    colB = B * Lh + b_idx * Lh + (t_idx - 1) // 2        # merged_B[0]=0, merged_B[t]=decode_B[(t-1)//2]
    mB = jax.nn.one_hot(colB, Np, dtype=jnp.float32) * (t_idx >= 1).astype(jnp.float32)[:, None]
    return mA, mB


def _pack_decoder_module(p, scale):
    # Repack per-head (D,D) weights into lane-dense fused projections; fold the 1/sqrt(d_k)
    # attention scale into the Q columns.
    # ta_w layout: index = proj * N_HEADS + head, proj order: qa, ka, va, qs, ks, vs.
    # Packed column layout is head-major inside each projection block, matching the per-head
    # fc row-blocks (fc row-block h == head h).
    H = N_HEADS
    ta_w, ta_fc = p['ta_w'], p['ta_fc']
    mha_w, mha_fc = p['mha_w'], p['mha_fc']

    def cat_heads(base):
        return jnp.concatenate([ta_w[base * H + h] for h in range(H)], axis=1)

    ta_aw = jnp.concatenate([cat_heads(0) * scale, cat_heads(1), cat_heads(2)], axis=1)   # (D, 3HD)
    ta_sw = jnp.concatenate([cat_heads(3) * scale, cat_heads(4), cat_heads(5)], axis=1)
    ta_fc_p = jnp.concatenate([ta_fc[h] for h in range(H)], axis=0)                       # (HD, D)
    mq_w = jnp.concatenate([mha_w[0 * H + h] for h in range(H)], axis=1) * scale          # (D, HD)
    mkv_w = jnp.concatenate([mha_w[1 * H + h] for h in range(H)]
                            + [mha_w[2 * H + h] for h in range(H)], axis=1)               # (D, 2HD)
    m_fc_p = jnp.concatenate([mha_fc[h] for h in range(H)], axis=0)                       # (HD, D)
    return dict(ta_aw=ta_aw, ta_sw=ta_sw, ta_fc=ta_fc_p, mq_w=mq_w, mkv_w=mkv_w, m_fc=m_fc_p,
                ffn_w1=p['ffn_w1'], ffn_b1=p['ffn_b1'], ffn_w2=p['ffn_w2'], ffn_b2=p['ffn_b2'],
                ln_g=p['ln_g'], ln_b=p['ln_b'])


_DEC_KEYS = ['ta_aw', 'ta_sw', 'ta_fc', 'mq_w', 'mkv_w', 'm_fc',
             'ffn_w1', 'ffn_b1', 'ffn_w2', 'ffn_b2', 'ln_g', 'ln_b']


def _stack_decoder_params(p_player, p_rally):
    return [jnp.stack([p_player[k], p_rally[k]], axis=0) for k in _DEC_KEYS]


def _pack_fusion(fz, D):
    # gate_w layout: index = gate * 3 + {A, B, L} row-blocks of the (3D, D) weight on cat([xA,xB,xL]).
    gw = fz['gate_w']
    gates = jnp.concatenate(
        [jnp.concatenate([gw[3 * i + j] for j in range(3)], axis=0) for i in range(3)], axis=1)  # (3D,3D)
    hid = jax.scipy.linalg.block_diag(fz['hid_w'][0], fz['hid_w'][1], fz['hid_w'][2])            # (3D,3D)
    return jnp.concatenate([gates, hid], axis=1)                                                 # (3D,6D)


def _pack_predictor(pred, D):
    aw, sw = pred['area_w'], pred['shot_w']
    pad = PRED_PAD - aw.shape[1] - sw.shape[1]
    return jnp.concatenate([aw, sw, jnp.zeros((D, pad), jnp.float32)], axis=1)    # (D, 128)


def init_params(key, cfg):
    d = cfg['encode_dim']
    keys = iter(jax.random.split(key, 64))

    def nrm(shape, s=0.1):
        return (s * jax.random.normal(next(keys), shape)).astype(jnp.float32)

    def decoder_module_params():
        return dict(
            ta_w=nrm((6 * N_HEADS, d, d)), ta_fc=nrm((N_HEADS, d, d)),
            mha_w=nrm((3 * N_HEADS, d, d)), mha_fc=nrm((N_HEADS, d, d)),
            ffn_w1=nrm((d, 2 * d)), ffn_b1=nrm((1, 2 * d)),
            ffn_w2=nrm((2 * d, d)), ffn_b2=nrm((1, d)),
            ln_g=jnp.ones((3, d), jnp.float32), ln_b=jnp.zeros((3, d), jnp.float32),
        )

    decode_length = cfg['max_ball_round'] - cfg['encode_length']
    return dict(
        area_emb_w=nrm((2, d)), area_emb_b=nrm((1, d)),
        shot_emb=nrm((cfg['shot_num'], d)).at[PAD].set(0.0),       # padding_idx = PAD
        player_emb=nrm((cfg['player_num'], d)).at[PAD].set(0.0),
        player_decode=decoder_module_params(),
        rally_decode=decoder_module_params(),
        fusion=dict(hid_w=nrm((3, d, d)), gate_w=nrm((9, d, d)),
                    w_A=nrm((decode_length, d)), w_B=nrm((decode_length, d)),
                    w_L=nrm((decode_length, d))),
        pred=dict(player_emb=nrm((cfg['player_num'], d)).at[PAD].set(0.0),
                  area_w=nrm((d, cfg['area_num'])), shot_w=nrm((d, cfg['shot_num']))),
        pos_table=sinusoid_pos_table(cfg['max_ball_round'], cfg['shot_dim']),
    )


def shot_gen_decoder_forward(params, cfg, shot, x, y, player,
                             enc_rally, enc_A, enc_B, target_player):
    B, S = shot.shape
    assert S % 2 == 0, "even decode length assumed (non-empty B sub-sequence)"
    D = cfg['encode_dim']
    el = cfg['encode_length']
    Lh, Leh = S // 2, el // 2
    Np, Nr = 2 * B * Lh, B * S
    scale = 1.0 / jnp.sqrt(jnp.float32(D))

    # --- EmbeddingLayer ---
    area = jnp.stack([x, y], axis=-1).astype(jnp.float32)                 # (B, S, 2)
    embedded_area = jax.nn.relu(jnp.einsum('bsi,id->bsd', area, params['area_emb_w'])
                                + params['area_emb_b'])
    embedded_shot = params['shot_emb'][shot]
    embedded_player = params['player_emb'][player]
    h_a = embedded_area + embedded_player
    h_s = embedded_shot + embedded_player

    # --- PositionalEncoding (decode mode: offset by encode_length) ---
    pos = params['pos_table']
    pos_half = pos[el:el + Lh]
    pos_full = pos[el:el + S]

    # --- player branch: A and B sub-sequences stacked along rows ---
    dp_a = (jnp.concatenate([h_a[:, ::2], h_a[:, 1::2]], axis=0) + pos_half[None]).reshape(Np, D)
    dp_s = (jnp.concatenate([h_s[:, ::2], h_s[:, 1::2]], axis=0) + pos_half[None]).reshape(Np, D)
    enc_p = jnp.concatenate([enc_A, enc_B], axis=0).reshape(2 * B * Leh, D)
    mask_p = jnp.concatenate([make_mask_bool(shot[:, ::2]), make_mask_bool(shot[:, 1::2])], axis=0)
    bias_p_self = block_diag_bias(mask_p)
    bias_p_ed = block_ed_bias(2 * B, Lh, Leh)

    # --- rally branch ---
    dr_a = (h_a + pos_full[None]).reshape(Nr, D)
    dr_s = (h_s + pos_full[None]).reshape(Nr, D)
    enc_r = enc_rally.reshape(B * el, D)
    bias_r_self = block_diag_bias(make_mask_bool(shot))
    bias_r_ed = block_ed_bias(B, S, el)

    # --- alternatemerge selection matrices ---
    mA, mB = build_merge_matrices(B, S)

    # --- packed weights ---
    dec_params = _stack_decoder_params(_pack_decoder_module(params['player_decode'], scale),
                                       _pack_decoder_module(params['rally_decode'], scale))
    fz = params['fusion']
    gh_w = _pack_fusion(fz, D)
    w_cat = jnp.tile(jnp.concatenate([fz['w_A'][:S], fz['w_B'][:S], fz['w_L'][:S]], axis=-1),
                     (B, 1))                                                       # (Nr, 3D)
    sum3 = jnp.concatenate([jnp.eye(D, dtype=jnp.float32)] * 3, axis=0)            # (3D, D)
    tp = params['pred']['player_emb'][target_player].reshape(Nr, D)
    pred_w = _pack_predictor(params['pred'], D)

    logits = pl.pallas_call(
        shotgen_fused_kernel,
        out_shape=jax.ShapeDtypeStruct((Nr, PRED_PAD), jnp.float32),
    )(dp_a, dp_s, bias_p_self, enc_p, bias_p_ed,
      dr_a, dr_s, bias_r_self, enc_r, bias_r_ed,
      *dec_params,
      mA, mB, gh_w, w_cat, sum3, tp, pred_w)

    logits = logits.reshape(B, S, PRED_PAD)
    An, Sn = cfg['area_num'], cfg['shot_num']
    return logits[..., :An], logits[..., An:An + Sn]


if __name__ == "__main__":
    cfg = CONFIG
    key = jax.random.PRNGKey(0)
    k_par, k_shot, k_pl, k_x, k_y, k_enc, k_tp = jax.random.split(key, 7)

    B, S = 2, 8
    el = cfg['encode_length']
    params = init_params(k_par, cfg)

    shot = jax.random.randint(k_shot, (B, S), 1, cfg['shot_num'])
    shot = shot.at[1, -1].set(PAD)                      # exercise padding mask
    player = jax.random.randint(k_pl, (B, S), 1, cfg['player_num'])
    target_player = jax.random.randint(k_tp, (B, S), 1, cfg['player_num'])
    x = jax.random.normal(k_x, (B, S), jnp.float32)
    y = jax.random.normal(k_y, (B, S), jnp.float32)
    ke1, ke2, ke3 = jax.random.split(k_enc, 3)
    enc_rally = jax.random.normal(ke1, (B, el, cfg['encode_dim']), jnp.float32)
    enc_A = jax.random.normal(ke2, (B, el // 2, cfg['encode_dim']), jnp.float32)
    enc_B = jax.random.normal(ke3, (B, el // 2, cfg['encode_dim']), jnp.float32)

    @jax.jit
    def fwd(params, shot, x, y, player, enc_rally, enc_A, enc_B, target_player):
        return shot_gen_decoder_forward(params, cfg, shot, x, y, player,
                                        enc_rally, enc_A, enc_B, target_player)

    area_logits, shot_logits = fwd(params, shot, x, y, player,
                                   enc_rally, enc_A, enc_B, target_player)
    jax.block_until_ready((area_logits, shot_logits))

    assert area_logits.shape == (B, S, cfg['area_num'])
    assert shot_logits.shape == (B, S, cfg['shot_num'])
    assert bool(jnp.all(jnp.isfinite(area_logits))) and bool(jnp.all(jnp.isfinite(shot_logits)))
    print("KERNEL_OK")
</pallas_src>

<mosaic_0001>
module attributes {stable_mosaic.version = 11 : i64} {
  func.func @shotgen_fused_kernel(%arg0: memref<16x32xf32, #tpu.memory_space<vmem>>, %arg1: memref<16x32xf32, #tpu.memory_space<vmem>>, %arg2: memref<16x16xf32, #tpu.memory_space<vmem>>, %arg3: memref<8x32xf32, #tpu.memory_space<vmem>>, %arg4: memref<16x8xf32, #tpu.memory_space<vmem>>, %arg5: memref<16x32xf32, #tpu.memory_space<vmem>>, %arg6: memref<16x32xf32, #tpu.memory_space<vmem>>, %arg7: memref<16x16xf32, #tpu.memory_space<vmem>>, %arg8: memref<8x32xf32, #tpu.memory_space<vmem>>, %arg9: memref<16x8xf32, #tpu.memory_space<vmem>>, %arg10: memref<2x32x192xf32, #tpu.memory_space<vmem>>, %arg11: memref<2x32x192xf32, #tpu.memory_space<vmem>>, %arg12: memref<2x64x32xf32, #tpu.memory_space<vmem>>, %arg13: memref<2x32x64xf32, #tpu.memory_space<vmem>>, %arg14: memref<2x32x128xf32, #tpu.memory_space<vmem>>, %arg15: memref<2x64x32xf32, #tpu.memory_space<vmem>>, %arg16: memref<2x32x64xf32, #tpu.memory_space<vmem>>, %arg17: memref<2x1x64xf32, #tpu.memory_space<vmem>>, %arg18: memref<2x64x32xf32, #tpu.memory_space<vmem>>, %arg19: memref<2x1x32xf32, #tpu.memory_space<vmem>>, %arg20: memref<2x3x32xf32, #tpu.memory_space<vmem>>, %arg21: memref<2x3x32xf32, #tpu.memory_space<vmem>>, %arg22: memref<16x16xf32, #tpu.memory_space<vmem>>, %arg23: memref<16x16xf32, #tpu.memory_space<vmem>>, %arg24: memref<96x192xf32, #tpu.memory_space<vmem>>, %arg25: memref<16x96xf32, #tpu.memory_space<vmem>>, %arg26: memref<96x32xf32, #tpu.memory_space<vmem>>, %arg27: memref<16x32xf32, #tpu.memory_space<vmem>>, %arg28: memref<32x128xf32, #tpu.memory_space<vmem>>, %arg29: memref<16x128xf32, #tpu.memory_space<vmem>>) attributes {dimension_semantics = [], scalar_prefetch = 0 : i64, scratch_operands = 0 : i64, tpu.core_type = #tpu.core_type<tc>} {
    %c0 = arith.constant 0 : index
    %c0_0 = arith.constant 0 : index
    %0 = vector.load %arg0[%c0, %c0_0] : memref<16x32xf32, #tpu.memory_space<vmem>>, vector<16x32xf32>
    %c0_1 = arith.constant 0 : index
    %c0_2 = arith.constant 0 : index
    %1 = vector.load %arg1[%c0_1, %c0_2] : memref<16x32xf32, #tpu.memory_space<vmem>>, vector<16x32xf32>
    %c0_3 = arith.constant 0 : index
    %c0_4 = arith.constant 0 : index
    %2 = vector.load %arg3[%c0_3, %c0_4] : memref<8x32xf32, #tpu.memory_space<vmem>>, vector<8x32xf32>
    %c0_5 = arith.constant 0 : index
    %c0_6 = arith.constant 0 : index
    %3 = vector.load %arg2[%c0_5, %c0_6] : memref<16x16xf32, #tpu.memory_space<vmem>>, vector<16x16xf32>
    %c0_7 = arith.constant 0 : index
    %c0_8 = arith.constant 0 : index
    %4 = vector.load %arg4[%c0_7, %c0_8] : memref<16x8xf32, #tpu.memory_space<vmem>>, vector<16x8xf32>
    %c0_9 = arith.constant 0 : index
    %c0_10 = arith.constant 0 : index
    %c0_11 = arith.constant 0 : index
    %5 = vector.load %arg20[%c0_9, %c0_10, %c0_11] : memref<2x3x32xf32, #tpu.memory_space<vmem>>, vector<1x3x32xf32>
    %6 = vector.shape_cast %5 : vector<1x3x32xf32> to vector<3x32xf32>
    %c0_12 = arith.constant 0 : index
    %c0_13 = arith.constant 0 : index
    %c0_14 = arith.constant 0 : index
    %7 = vector.load %arg21[%c0_12, %c0_13, %c0_14] : memref<2x3x32xf32, #tpu.memory_space<vmem>>, vector<1x3x32xf32>
    %8 = vector.shape_cast %7 : vector<1x3x32xf32> to vector<3x32xf32>
    %9 = arith.addf %0, %1 : vector<16x32xf32>
    %c0_15 = arith.constant 0 : index
    %c0_16 = arith.constant 0 : index
    %c0_17 = arith.constant 0 : index
    %10 = vector.load %arg10[%c0_15, %c0_16, %c0_17] : memref<2x32x192xf32, #tpu.memory_space<vmem>>, vector<1x32x192xf32>
    %11 = vector.shape_cast %10 : vector<1x32x192xf32> to vector<32x192xf32>
    %cst = arith.constant dense<0.000000e+00> : vector<16x192xf32>
    %12 = tpu.matmul %0, %11, %cst {dimension_numbers = #tpu.dot_dimension_numbers<[1], [0], [0], [1], [0, 0, 1, 1], [], []>} : vector<16x32xf32>, vector<32x192xf32>, vector<16x192xf32> -> vector<16x192xf32>
    %c0_18 = arith.constant 0 : index
    %c0_19 = arith.constant 0 : index
    %c0_20 = arith.constant 0 : index
    %13 = vector.load %arg11[%c0_18, %c0_19, %c0_20] : memref<2x32x192xf32, #tpu.memory_space<vmem>>, vector<1x32x192xf32>
    %14 = vector.shape_cast %13 : vector<1x32x192xf32> to vector<32x192xf32>
    %cst_21 = arith.constant dense<0.000000e+00> : vector<16x192xf32>
    %15 = tpu.matmul %1, %14, %cst_21 {dimension_numbers = #tpu.dot_dimension_numbers<[1], [0], [0], [1], [0, 0, 1, 1], [], []>} : vector<16x32xf32>, vector<32x192xf32>, vector<16x192xf32> -> vector<16x192xf32>
    %16 = arith.addf %12, %15 : vector<16x192xf32>
    %17 = vector.extract_strided_slice %16 {offsets = [0, 0], sizes = [16, 64], strides = [1, 1]} : vector<16x192xf32> to vector<16x64xf32>
    %18 = vector.extract_strided_slice %16 {offsets = [0, 64], sizes = [16, 64], strides = [1, 1]} : vector<16x192xf32> to vector<16x64xf32>
    %19 = vector.extract_strided_slice %16 {offsets = [0, 128], sizes = [16, 64], strides = [1, 1]} : vector<16x192xf32> to vector<16x64xf32>
    %20 = vector.extract_strided_slice %17 {offsets = [0, 0], sizes = [16, 32], strides = [1, 1]} : vector<16x64xf32> to vector<16x32xf32>
    %21 = vector.extract_strided_slice %18 {offsets = [0, 0], sizes = [16, 32], strides = [1, 1]} : vector<16x64xf32> to vector<16x32xf32>
    %cst_22 = arith.constant dense<0.000000e+00> : vector<16x16xf32>
    %22 = tpu.matmul %20, %21, %cst_22 {dimension_numbers = #tpu.dot_dimension_numbers<[1], [1], [0], [0], [0, 0, 1, 0], [], []>} : vector<16x32xf32>, vector<16x32xf32>, vector<16x16xf32> -> vector<16x16xf32>
    %23 = arith.addf %22, %3 : vector<16x16xf32>
    %cst_23 = arith.constant dense<0xFF800000> : vector<16xf32>
    %24 = vector.multi_reduction <maximumf>, %23, %cst_23 [1] : vector<16x16xf32> to vector<16xf32>
    %25 = vector.shape_cast %24 : vector<16xf32> to vector<16x1xf32>
    %26 = vector.broadcast %25 : vector<16x1xf32> to vector<16x16xf32>
    %27 = arith.subf %23, %26 : vector<16x16xf32>
    %28 = math.exp %27 : vector<16x16xf32>
    %cst_24 = arith.constant dense<0.000000e+00> : vector<16xf32>
    %29 = vector.multi_reduction <add>, %28, %cst_24 [1] : vector<16x16xf32> to vector<16xf32>
    %30 = vector.shape_cast %29 : vector<16xf32> to vector<16x1xf32>
    %31 = tpu.reciprocal %30 {approx = true} : vector<16x1xf32> -> vector<16x1xf32>
    %32 = vector.broadcast %31 : vector<16x1xf32> to vector<16x16xf32>
    %33 = arith.mulf %28, %32 : vector<16x16xf32>
    %34 = vector.extract_strided_slice %19 {offsets = [0, 0], sizes = [16, 32], strides = [1, 1]} : vector<16x64xf32> to vector<16x32xf32>
    %cst_25 = arith.constant dense<0.000000e+00> : vector<16x32xf32>
    %35 = tpu.matmul %33, %34, %cst_25 {dimension_numbers = #tpu.dot_dimension_numbers<[1], [0], [0], [1], [0, 0, 1, 1], [], []>} : vector<16x16xf32>, vector<16x32xf32>, vector<16x32xf32> -> vector<16x32xf32>
    %c0_26 = arith.constant 0 : index
    %c0_27 = arith.constant 0 : index
    %c0_28 = arith.constant 0 : index
    %36 = vector.load %arg12[%c0_26, %c0_27, %c0_28] : memref<2x64x32xf32, #tpu.memory_space<vmem>>, vector<1x32x32xf32>
    %37 = vector.shape_cast %36 : vector<1x32x32xf32> to vector<32x32xf32>
    %cst_29 = arith.constant dense<0.000000e+00> : vector<16x32xf32>
    %38 = tpu.matmul %35, %37, %cst_29 {dimension_numbers = #tpu.dot_dimension_numbers<[1], [0], [0], [1], [0, 0, 1, 1], [], []>} : vector<16x32xf32>, vector<32x32xf32>, vector<16x32xf32> -> vector<16x32xf32>
    %39 = arith.addf %9, %38 : vector<16x32xf32>
    %40 = vector.extract_strided_slice %17 {offsets = [0, 32], sizes = [16, 32], strides = [1, 1]} : vector<16x64xf32> to vector<16x32xf32>
    %41 = vector.extract_strided_slice %18 {offsets = [0, 32], sizes = [16, 32], strides = [1, 1]} : vector<16x64xf32> to vector<16x32xf32>
    %cst_30 = arith.constant dense<0.000000e+00> : vector<16x16xf32>
    %42 = tpu.matmul %40, %41, %cst_30 {dimension_numbers = #tpu.dot_dimension_numbers<[1], [1], [0], [0], [0, 0, 1, 0], [], []>} : vector<16x32xf32>, vector<16x32xf32>, vector<16x16xf32> -> vector<16x16xf32>
    %43 = arith.addf %42, %3 : vector<16x16xf32>
    %cst_31 = arith.constant dense<0xFF800000> : vector<16xf32>
    %44 = vector.multi_reduction <maximumf>, %43, %cst_31 [1] : vector<16x16xf32> to vector<16xf32>
    %45 = vector.shape_cast %44 : vector<16xf32> to vector<16x1xf32>
    %46 = vector.broadcast %45 : vector<16x1xf32> to vector<16x16xf32>
    %47 = arith.subf %43, %46 : vector<16x16xf32>
    %48 = math.exp %47 : vector<16x16xf32>
    %cst_32 = arith.constant dense<0.000000e+00> : vector<16xf32>
    %49 = vector.multi_reduction <add>, %48, %cst_32 [1] : vector<16x16xf32> to vector<16xf32>
    %50 = vector.shape_cast %49 : vector<16xf32> to vector<16x1xf32>
    %51 = tpu.reciprocal %50 {approx = true} : vector<16x1xf32> -> vector<16x1xf32>
    %52 = vector.broadcast %51 : vector<16x1xf32> to vector<16x16xf32>
    %53 = arith.mulf %48, %52 : vector<16x16xf32>
    %54 = vector.extract_strided_slice %19 {offsets = [0, 32], sizes = [16, 32], strides = [1, 1]} : vector<16x64xf32> to vector<16x32xf32>
    %cst_33 = arith.constant dense<0.000000e+00> : vector<16x32xf32>
    %55 = tpu.matmul %53, %54, %cst_33 {dimension_numbers = #tpu.dot_dimension_numbers<[1], [0], [0], [1], [0, 0, 1, 1], [], []>} : vector<16x16xf32>, vector<16x32xf32>, vector<16x32xf32> -> vector<16x32xf32>
    %c0_34 = arith.constant 0 : index
    %c32 = arith.constant 32 : index
    %c0_35 = arith.constant 0 : index
    %56 = vector.load %arg12[%c0_34, %c32, %c0_35] : memref<2x64x32xf32, #tpu.memory_space<vmem>>, vector<1x32x32xf32>
    %57 = vector.shape_cast %56 : vector<1x32x32xf32> to vector<32x32xf32>
    %cst_36 = arith.constant dense<0.000000e+00> : vector<16x32xf32>
    %58 = tpu.matmul %55, %57, %cst_36 {dimension_numbers = #tpu.dot_dimension_numbers<[1], [0], [0], [1], [0, 0, 1, 1], [], []>} : vector<16x32xf32>, vector<32x32xf32>, vector<16x32xf32> -> vector<16x32xf32>
    %59 = arith.addf %39, %58 : vector<16x32xf32>
    %60 = vector.extract_strided_slice %6 {offsets = [0, 0], sizes = [1, 32], strides = [1, 1]} : vector<3x32xf32> to vector<1x32xf32>
    %61 = vector.shape_cast %60 : vector<1x32xf32> to vector<32xf32>
    %62 = vector.extract_strided_slice %8 {offsets = [0, 0], sizes = [1, 32], strides = [1, 1]} : vector<3x32xf32> to vector<1x32xf32>
    %63 = vector.shape_cast %62 : vector<1x32xf32> to vector<32xf32>
    %cst_37 = arith.constant dense<0.000000e+00> : vector<16xf32>
    %64 = vector.multi_reduction <add>, %59, %cst_37 [1] : vector<16x32xf32> to vector<16xf32>
    %65 = vector.shape_cast %64 : vector<16xf32> to vector<16x1xf32>
    %cst_38 = arith.constant 3.200000e+01 : f32
    %66 = vector.broadcast %cst_38 : f32 to vector<16x1xf32>
    %67 = arith.divf %65, %66 : vector<16x1xf32>
    %68 = vector.broadcast %67 : vector<16x1xf32> to vector<16x32xf32>
    %69 = arith.subf %59, %68 : vector<16x32xf32>
    %70 = arith.mulf %69, %69 : vector<16x32xf32>
    %cst_39 = arith.constant dense<0.000000e+00> : vector<16xf32>
    %71 = vector.multi_reduction <add>, %70, %cst_39 [1] : vector<16x32xf32> to vector<16xf32>
    %72 = vector.shape_cast %71 : vector<16xf32> to vector<16x1xf32>
    %cst_40 = arith.constant 3.200000e+01 : f32
    %73 = vector.broadcast %cst_40 : f32 to vector<16x1xf32>
    %74 = arith.divf %72, %73 : vector<16x1xf32>
    %75 = vector.broadcast %67 : vector<16x1xf32> to vector<16x32xf32>
    %76 = arith.subf %59, %75 : vector<16x32xf32>
    %cst_41 = arith.constant 9.99999997E-7 : f32
    %77 = vector.broadcast %cst_41 : f32 to vector<16x1xf32>
    %78 = arith.addf %74, %77 : vector<16x1xf32>
    %79 = math.rsqrt %78 : vector<16x1xf32>
    %80 = vector.broadcast %79 : vector<16x1xf32> to vector<16x32xf32>
    %81 = arith.mulf %76, %80 : vector<16x32xf32>
    %82 = vector.shape_cast %61 : vector<32xf32> to vector<1x32xf32>
    %83 = vector.broadcast %82 : vector<1x32xf32> to vector<16x32xf32>
    %84 = arith.mulf %81, %83 : vector<16x32xf32>
    %85 = vector.shape_cast %63 : vector<32xf32> to vector<1x32xf32>
    %86 = vector.broadcast %85 : vector<1x32xf32> to vector<16x32xf32>
    %87 = arith.addf %84, %86 : vector<16x32xf32>
    %c0_42 = arith.constant 0 : index
    %c0_43 = arith.constant 0 : index
    %c0_44 = arith.constant 0 : index
    %88 = vector.load %arg13[%c0_42, %c0_43, %c0_44] : memref<2x32x64xf32, #tpu.memory_space<vmem>>, vector<1x32x64xf32>
    %89 = vector.shape_cast %88 : vector<1x32x64xf32> to vector<32x64xf32>
    %cst_45 = arith.constant dense<0.000000e+00> : vector<16x64xf32>
    %90 = tpu.matmul %87, %89, %cst_45 {dimension_numbers = #tpu.dot_dimension_numbers<[1], [0], [0], [1], [0, 0, 1, 1], [], []>} : vector<16x32xf32>, vector<32x64xf32>, vector<16x64xf32> -> vector<16x64xf32>
    %c0_46 = arith.constant 0 : index
    %c0_47 = arith.constant 0 : index
    %c0_48 = arith.constant 0 : index
    %91 = vector.load %arg14[%c0_46, %c0_47, %c0_48] : memref<2x32x128xf32, #tpu.memory_space<vmem>>, vector<1x32x128xf32>
    %92 = vector.shape_cast %91 : vector<1x32x128xf32> to vector<32x128xf32>
    %cst_49 = arith.constant dense<0.000000e+00> : vector<8x128xf32>
    %93 = tpu.matmul %2, %92, %cst_49 {dimension_numbers = #tpu.dot_dimension_numbers<[1], [0], [0], [1], [0, 0, 1, 1], [], []>} : vector<8x32xf32>, vector<32x128xf32>, vector<8x128xf32> -> vector<8x128xf32>
    %94 = vector.extract_strided_slice %90 {offsets = [0, 0], sizes = [16, 32], strides = [1, 1]} : vector<16x64xf32> to vector<16x32xf32>
    %95 = vector.extract_strided_slice %93 {offsets = [0, 0], sizes = [8, 32], strides = [1, 1]} : vector<8x128xf32> to vector<8x32xf32>
    %cst_50 = arith.constant dense<0.000000e+00> : vector<16x8xf32>
    %96 = tpu.matmul %94, %95, %cst_50 {dimension_numbers = #tpu.dot_dimension_numbers<[1], [1], [0], [0], [0, 0, 1, 0], [], []>} : vector<16x32xf32>, vector<8x32xf32>, vector<16x8xf32> -> vector<16x8xf32>
    %97 = arith.addf %96, %4 : vector<16x8xf32>
    %cst_51 = arith.constant dense<0xFF800000> : vector<16xf32>
    %98 = vector.multi_reduction <maximumf>, %97, %cst_51 [1] : vector<16x8xf32> to vector<16xf32>
    %99 = vector.shape_cast %98 : vector<16xf32> to vector<16x1xf32>
    %100 = vector.broadcast %99 : vector<16x1xf32> to vector<16x8xf32>
    %101 = arith.subf %97, %100 : vector<16x8xf32>
    %102 = math.exp %101 : vector<16x8xf32>
    %cst_52 = arith.constant dense<0.000000e+00> : vector<16xf32>
    %103 = vector.multi_reduction <add>, %102, %cst_52 [1] : vector<16x8xf32> to vector<16xf32>
    %104 = vector.shape_cast %103 : vector<16xf32> to vector<16x1xf32>
    %105 = tpu.reciprocal %104 {approx = true} : vector<16x1xf32> -> vector<16x1xf32>
    %106 = vector.broadcast %105 : vector<16x1xf32> to vector<16x8xf32>
    %107 = arith.mulf %102, %106 : vector<16x8xf32>
    %108 = vector.extract_strided_slice %93 {offsets = [0, 64], sizes = [8, 32], strides = [1, 1]} : vector<8x128xf32> to vector<8x32xf32>
    %cst_53 = arith.constant dense<0.000000e+00> : vector<16x32xf32>
    %109 = tpu.matmul %107, %108, %cst_53 {dimension_numbers = #tpu.dot_dimension_numbers<[1], [0], [0], [1], [0, 0, 1, 1], [], []>} : vector<16x8xf32>, vector<8x32xf32>, vector<16x32xf32> -> vector<16x32xf32>
    %c0_54 = arith.constant 0 : index
    %c0_55 = arith.constant 0 : index
    %c0_56 = arith.constant 0 : index
    %110 = vector.load %arg15[%c0_54, %c0_55, %c0_56] : memref<2x64x32xf32, #tpu.memory_space<vmem>>, vector<1x32x32xf32>
    %111 = vector.shape_cast %110 : vector<1x32x32xf32> to vector<32x32xf32>
    %cst_57 = arith.constant dense<0.000000e+00> : vector<16x32xf32>
    %112 = tpu.matmul %109, %111, %cst_57 {dimension_numbers = #tpu.dot_dimension_numbers<[1], [0], [0], [1], [0, 0, 1, 1], [], []>} : vector<16x32xf32>, vector<32x32xf32>, vector<16x32xf32> -> vector<16x32xf32>
    %113 = arith.addf %87, %112 : vector<16x32xf32>
    %114 = vector.extract_strided_slice %90 {offsets = [0, 32], sizes = [16, 32], strides = [1, 1]} : vector<16x64xf32> to vector<16x32xf32>
    %115 = vector.extract_strided_slice %93 {offsets = [0, 32], sizes = [8, 32], strides = [1, 1]} : vector<8x128xf32> to vector<8x32xf32>
    %cst_58 = arith.constant dense<0.000000e+00> : vector<16x8xf32>
    %116 = tpu.matmul %114, %115, %cst_58 {dimension_numbers = #tpu.dot_dimension_numbers<[1], [1], [0], [0], [0, 0, 1, 0], [], []>} : vector<16x32xf32>, vector<8x32xf32>, vector<16x8xf32> -> vector<16x8xf32>
    %117 = arith.addf %116, %4 : vector<16x8xf32>
    %cst_59 = arith.constant dense<0xFF800000> : vector<16xf32>
    %118 = vector.multi_reduction <maximumf>, %117, %cst_59 [1] : vector<16x8xf32> to vector<16xf32>
    %119 = vector.shape_cast %118 : vector<16xf32> to vector<16x1xf32>
    %120 = vector.broadcast %119 : vector<16x1xf32> to vector<16x8xf32>
    %121 = arith.subf %117, %120 : vector<16x8xf32>
    %122 = math.exp %121 : vector<16x8xf32>
    %cst_60 = arith.constant dense<0.000000e+00> : vector<16xf32>
    %123 = vector.multi_reduction <add>, %122, %cst_60 [1] : vector<16x8xf32> to vector<16xf32>
    %124 = vector.shape_cast %123 : vector<16xf32> to vector<16x1xf32>
    %125 = tpu.reciprocal %124 {approx = true} : vector<16x1xf32> -> vector<16x1xf32>
    %126 = vector.broadcast %125 : vector<16x1xf32> to vector<16x8xf32>
    %127 = arith.mulf %122, %126 : vector<16x8xf32>
    %128 = vector.extract_strided_slice %93 {offsets = [0, 96], sizes = [8, 32], strides = [1, 1]} : vector<8x128xf32> to vector<8x32xf32>
    %cst_61 = arith.constant dense<0.000000e+00> : vector<16x32xf32>
    %129 = tpu.matmul %127, %128, %cst_61 {dimension_numbers = #tpu.dot_dimension_numbers<[1], [0], [0], [1], [0, 0, 1, 1], [], []>} : vector<16x8xf32>, vector<8x32xf32>, vector<16x32xf32> -> vector<16x32xf32>
    %c0_62 = arith.constant 0 : index
    %c32_63 = arith.constant 32 : index
    %c0_64 = arith.constant 0 : index
    %130 = vector.load %arg15[%c0_62, %c32_63, %c0_64] : memref<2x64x32xf32, #tpu.memory_space<vmem>>, vector<1x32x32xf32>
    %131 = vector.shape_cast %130 : vector<1x32x32xf32> to vector<32x32xf32>
    %cst_65 = arith.constant dense<0.000000e+00> : vector<16x32xf32>
    %132 = tpu.matmul %129, %131, %cst_65 {dimension_numbers = #tpu.dot_dimension_numbers<[1], [0], [0], [1], [0, 0, 1, 1], [], []>} : vector<16x32xf32>, vector<32x32xf32>, vector<16x32xf32> -> vector<16x32xf32>
    %133 = arith.addf %113, %132 : vector<16x32xf32>
    %134 = vector.extract_strided_slice %6 {offsets = [1, 0], sizes = [1, 32], strides = [1, 1]} : vector<3x32xf32> to vector<1x32xf32>
    %135 = vector.shape_cast %134 : vector<1x32xf32> to vector<32xf32>
    %136 = vector.extract_strided_slice %8 {offsets = [1, 0], sizes = [1, 32], strides = [1, 1]} : vector<3x32xf32> to vector<1x32xf32>
    %137 = vector.shape_cast %136 : vector<1x32xf32> to vector<32xf32>
    %cst_66 = arith.constant dense<0.000000e+00> : vector<16xf32>
    %138 = vector.multi_reduction <add>, %133, %cst_66 [1] : vector<16x32xf32> to vector<16xf32>
    %139 = vector.shape_cast %138 : vector<16xf32> to vector<16x1xf32>
    %cst_67 = arith.constant 3.200000e+01 : f32
    %140 = vector.broadcast %cst_67 : f32 to vector<16x1xf32>
    %141 = arith.divf %139, %140 : vector<16x1xf32>
    %142 = vector.broadcast %141 : vector<16x1xf32> to vector<16x32xf32>
    %143 = arith.subf %133, %142 : vector<16x32xf32>
    %144 = arith.mulf %143, %143 : vector<16x32xf32>
    %cst_68 = arith.constant dense<0.000000e+00> : vector<16xf32>
    %145 = vector.multi_reduction <add>, %144, %cst_68 [1] : vector<16x32xf32> to vector<16xf32>
    %146 = vector.shape_cast %145 : vector<16xf32> to vector<16x1xf32>
    %cst_69 = arith.constant 3.200000e+01 : f32
    %147 = vector.broadcast %cst_69 : f32 to vector<16x1xf32>
    %148 = arith.divf %146, %147 : vector<16x1xf32>
    %149 = vector.broadcast %141 : vector<16x1xf32> to vector<16x32xf32>
    %150 = arith.subf %133, %149 : vector<16x32xf32>
    %cst_70 = arith.constant 9.99999997E-7 : f32
    %151 = vector.broadcast %cst_70 : f32 to vector<16x1xf32>
    %152 = arith.addf %148, %151 : vector<16x1xf32>
    %153 = math.rsqrt %152 : vector<16x1xf32>
    %154 = vector.broadcast %153 : vector<16x1xf32> to vector<16x32xf32>
    %155 = arith.mulf %150, %154 : vector<16x32xf32>
    %156 = vector.shape_cast %135 : vector<32xf32> to vector<1x32xf32>
    %157 = vector.broadcast %156 : vector<1x32xf32> to vector<16x32xf32>
    %158 = arith.mulf %155, %157 : vector<16x32xf32>
    %159 = vector.shape_cast %137 : vector<32xf32> to vector<1x32xf32>
    %160 = vector.broadcast %159 : vector<1x32xf32> to vector<16x32xf32>
    %161 = arith.addf %158, %160 : vector<16x32xf32>
    %c0_71 = arith.constant 0 : index
    %c0_72 = arith.constant 0 : index
    %c0_73 = arith.constant 0 : index
    %162 = vector.load %arg16[%c0_71, %c0_72, %c0_73] : memref<2x32x64xf32, #tpu.memory_space<vmem>>, vector<1x32x64xf32>
    %163 = vector.shape_cast %162 : vector<1x32x64xf32> to vector<32x64xf32>
    %cst_74 = arith.constant dense<0.000000e+00> : vector<16x64xf32>
    %164 = tpu.matmul %161, %163, %cst_74 {dimension_numbers = #tpu.dot_dimension_numbers<[1], [0], [0], [1], [0, 0, 1, 1], [], []>} : vector<16x32xf32>, vector<32x64xf32>, vector<16x64xf32> -> vector<16x64xf32>
    %c0_75 = arith.constant 0 : index
    %c0_76 = arith.constant 0 : index
    %c0_77 = arith.constant 0 : index
    %165 = vector.load %arg17[%c0_75, %c0_76, %c0_77] : memref<2x1x64xf32, #tpu.memory_space<vmem>>, vector<1x1x64xf32>
    %166 = vector.shape_cast %165 : vector<1x1x64xf32> to vector<1x64xf32>
    %167 = vector.broadcast %166 : vector<1x64xf32> to vector<16x64xf32>
    %168 = arith.addf %164, %167 : vector<16x64xf32>
    %cst_78 = arith.constant 0.000000e+00 : f32
    %169 = vector.broadcast %cst_78 : f32 to vector<16x64xf32>
    %170 = arith.maximumf %168, %169 : vector<16x64xf32>
    %c0_79 = arith.constant 0 : index
    %c0_80 = arith.constant 0 : index
    %c0_81 = arith.constant 0 : index
    %171 = vector.load %arg18[%c0_79, %c0_80, %c0_81] : memref<2x64x32xf32, #tpu.memory_space<vmem>>, vector<1x64x32xf32>
    %172 = vector.shape_cast %171 : vector<1x64x32xf32> to vector<64x32xf32>
    %cst_82 = arith.constant dense<0.000000e+00> : vector<16x32xf32>
    %173 = tpu.matmul %170, %172, %cst_82 {dimension_numbers = #tpu.dot_dimension_numbers<[1], [0], [0], [1], [0, 0, 1, 1], [], []>} : vector<16x64xf32>, vector<64x32xf32>, vector<16x32xf32> -> vector<16x32xf32>
    %c0_83 = arith.constant 0 : index
    %c0_84 = arith.constant 0 : index
    %c0_85 = arith.constant 0 : index
    %174 = vector.load %arg19[%c0_83, %c0_84, %c0_85] : memref<2x1x32xf32, #tpu.memory_space<vmem>>, vector<1x1x32xf32>
    %175 = vector.shape_cast %174 : vector<1x1x32xf32> to vector<1x32xf32>
    %176 = vector.broadcast %175 : vector<1x32xf32> to vector<16x32xf32>
    %177 = arith.addf %173, %176 : vector<16x32xf32>
    %178 = arith.addf %177, %161 : vector<16x32xf32>
    %179 = vector.extract_strided_slice %6 {offsets = [2, 0], sizes = [1, 32], strides = [1, 1]} : vector<3x32xf32> to vector<1x32xf32>
    %180 = vector.shape_cast %179 : vector<1x32xf32> to vector<32xf32>
    %181 = vector.extract_strided_slice %8 {offsets = [2, 0], sizes = [1, 32], strides = [1, 1]} : vector<3x32xf32> to vector<1x32xf32>
    %182 = vector.shape_cast %181 : vector<1x32xf32> to vector<32xf32>
    %cst_86 = arith.constant dense<0.000000e+00> : vector<16xf32>
    %183 = vector.multi_reduction <add>, %178, %cst_86 [1] : vector<16x32xf32> to vector<16xf32>
    %184 = vector.shape_cast %183 : vector<16xf32> to vector<16x1xf32>
    %cst_87 = arith.constant 3.200000e+01 : f32
    %185 = vector.broadcast %cst_87 : f32 to vector<16x1xf32>
    %186 = arith.divf %184, %185 : vector<16x1xf32>
    %187 = vector.broadcast %186 : vector<16x1xf32> to vector<16x32xf32>
    %188 = arith.subf %178, %187 : vector<16x32xf32>
    %189 = arith.mulf %188, %188 : vector<16x32xf32>
    %cst_88 = arith.constant dense<0.000000e+00> : vector<16xf32>
    %190 = vector.multi_reduction <add>, %189, %cst_88 [1] : vector<16x32xf32> to vector<16xf32>
    %191 = vector.shape_cast %190 : vector<16xf32> to vector<16x1xf32>
    %cst_89 = arith.constant 3.200000e+01 : f32
    %192 = vector.broadcast %cst_89 : f32 to vector<16x1xf32>
    %193 = arith.divf %191, %192 : vector<16x1xf32>
    %194 = vector.broadcast %186 : vector<16x1xf32> to vector<16x32xf32>
    %195 = arith.subf %178, %194 : vector<16x32xf32>
    %cst_90 = arith.constant 9.99999997E-7 : f32
    %196 = vector.broadcast %cst_90 : f32 to vector<16x1xf32>
    %197 = arith.addf %193, %196 : vector<16x1xf32>
    %198 = math.rsqrt %197 : vector<16x1xf32>
    %199 = vector.broadcast %198 : vector<16x1xf32> to vector<16x32xf32>
    %200 = arith.mulf %195, %199 : vector<16x32xf32>
    %201 = vector.shape_cast %180 : vector<32xf32> to vector<1x32xf32>
    %202 = vector.broadcast %201 : vector<1x32xf32> to vector<16x32xf32>
    %203 = arith.mulf %200, %202 : vector<16x32xf32>
    %204 = vector.shape_cast %182 : vector<32xf32> to vector<1x32xf32>
    %205 = vector.broadcast %204 : vector<1x32xf32> to vector<16x32xf32>
    %206 = arith.addf %203, %205 : vector<16x32xf32>
    %c0_91 = arith.constant 0 : index
    %c0_92 = arith.constant 0 : index
    %207 = vector.load %arg5[%c0_91, %c0_92] : memref<16x32xf32, #tpu.memory_space<vmem>>, vector<16x32xf32>
    %c0_93 = arith.constant 0 : index
    %c0_94 = arith.constant 0 : index
    %208 = vector.load %arg6[%c0_93, %c0_94] : memref<16x32xf32, #tpu.memory_space<vmem>>, vector<16x32xf32>
    %c0_95 = arith.constant 0 : index
    %c0_96 = arith.constant 0 : index
    %209 = vector.load %arg8[%c0_95, %c0_96] : memref<8x32xf32, #tpu.memory_space<vmem>>, vector<8x32xf32>
    %c0_97 = arith.constant 0 : index
    %c0_98 = arith.constant 0 : index
    %210 = vector.load %arg7[%c0_97, %c0_98] : memref<16x16xf32, #tpu.memory_space<vmem>>, vector<16x16xf32>
    %c0_99 = arith.constant 0 : index
    %c0_100 = arith.constant 0 : index
    %211 = vector.load %arg9[%c0_99, %c0_100] : memref<16x8xf32, #tpu.memory_space<vmem>>, vector<16x8xf32>
    %c1 = arith.constant 1 : index
    %c0_101 = arith.constant 0 : index
    %c0_102 = arith.constant 0 : index
    %212 = vector.load %arg20[%c1, %c0_101, %c0_102] : memref<2x3x32xf32, #tpu.memory_space<vmem>>, vector<1x3x32xf32>
    %213 = vector.shape_cast %212 : vector<1x3x32xf32> to vector<3x32xf32>
    %c1_103 = arith.constant 1 : index
    %c0_104 = arith.constant 0 : index
    %c0_105 = arith.constant 0 : index
    %214 = vector.load %arg21[%c1_103, %c0_104, %c0_105] : memref<2x3x32xf32, #tpu.memory_space<vmem>>, vector<1x3x32xf32>
    %215 = vector.shape_cast %214 : vector<1x3x32xf32> to vector<3x32xf32>
    %216 = arith.addf %207, %208 : vector<16x32xf32>
    %c1_106 = arith.constant 1 : index
    %c0_107 = arith.constant 0 : index
    %c0_108 = arith.constant 0 : index
    %217 = vector.load %arg10[%c1_106, %c0_107, %c0_108] : memref<2x32x192xf32, #tpu.memory_space<vmem>>, vector<1x32x192xf32>
    %218 = vector.shape_cast %217 : vector<1x32x192xf32> to vector<32x192xf32>
    %cst_109 = arith.constant dense<0.000000e+00> : vector<16x192xf32>
    %219 = tpu.matmul %207, %218, %cst_109 {dimension_numbers = #tpu.dot_dimension_numbers<[1], [0], [0], [1], [0, 0, 1, 1], [], []>} : vector<16x32xf32>, vector<32x192xf32>, vector<16x192xf32> -> vector<16x192xf32>
    %c1_110 = arith.constant 1 : index
    %c0_111 = arith.constant 0 : index
    %c0_112 = arith.constant 0 : index
    %220 = vector.load %arg11[%c1_110, %c0_111, %c0_112] : memref<2x32x192xf32, #tpu.memory_space<vmem>>, vector<1x32x192xf32>
    %221 = vector.shape_cast %220 : vector<1x32x192xf32> to vector<32x192xf32>
    %cst_113 = arith.constant dense<0.000000e+00> : vector<16x192xf32>
    %222 = tpu.matmul %208, %221, %cst_113 {dimension_numbers = #tpu.dot_dimension_numbers<[1], [0], [0], [1], [0, 0, 1, 1], [], []>} : vector<16x32xf32>, vector<32x192xf32>, vector<16x192xf32> -> vector<16x192xf32>
    %223 = arith.addf %219, %222 : vector<16x192xf32>
    %224 = vector.extract_strided_slice %223 {offsets = [0, 0], sizes = [16, 64], strides = [1, 1]} : vector<16x192xf32> to vector<16x64xf32>
    %225 = vector.extract_strided_slice %223 {offsets = [0, 64], sizes = [16, 64], strides = [1, 1]} : vector<16x192xf32> to vector<16x64xf32>
    %226 = vector.extract_strided_slice %223 {offsets = [0, 128], sizes = [16, 64], strides = [1, 1]} : vector<16x192xf32> to vector<16x64xf32>
    %227 = vector.extract_strided_slice %224 {offsets = [0, 0], sizes = [16, 32], strides = [1, 1]} : vector<16x64xf32> to vector<16x32xf32>
    %228 = vector.extract_strided_slice %225 {offsets = [0, 0], sizes = [16, 32], strides = [1, 1]} : vector<16x64xf32> to vector<16x32xf32>
    %cst_114 = arith.constant dense<0.000000e+00> : vector<16x16xf32>
    %229 = tpu.matmul %227, %228, %cst_114 {dimension_numbers = #tpu.dot_dimension_numbers<[1], [1], [0], [0], [0, 0, 1, 0], [], []>} : vector<16x32xf32>, vector<16x32xf32>, vector<16x16xf32> -> vector<16x16xf32>
    %230 = arith.addf %229, %210 : vector<16x16xf32>
    %cst_115 = arith.constant dense<0xFF800000> : vector<16xf32>
    %231 = vector.multi_reduction <maximumf>, %230, %cst_115 [1] : vector<16x16xf32> to vector<16xf32>
    %232 = vector.shape_cast %231 : vector<16xf32> to vector<16x1xf32>
    %233 = vector.broadcast %232 : vector<16x1xf32> to vector<16x16xf32>
    %234 = arith.subf %230, %233 : vector<16x16xf32>
    %235 = math.exp %234 : vector<16x16xf32>
    %cst_116 = arith.constant dense<0.000000e+00> : vector<16xf32>
    %236 = vector.multi_reduction <add>, %235, %cst_116 [1] : vector<16x16xf32> to vector<16xf32>
    %237 = vector.shape_cast %236 : vector<16xf32> to vector<16x1xf32>
    %238 = tpu.reciprocal %237 {approx = true} : vector<16x1xf32> -> vector<16x1xf32>
    %239 = vector.broadcast %238 : vector<16x1xf32> to vector<16x16xf32>
    %240 = arith.mulf %235, %239 : vector<16x16xf32>
    %241 = vector.extract_strided_slice %226 {offsets = [0, 0], sizes = [16, 32], strides = [1, 1]} : vector<16x64xf32> to vector<16x32xf32>
    %cst_117 = arith.constant dense<0.000000e+00> : vector<16x32xf32>
    %242 = tpu.matmul %240, %241, %cst_117 {dimension_numbers = #tpu.dot_dimension_numbers<[1], [0], [0], [1], [0, 0, 1, 1], [], []>} : vector<16x16xf32>, vector<16x32xf32>, vector<16x32xf32> -> vector<16x32xf32>
    %c1_118 = arith.constant 1 : index
    %c0_119 = arith.constant 0 : index
    %c0_120 = arith.constant 0 : index
    %243 = vector.load %arg12[%c1_118, %c0_119, %c0_120] : memref<2x64x32xf32, #tpu.memory_space<vmem>>, vector<1x32x32xf32>
    %244 = vector.shape_cast %243 : vector<1x32x32xf32> to vector<32x32xf32>
    %cst_121 = arith.constant dense<0.000000e+00> : vector<16x32xf32>
    %245 = tpu.matmul %242, %244, %cst_121 {dimension_numbers = #tpu.dot_dimension_numbers<[1], [0], [0], [1], [0, 0, 1, 1], [], []>} : vector<16x32xf32>, vector<32x32xf32>, vector<16x32xf32> -> vector<16x32xf32>
    %246 = arith.addf %216, %245 : vector<16x32xf32>
    %247 = vector.extract_strided_slice %224 {offsets = [0, 32], sizes = [16, 32], strides = [1, 1]} : vector<16x64xf32> to vector<16x32xf32>
    %248 = vector.extract_strided_slice %225 {offsets = [0, 32], sizes = [16, 32], strides = [1, 1]} : vector<16x64xf32> to vector<16x32xf32>
    %cst_122 = arith.constant dense<0.000000e+00> : vector<16x16xf32>
    %249 = tpu.matmul %247, %248, %cst_122 {dimension_numbers = #tpu.dot_dimension_numbers<[1], [1], [0], [0], [0, 0, 1, 0], [], []>} : vector<16x32xf32>, vector<16x32xf32>, vector<16x16xf32> -> vector<16x16xf32>
    %250 = arith.addf %249, %210 : vector<16x16xf32>
    %cst_123 = arith.constant dense<0xFF800000> : vector<16xf32>
    %251 = vector.multi_reduction <maximumf>, %250, %cst_123 [1] : vector<16x16xf32> to vector<16xf32>
    %252 = vector.shape_cast %251 : vector<16xf32> to vector<16x1xf32>
    %253 = vector.broadcast %252 : vector<16x1xf32> to vector<16x16xf32>
    %254 = arith.subf %250, %253 : vector<16x16xf32>
    %255 = math.exp %254 : vector<16x16xf32>
    %cst_124 = arith.constant dense<0.000000e+00> : vector<16xf32>
    %256 = vector.multi_reduction <add>, %255, %cst_124 [1] : vector<16x16xf32> to vector<16xf32>
    %257 = vector.shape_cast %256 : vector<16xf32> to vector<16x1xf32>
    %258 = tpu.reciprocal %257 {approx = true} : vector<16x1xf32> -> vector<16x1xf32>
    %259 = vector.broadcast %258 : vector<16x1xf32> to vector<16x16xf32>
    %260 = arith.mulf %255, %259 : vector<16x16xf32>
    %261 = vector.extract_strided_slice %226 {offsets = [0, 32], sizes = [16, 32], strides = [1, 1]} : vector<16x64xf32> to vector<16x32xf32>
    %cst_125 = arith.constant dense<0.000000e+00> : vector<16x32xf32>
    %262 = tpu.matmul %260, %261, %cst_125 {dimension_numbers = #tpu.dot_dimension_numbers<[1], [0], [0], [1], [0, 0, 1, 1], [], []>} : vector<16x16xf32>, vector<16x32xf32>, vector<16x32xf32> -> vector<16x32xf32>
    %c1_126 = arith.constant 1 : index
    %c32_127 = arith.constant 32 : index
    %c0_128 = arith.constant 0 : index
    %263 = vector.load %arg12[%c1_126, %c32_127, %c0_128] : memref<2x64x32xf32, #tpu.memory_space<vmem>>, vector<1x32x32xf32>
    %264 = vector.shape_cast %263 : vector<1x32x32xf32> to vector<32x32xf32>
    %cst_129 = arith.constant dense<0.000000e+00> : vector<16x32xf32>
    %265 = tpu.matmul %262, %264, %cst_129 {dimension_numbers = #tpu.dot_dimension_numbers<[1], [0], [0], [1], [0, 0, 1, 1], [], []>} : vector<16x32xf32>, vector<32x32xf32>, vector<16x32xf32> -> vector<16x32xf32>
    %266 = arith.addf %246, %265 : vector<16x32xf32>
    %267 = vector.extract_strided_slice %213 {offsets = [0, 0], sizes = [1, 32], strides = [1, 1]} : vector<3x32xf32> to vector<1x32xf32>
    %268 = vector.shape_cast %267 : vector<1x32xf32> to vector<32xf32>
    %269 = vector.extract_strided_slice %215 {offsets = [0, 0], sizes = [1, 32], strides = [1, 1]} : vector<3x32xf32> to vector<1x32xf32>
    %270 = vector.shape_cast %269 : vector<1x32xf32> to vector<32xf32>
    %cst_130 = arith.constant dense<0.000000e+00> : vector<16xf32>
    %271 = vector.multi_reduction <add>, %266, %cst_130 [1] : vector<16x32xf32> to vector<16xf32>
    %272 = vector.shape_cast %271 : vector<16xf32> to vector<16x1xf32>
    %cst_131 = arith.constant 3.200000e+01 : f32
    %273 = vector.broadcast %cst_131 : f32 to vector<16x1xf32>
    %274 = arith.divf %272, %273 : vector<16x1xf32>
    %275 = vector.broadcast %274 : vector<16x1xf32> to vector<16x32xf32>
    %276 = arith.subf %266, %275 : vector<16x32xf32>
    %277 = arith.mulf %276, %276 : vector<16x32xf32>
    %cst_132 = arith.constant dense<0.000000e+00> : vector<16xf32>
    %278 = vector.multi_reduction <add>, %277, %cst_132 [1] : vector<16x32xf32> to vector<16xf32>
    %279 = vector.shape_cast %278 : vector<16xf32> to vector<16x1xf32>
    %cst_133 = arith.constant 3.200000e+01 : f32
    %280 = vector.broadcast %cst_133 : f32 to vector<16x1xf32>
    %281 = arith.divf %279, %280 : vector<16x1xf32>
    %282 = vector.broadcast %274 : vector<16x1xf32> to vector<16x32xf32>
    %283 = arith.subf %266, %282 : vector<16x32xf32>
    %cst_134 = arith.constant 9.99999997E-7 : f32
    %284 = vector.broadcast %cst_134 : f32 to vector<16x1xf32>
    %285 = arith.addf %281, %284 : vector<16x1xf32>
    %286 = math.rsqrt %285 : vector<16x1xf32>
    %287 = vector.broadcast %286 : vector<16x1xf32> to vector<16x32xf32>
    %288 = arith.mulf %283, %287 : vector<16x32xf32>
    %289 = vector.shape_cast %268 : vector<32xf32> to vector<1x32xf32>
    %290 = vector.broadcast %289 : vector<1x32xf32> to vector<16x32xf32>
    %291 = arith.mulf %288, %290 : vector<16x32xf32>
    %292 = vector.shape_cast %270 : vector<32xf32> to vector<1x32xf32>
    %293 = vector.broadcast %292 : vector<1x32xf32> to vector<16x32xf32>
    %294 = arith.addf %291, %293 : vector<16x32xf32>
    %c1_135 = arith.constant 1 : index
    %c0_136 = arith.constant 0 : index
    %c0_137 = arith.constant 0 : index
    %295 = vector.load %arg13[%c1_135, %c0_136, %c0_137] : memref<2x32x64xf32, #tpu.memory_space<vmem>>, vector<1x32x64xf32>
    %296 = vector.shape_cast %295 : vector<1x32x64xf32> to vector<32x64xf32>
    %cst_138 = arith.constant dense<0.000000e+00> : vector<16x64xf32>
    %297 = tpu.matmul %294, %296, %cst_138 {dimension_numbers = #tpu.dot_dimension_numbers<[1], [0], [0], [1], [0, 0, 1, 1], [], []>} : vector<16x32xf32>, vector<32x64xf32>, vector<16x64xf32> -> vector<16x64xf32>
    %c1_139 = arith.constant 1 : index
    %c0_140 = arith.constant 0 : index
    %c0_141 = arith.constant 0 : index
    %298 = vector.load %arg14[%c1_139, %c0_140, %c0_141] : memref<2x32x128xf32, #tpu.memory_space<vmem>>, vector<1x32x128xf32>
    %299 = vector.shape_cast %298 : vector<1x32x128xf32> to vector<32x128xf32>
    %cst_142 = arith.constant dense<0.000000e+00> : vector<8x128xf32>
    %300 = tpu.matmul %209, %299, %cst_142 {dimension_numbers = #tpu.dot_dimension_numbers<[1], [0], [0], [1], [0, 0, 1, 1], [], []>} : vector<8x32xf32>, vector<32x128xf32>, vector<8x128xf32> -> vector<8x128xf32>
    %301 = vector.extract_strided_slice %297 {offsets = [0, 0], sizes = [16, 32], strides = [1, 1]} : vector<16x64xf32> to vector<16x32xf32>
    %302 = vector.extract_strided_slice %300 {offsets = [0, 0], sizes = [8, 32], strides = [1, 1]} : vector<8x128xf32> to vector<8x32xf32>
    %cst_143 = arith.constant dense<0.000000e+00> : vector<16x8xf32>
    %303 = tpu.matmul %301, %302, %cst_143 {dimension_numbers = #tpu.dot_dimension_numbers<[1], [1], [0], [0], [0, 0, 1, 0], [], []>} : vector<16x32xf32>, vector<8x32xf32>, vector<16x8xf32> -> vector<16x8xf32>
    %304 = arith.addf %303, %211 : vector<16x8xf32>
    %cst_144 = arith.constant dense<0xFF800000> : vector<16xf32>
    %305 = vector.multi_reduction <maximumf>, %304, %cst_144 [1] : vector<16x8xf32> to vector<16xf32>
    %306 = vector.shape_cast %305 : vector<16xf32> to vector<16x1xf32>
    %307 = vector.broadcast %306 : vector<16x1xf32> to vector<16x8xf32>
    %308 = arith.subf %304, %307 : vector<16x8xf32>
    %309 = math.exp %308 : vector<16x8xf32>
    %cst_145 = arith.constant dense<0.000000e+00> : vector<16xf32>
    %310 = vector.multi_reduction <add>, %309, %cst_145 [1] : vector<16x8xf32> to vector<16xf32>
    %311 = vector.shape_cast %310 : vector<16xf32> to vector<16x1xf32>
    %312 = tpu.reciprocal %311 {approx = true} : vector<16x1xf32> -> vector<16x1xf32>
    %313 = vector.broadcast %312 : vector<16x1xf32> to vector<16x8xf32>
    %314 = arith.mulf %309, %313 : vector<16x8xf32>
    %315 = vector.extract_strided_slice %300 {offsets = [0, 64], sizes = [8, 32], strides = [1, 1]} : vector<8x128xf32> to vector<8x32xf32>
    %cst_146 = arith.constant dense<0.000000e+00> : vector<16x32xf32>
    %316 = tpu.matmul %314, %315, %cst_146 {dimension_numbers = #tpu.dot_dimension_numbers<[1], [0], [0], [1], [0, 0, 1, 1], [], []>} : vector<16x8xf32>, vector<8x32xf32>, vector<16x32xf32> -> vector<16x32xf32>
    %c1_147 = arith.constant 1 : index
    %c0_148 = arith.constant 0 : index
    %c0_149 = arith.constant 0 : index
    %317 = vector.load %arg15[%c1_147, %c0_148, %c0_149] : memref<2x64x32xf32, #tpu.memory_space<vmem>>, vector<1x32x32xf32>
    %318 = vector.shape_cast %317 : vector<1x32x32xf32> to vector<32x32xf32>
    %cst_150 = arith.constant dense<0.000000e+00> : vector<16x32xf32>
    %319 = tpu.matmul %316, %318, %cst_150 {dimension_numbers = #tpu.dot_dimension_numbers<[1], [0], [0], [1], [0, 0, 1, 1], [], []>} : vector<16x32xf32>, vector<32x32xf32>, vector<16x32xf32> -> vector<16x32xf32>
    %320 = arith.addf %294, %319 : vector<16x32xf32>
    %321 = vector.extract_strided_slice %297 {offsets = [0, 32], sizes = [16, 32], strides = [1, 1]} : vector<16x64xf32> to vector<16x32xf32>
    %322 = vector.extract_strided_slice %300 {offsets = [0, 32], sizes = [8, 32], strides = [1, 1]} : vector<8x128xf32> to vector<8x32xf32>
    %cst_151 = arith.constant dense<0.000000e+00> : vector<16x8xf32>
    %323 = tpu.matmul %321, %322, %cst_151 {dimension_numbers = #tpu.dot_dimension_numbers<[1], [1], [0], [0], [0, 0, 1, 0], [], []>} : vector<16x32xf32>, vector<8x32xf32>, vector<16x8xf32> -> vector<16x8xf32>
    %324 = arith.addf %323, %211 : vector<16x8xf32>
    %cst_152 = arith.constant dense<0xFF800000> : vector<16xf32>
    %325 = vector.multi_reduction <maximumf>, %324, %cst_152 [1] : vector<16x8xf32> to vector<16xf32>
    %326 = vector.shape_cast %325 : vector<16xf32> to vector<16x1xf32>
    %327 = vector.broadcast %326 : vector<16x1xf32> to vector<16x8xf32>
    %328 = arith.subf %324, %327 : vector<16x8xf32>
    %329 = math.exp %328 : vector<16x8xf32>
    %cst_153 = arith.constant dense<0.000000e+00> : vector<16xf32>
    %330 = vector.multi_reduction <add>, %329, %cst_153 [1] : vector<16x8xf32> to vector<16xf32>
    %331 = vector.shape_cast %330 : vector<16xf32> to vector<16x1xf32>
    %332 = tpu.reciprocal %331 {approx = true} : vector<16x1xf32> -> vector<16x1xf32>
    %333 = vector.broadcast %332 : vector<16x1xf32> to vector<16x8xf32>
    %334 = arith.mulf %329, %333 : vector<16x8xf32>
    %335 = vector.extract_strided_slice %300 {offsets = [0, 96], sizes = [8, 32], strides = [1, 1]} : vector<8x128xf32> to vector<8x32xf32>
    %cst_154 = arith.constant dense<0.000000e+00> : vector<16x32xf32>
    %336 = tpu.matmul %334, %335, %cst_154 {dimension_numbers = #tpu.dot_dimension_numbers<[1], [0], [0], [1], [0, 0, 1, 1], [], []>} : vector<16x8xf32>, vector<8x32xf32>, vector<16x32xf32> -> vector<16x32xf32>
    %c1_155 = arith.constant 1 : index
    %c32_156 = arith.constant 32 : index
    %c0_157 = arith.constant 0 : index
    %337 = vector.load %arg15[%c1_155, %c32_156, %c0_157] : memref<2x64x32xf32, #tpu.memory_space<vmem>>, vector<1x32x32xf32>
    %338 = vector.shape_cast %337 : vector<1x32x32xf32> to vector<32x32xf32>
    %cst_158 = arith.constant dense<0.000000e+00> : vector<16x32xf32>
    %339 = tpu.matmul %336, %338, %cst_158 {dimension_numbers = #tpu.dot_dimension_numbers<[1], [0], [0], [1], [0, 0, 1, 1], [], []>} : vector<16x32xf32>, vector<32x32xf32>, vector<16x32xf32> -> vector<16x32xf32>
    %340 = arith.addf %320, %339 : vector<16x32xf32>
    %341 = vector.extract_strided_slice %213 {offsets = [1, 0], sizes = [1, 32], strides = [1, 1]} : vector<3x32xf32> to vector<1x32xf32>
    %342 = vector.shape_cast %341 : vector<1x32xf32> to vector<32xf32>
    %343 = vector.extract_strided_slice %215 {offsets = [1, 0], sizes = [1, 32], strides = [1, 1]} : vector<3x32xf32> to vector<1x32xf32>
    %344 = vector.shape_cast %343 : vector<1x32xf32> to vector<32xf32>
    %cst_159 = arith.constant dense<0.000000e+00> : vector<16xf32>
    %345 = vector.multi_reduction <add>, %340, %cst_159 [1] : vector<16x32xf32> to vector<16xf32>
    %346 = vector.shape_cast %345 : vector<16xf32> to vector<16x1xf32>
    %cst_160 = arith.constant 3.200000e+01 : f32
    %347 = vector.broadcast %cst_160 : f32 to vector<16x1xf32>
    %348 = arith.divf %346, %347 : vector<16x1xf32>
    %349 = vector.broadcast %348 : vector<16x1xf32> to vector<16x32xf32>
    %350 = arith.subf %340, %349 : vector<16x32xf32>
    %351 = arith.mulf %350, %350 : vector<16x32xf32>
    %cst_161 = arith.constant dense<0.000000e+00> : vector<16xf32>
    %352 = vector.multi_reduction <add>, %351, %cst_161 [1] : vector<16x32xf32> to vector<16xf32>
    %353 = vector.shape_cast %352 : vector<16xf32> to vector<16x1xf32>
    %cst_162 = arith.constant 3.200000e+01 : f32
    %354 = vector.broadcast %cst_162 : f32 to vector<16x1xf32>
    %355 = arith.divf %353, %354 : vector<16x1xf32>
    %356 = vector.broadcast %348 : vector<16x1xf32> to vector<16x32xf32>
    %357 = arith.subf %340, %356 : vector<16x32xf32>
    %cst_163 = arith.constant 9.99999997E-7 : f32
    %358 = vector.broadcast %cst_163 : f32 to vector<16x1xf32>
    %359 = arith.addf %355, %358 : vector<16x1xf32>
    %360 = math.rsqrt %359 : vector<16x1xf32>
    %361 = vector.broadcast %360 : vector<16x1xf32> to vector<16x32xf32>
    %362 = arith.mulf %357, %361 : vector<16x32xf32>
    %363 = vector.shape_cast %342 : vector<32xf32> to vector<1x32xf32>
    %364 = vector.broadcast %363 : vector<1x32xf32> to vector<16x32xf32>
    %365 = arith.mulf %362, %364 : vector<16x32xf32>
    %366 = vector.shape_cast %344 : vector<32xf32> to vector<1x32xf32>
    %367 = vector.broadcast %366 : vector<1x32xf32> to vector<16x32xf32>
    %368 = arith.addf %365, %367 : vector<16x32xf32>
    %c1_164 = arith.constant 1 : index
    %c0_165 = arith.constant 0 : index
    %c0_166 = arith.constant 0 : index
    %369 = vector.load %arg16[%c1_164, %c0_165, %c0_166] : memref<2x32x64xf32, #tpu.memory_space<vmem>>, vector<1x32x64xf32>
    %370 = vector.shape_cast %369 : vector<1x32x64xf32> to vector<32x64xf32>
    %cst_167 = arith.constant dense<0.000000e+00> : vector<16x64xf32>
    %371 = tpu.matmul %368, %370, %cst_167 {dimension_numbers = #tpu.dot_dimension_numbers<[1], [0], [0], [1], [0, 0, 1, 1], [], []>} : vector<16x32xf32>, vector<32x64xf32>, vector<16x64xf32> -> vector<16x64xf32>
    %c1_168 = arith.constant 1 : index
    %c0_169 = arith.constant 0 : index
    %c0_170 = arith.constant 0 : index
    %372 = vector.load %arg17[%c1_168, %c0_169, %c0_170] : memref<2x1x64xf32, #tpu.memory_space<vmem>>, vector<1x1x64xf32>
    %373 = vector.shape_cast %372 : vector<1x1x64xf32> to vector<1x64xf32>
    %374 = vector.broadcast %373 : vector<1x64xf32> to vector<16x64xf32>
    %375 = arith.addf %371, %374 : vector<16x64xf32>
    %cst_171 = arith.constant 0.000000e+00 : f32
    %376 = vector.broadcast %cst_171 : f32 to vector<16x64xf32>
    %377 = arith.maximumf %375, %376 : vector<16x64xf32>
    %c1_172 = arith.constant 1 : index
    %c0_173 = arith.constant 0 : index
    %c0_174 = arith.constant 0 : index
    %378 = vector.load %arg18[%c1_172, %c0_173, %c0_174] : memref<2x64x32xf32, #tpu.memory_space<vmem>>, vector<1x64x32xf32>
    %379 = vector.shape_cast %378 : vector<1x64x32xf32> to vector<64x32xf32>
    %cst_175 = arith.constant dense<0.000000e+00> : vector<16x32xf32>
    %380 = tpu.matmul %377, %379, %cst_175 {dimension_numbers = #tpu.dot_dimension_numbers<[1], [0], [0], [1], [0, 0, 1, 1], [], []>} : vector<16x64xf32>, vector<64x32xf32>, vector<16x32xf32> -> vector<16x32xf32>
    %c1_176 = arith.constant 1 : index
    %c0_177 = arith.constant 0 : index
    %c0_178 = arith.constant 0 : index
    %381 = vector.load %arg19[%c1_176, %c0_177, %c0_178] : memref<2x1x32xf32, #tpu.memory_space<vmem>>, vector<1x1x32xf32>
    %382 = vector.shape_cast %381 : vector<1x1x32xf32> to vector<1x32xf32>
    %383 = vector.broadcast %382 : vector<1x32xf32> to vector<16x32xf32>
    %384 = arith.addf %380, %383 : vector<16x32xf32>
    %385 = arith.addf %384, %368 : vector<16x32xf32>
    %386 = vector.extract_strided_slice %213 {offsets = [2, 0], sizes = [1, 32], strides = [1, 1]} : vector<3x32xf32> to vector<1x32xf32>
    %387 = vector.shape_cast %386 : vector<1x32xf32> to vector<32xf32>
    %388 = vector.extract_strided_slice %215 {offsets = [2, 0], sizes = [1, 32], strides = [1, 1]} : vector<3x32xf32> to vector<1x32xf32>
    %389 = vector.shape_cast %388 : vector<1x32xf32> to vector<32xf32>
    %cst_179 = arith.constant dense<0.000000e+00> : vector<16xf32>
    %390 = vector.multi_reduction <add>, %385, %cst_179 [1] : vector<16x32xf32> to vector<16xf32>
    %391 = vector.shape_cast %390 : vector<16xf32> to vector<16x1xf32>
    %cst_180 = arith.constant 3.200000e+01 : f32
    %392 = vector.broadcast %cst_180 : f32 to vector<16x1xf32>
    %393 = arith.divf %391, %392 : vector<16x1xf32>
    %394 = vector.broadcast %393 : vector<16x1xf32> to vector<16x32xf32>
    %395 = arith.subf %385, %394 : vector<16x32xf32>
    %396 = arith.mulf %395, %395 : vector<16x32xf32>
    %cst_181 = arith.constant dense<0.000000e+00> : vector<16xf32>
    %397 = vector.multi_reduction <add>, %396, %cst_181 [1] : vector<16x32xf32> to vector<16xf32>
    %398 = vector.shape_cast %397 : vector<16xf32> to vector<16x1xf32>
    %cst_182 = arith.constant 3.200000e+01 : f32
    %399 = vector.broadcast %cst_182 : f32 to vector<16x1xf32>
    %400 = arith.divf %398, %399 : vector<16x1xf32>
    %401 = vector.broadcast %393 : vector<16x1xf32> to vector<16x32xf32>
    %402 = arith.subf %385, %401 : vector<16x32xf32>
    %cst_183 = arith.constant 9.99999997E-7 : f32
    %403 = vector.broadcast %cst_183 : f32 to vector<16x1xf32>
    %404 = arith.addf %400, %403 : vector<16x1xf32>
    %405 = math.rsqrt %404 : vector<16x1xf32>
    %406 = vector.broadcast %405 : vector<16x1xf32> to vector<16x32xf32>
    %407 = arith.mulf %402, %406 : vector<16x32xf32>
    %408 = vector.shape_cast %387 : vector<32xf32> to vector<1x32xf32>
    %409 = vector.broadcast %408 : vector<1x32xf32> to vector<16x32xf32>
    %410 = arith.mulf %407, %409 : vector<16x32xf32>
    %411 = vector.shape_cast %389 : vector<32xf32> to vector<1x32xf32>
    %412 = vector.broadcast %411 : vector<1x32xf32> to vector<16x32xf32>
    %413 = arith.addf %410, %412 : vector<16x32xf32>
    %c0_184 = arith.constant 0 : index
    %c0_185 = arith.constant 0 : index
    %414 = vector.load %arg22[%c0_184, %c0_185] : memref<16x16xf32, #tpu.memory_space<vmem>>, vector<16x16xf32>
    %cst_186 = arith.constant dense<0.000000e+00> : vector<16x32xf32>
    %415 = tpu.matmul %414, %206, %cst_186 {dimension_numbers = #tpu.dot_dimension_numbers<[1], [0], [0], [1], [0, 0, 1, 1], [], []>} : vector<16x16xf32>, vector<16x32xf32>, vector<16x32xf32> -> vector<16x32xf32>
    %c0_187 = arith.constant 0 : index
    %c0_188 = arith.constant 0 : index
    %416 = vector.load %arg23[%c0_187, %c0_188] : memref<16x16xf32, #tpu.memory_space<vmem>>, vector<16x16xf32>
    %cst_189 = arith.constant dense<0.000000e+00> : vector<16x32xf32>
    %417 = tpu.matmul %416, %206, %cst_189 {dimension_numbers = #tpu.dot_dimension_numbers<[1], [0], [0], [1], [0, 0, 1, 1], [], []>} : vector<16x16xf32>, vector<16x32xf32>, vector<16x32xf32> -> vector<16x32xf32>
    %c0_190 = arith.constant 0 : index
    %c0_191 = arith.constant 0 : index
    %418 = vector.load %arg24[%c0_190, %c0_191] : memref<96x192xf32, #tpu.memory_space<vmem>>, vector<32x192xf32>
    %cst_192 = arith.constant dense<0.000000e+00> : vector<16x192xf32>
    %419 = tpu.matmul %415, %418, %cst_192 {dimension_numbers = #tpu.dot_dimension_numbers<[1], [0], [0], [1], [0, 0, 1, 1], [], []>} : vector<16x32xf32>, vector<32x192xf32>, vector<16x192xf32> -> vector<16x192xf32>
    %c32_193 = arith.constant 32 : index
    %c0_194 = arith.constant 0 : index
    %420 = vector.load %arg24[%c32_193, %c0_194] : memref<96x192xf32, #tpu.memory_space<vmem>>, vector<32x192xf32>
    %cst_195 = arith.constant dense<0.000000e+00> : vector<16x192xf32>
    %421 = tpu.matmul %417, %420, %cst_195 {dimension_numbers = #tpu.dot_dimension_numbers<[1], [0], [0], [1], [0, 0, 1, 1], [], []>} : vector<16x32xf32>, vector<32x192xf32>, vector<16x192xf32> -> vector<16x192xf32>
    %422 = arith.addf %419, %421 : vector<16x192xf32>
    %c64 = arith.constant 64 : index
    %c0_196 = arith.constant 0 : index
    %423 = vector.load %arg24[%c64, %c0_196] : memref<96x192xf32, #tpu.memory_space<vmem>>, vector<32x192xf32>
    %cst_197 = arith.constant dense<0.000000e+00> : vector<16x192xf32>
    %424 = tpu.matmul %413, %423, %cst_197 {dimension_numbers = #tpu.dot_dimension_numbers<[1], [0], [0], [1], [0, 0, 1, 1], [], []>} : vector<16x32xf32>, vector<32x192xf32>, vector<16x192xf32> -> vector<16x192xf32>
    %425 = arith.addf %422, %424 : vector<16x192xf32>
    %426 = vector.extract_strided_slice %425 {offsets = [0, 0], sizes = [16, 96], strides = [1, 1]} : vector<16x192xf32> to vector<16x96xf32>
    %427 = arith.negf %426 : vector<16x96xf32>
    %428 = math.exp %427 : vector<16x96xf32>
    %cst_198 = arith.constant 1.000000e+00 : f32
    %429 = vector.broadcast %cst_198 : f32 to vector<16x96xf32>
    %430 = arith.addf %429, %428 : vector<16x96xf32>
    %431 = arith.divf %429, %430 : vector<16x96xf32>
    %432 = vector.extract_strided_slice %425 {offsets = [0, 96], sizes = [16, 96], strides = [1, 1]} : vector<16x192xf32> to vector<16x96xf32>
    %433 = math.tanh %432 : vector<16x96xf32>
    %434 = arith.mulf %431, %433 : vector<16x96xf32>
    %c0_199 = arith.constant 0 : index
    %c0_200 = arith.constant 0 : index
    %435 = vector.load %arg25[%c0_199, %c0_200] : memref<16x96xf32, #tpu.memory_space<vmem>>, vector<16x96xf32>
    %436 = arith.mulf %434, %435 : vector<16x96xf32>
    %c0_201 = arith.constant 0 : index
    %c0_202 = arith.constant 0 : index
    %437 = vector.load %arg26[%c0_201, %c0_202] : memref<96x32xf32, #tpu.memory_space<vmem>>, vector<96x32xf32>
    %cst_203 = arith.constant dense<0.000000e+00> : vector<16x32xf32>
    %438 = tpu.matmul %436, %437, %cst_203 {dimension_numbers = #tpu.dot_dimension_numbers<[1], [0], [0], [1], [0, 0, 1, 1], [], []>} : vector<16x96xf32>, vector<96x32xf32>, vector<16x32xf32> -> vector<16x32xf32>
    %439 = arith.negf %438 : vector<16x32xf32>
    %440 = math.exp %439 : vector<16x32xf32>
    %cst_204 = arith.constant 1.000000e+00 : f32
    %441 = vector.broadcast %cst_204 : f32 to vector<16x32xf32>
    %442 = arith.addf %441, %440 : vector<16x32xf32>
    %443 = arith.divf %441, %442 : vector<16x32xf32>
    %c0_205 = arith.constant 0 : index
    %c0_206 = arith.constant 0 : index
    %444 = vector.load %arg27[%c0_205, %c0_206] : memref<16x32xf32, #tpu.memory_space<vmem>>, vector<16x32xf32>
    %445 = arith.addf %443, %444 : vector<16x32xf32>
    %c0_207 = arith.constant 0 : index
    %c0_208 = arith.constant 0 : index
    %446 = vector.load %arg28[%c0_207, %c0_208] : memref<32x128xf32, #tpu.memory_space<vmem>>, vector<32x128xf32>
    %cst_209 = arith.constant dense<0.000000e+00> : vector<16x128xf32>
    %447 = tpu.matmul %445, %446, %cst_209 {dimension_numbers = #tpu.dot_dimension_numbers<[1], [0], [0], [1], [0, 0, 1, 1], [], []>} : vector<16x32xf32>, vector<32x128xf32>, vector<16x128xf32> -> vector<16x128xf32>
    %c0_210 = arith.constant 0 : index
    %c0_211 = arith.constant 0 : index
    %448 = vector.load %arg29[%c0_210, %c0_211] : memref<16x128xf32, #tpu.memory_space<vmem>>, vector<16x128xf32>
    tpu.vector_store %arg29[%c0_210, %c0_211], %447 {strides = array<i32>} : memref<16x128xf32, #tpu.memory_space<vmem>>, vector<16x128xf32>,
    return
  }
}

</mosaic_0001>

<bundles_post_ra>
// kernel: fwd.1
= control target key start
LH: loop header
LB: loop body
LE: loop exit
PB: predicated region body
PF: predicated region fallthrough
CT: control target
= control target key end

     0   :  { %s5599_s3 = smov 11   ;;  %v5600_v0 = vmov 0.0   ;;  %s5601_s7 = smov 10   ;;  %vm151_vm0 = vcmask 261120   ;;  %vm407_vm2 = vcmask 130048   ;;  %vm5614_vm3 = vmmov 0   ;;  %s6290_s0 = inlined_call_operand.smem [shape: u32[30], index: -1, kind: input, shape index: {}] }
   0x1   :  { %s5642_s6 = sld [smem:[%s6290_s0 + %s5599_s3]]   ;;  %222 = vmatprep.mubr.f32.mxu0 %v5600_v0  ;;  %s5602_s11 = smov 1   ;;  %vm5711_vm1 = vmpackc.low %vm151_vm0, %vm151_vm0  ;;  %vm1172_vm4 = vcmask 64512   ;;  %vm1793_vm5 = vcmask 523264   ;;  %vm4208_vm6 = vcmask 785408  }
   0x2   :  { %s5648_s10 = sld [smem:[%s6290_s0 + %s5601_s7]]   ;;  %s5603_s18 = smov 96  }
   0x3   :  { %s5656_s14 = sld [smem:[%s6290_s0 + %s5602_s11]]   ;;  %s5604_s19 = smov 64  }
   0x4   :  { %s1_s17 = sld [smem:[%s6290_s0]]   ;;  %s5605_s20 = smov 32  }
   0x5   :  { %s5606_s21 = smov 2   ;;  %s5607_s25 = smov 12  }
   0x6   :  { %s4398_s24 = sld [smem:[%s6290_s0 + %s5606_s21]]   ;;  %s5608_s29 = smov 13  }
   0x7   :  { %v144_v1 = vld [vmem:[%s5642_s6 + $0x8] sm:$0xff]  ;;  %v146_v2 = vld [vmem:[%s5642_s6 + $0x18] sm:$0xff]  ;;  %v143_v3 = vld [vmem:[%s5642_s6] sm:$0xff]  ;;  %s5742_s28 = sld [smem:[%s6290_s0 + %s5607_s25]]   ;;  %s5610_s3 = smov 20  }
   0x8   :  { %v5112_v4 = vpack.c.bf16 %v146_v2, %v144_v1  ;;  %v145_v5 = vld [vmem:[%s5642_s6 + $0x10] sm:$0xff]  ;;  %v148_v6 = vld [vmem:[%s5642_s6 + $0x28] sm:$0xff]  ;;  %v150_v7 = vld [vmem:[%s5642_s6 + $0x38] sm:$0xff]  ;;  %s5772_s2 = sld [smem:[%s6290_s0 + %s5608_s29]]   ;;  %s5611_s8 = smov 21  }
   0x9   :  { %v5114_v8 = vpack.c.bf16 %v145_v5, %v143_v3  ;;  %v5116_v9 = vpack.c.bf16 %v150_v7, %v148_v6  ;;  %v147_v10 = vld [vmem:[%s5642_s6 + $0x20] sm:$0xff]  ;;  %v149_v11 = vld [vmem:[%s5642_s6 + $0x30] sm:$0xff]  ;;  %v136_v12 = vld [vmem:[%s5648_s10 + $0x8] sm:$0xff]  ;;  %s5782_s7 = sld [smem:[%s6290_s0 + %s5610_s3]]   ;;  %s5612_s13 = smov 14  }
   0xa   :  { %5113 = vmatprep.subr.bf16.mxu0 %v5112_v4  ;;  %v138_v13 = vld [vmem:[%s5648_s10 + $0x18] sm:$0xff]  ;;  %v5118_v14 = vpack.c.bf16 %v149_v11, %v147_v10  ;;  %v135_v16 = vld [vmem:[%s5648_s10] sm:$0xff]  ;;  %v137_v17 = vld [vmem:[%s5648_s10 + $0x10] sm:$0xff]  ;;  %s5787_s12 = sld [smem:[%s6290_s0 + %s5611_s8]]   ;;  %s5616_s29 = smov 15  }
   0xb   :  { %5115 = vmatpush1.bf16.msra.mxu0 %v5114_v8  ;;  %v5120_v15 = vpack.c.bf16 %v138_v13, %v136_v12  ;;  %v140_v18 = vld [vmem:[%s5648_s10 + $0x28] sm:$0xff]  ;;  %v142_v19 = vld [vmem:[%s5648_s10 + $0x38] sm:$0xff]  ;;  %v5670_v20 = vld [vmem:[%s5656_s14] sm:$0xff]  ;;  %v5122_v21 = vpack.c.bf16 %v137_v17, %v135_v16  ;;  %s5800_s16 = sld [smem:[%s6290_s0 + %s5612_s13]]   ;;  %s5617_s4 = smov 16  }
   0xc   :  { %5117 = vmatprep.subr.bf16.mxu0 %v5116_v9  ;;  %v5124_v22 = vpack.c.bf16 %v142_v19, %v140_v18  ;;  %v139_v23 = vld [vmem:[%s5648_s10 + $0x20] sm:$0xff]  ;;  %v141_v24 = vld [vmem:[%s5648_s10 + $0x30] sm:$0xff]  ;;  %v5681_v25 = vld [vmem:[%s5656_s14 + $0x8] sm:$0xff]  ;;  %s5858_s3 = sld [smem:[%s6290_s0 + %s5616_s29]]   ;;  %s5618_s11 = smov 18  }
   0xd   :  { %v5126_v26 = vpack.c.bf16 %v141_v24, %v139_v23  ;;  %v5686_v27 = vld [vmem:[%s1_s17] sm:$0xff]  ;;  %v5691_v28 = vld [vmem:[%s1_s17 + $0x8] sm:$0xff]  ;;  %s5613_s17 = smov 3   ;;  %s5897_s9 = sld [smem:[%s6290_s0 + %s5617_s4]]  }
   0xe   :  { %v128_v47 = vld [vmem:[%s4398_s24 + $0x8] sm:$0xff]  ;;  %v127_v48 = vld [vmem:[%s4398_s24] sm:$0xff]  ;;  %s4399_s23 = sld [smem:[%s6290_s0 + %s5613_s17]]   ;;  %s5615_s24 = smov 4  }
   0xf   :  { %5119 = vmatpush1.bf16.msra.mxu0 %v5118_v14  ;;  %v511_v13 = vld [vmem:[%s5742_s28] sm:$0xff]  ;;  %v512_v14 = vld [vmem:[%s5742_s28 + $0x8] sm:$0xff]  ;;  %s4400_s27 = sld [smem:[%s6290_s0 + %s5615_s24]]   ;;  %s5619_s17 = smov 6  }
  0x10   :  { %5121 = vmatprep.subr.bf16.mxu0 %v5120_v15  ;;  %v5138_v15 = vpack.c.bf16 %v512_v14, %v511_v13  ;;  %s5908_s15 = sld [smem:[%s6290_s0 + %s5618_s11]]   ;;  %s5622_s1 = smov 7  }
  0x11   :  { %s4403_s8 = sld [smem:[%s6290_s0 + %s5622_s1]]  }
  0x12   :  { %4426 = vmatmul.mubr.msk.f32.vlgmr.msra.gmra.mrb[0].mxu0 %vm151_vm0, %v5670_v20 }
  0x13   :  { %5123 = vmatpush1.bf16.msra.mxu0 %v5122_v21  ;;  %228 = vmatprep.mubr.f32.mxu0 %v5600_v0 }
  0x14   :  { %5125 = vmatprep.subr.bf16.mxu0 %v5124_v22 }
  0x16   :  { %4427 = vmatmul.mubr.msk.f32.gmra.mrb[2].mxu0 %vm151_vm0, %v5681_v25 }
  0x17   :  { %5127 = vmatpush1.bf16.msra.mxu0 %v5126_v26  ;;  %305 = vmatprep.mubr.f32.mxu0 %v5600_v0  ;;  %v513_v26 = vld [vmem:[%s5742_s28 + $0x10] sm:$0xff] }
  0x1a   :  { %4428 = vmatmul.mubr.msk.f32.vlgmr.msra.gmra.mrb[0].mxu0 %vm151_vm0, %v5686_v27 }
  0x1b   :  { %311 = vmatprep.mubr.f32.mxu0 %v5600_v0 }
  0x1e   :  { %4429 = vmatmul.mubr.msk.f32.gmra.mrb[2].mxu0 %vm151_vm0, %v5691_v28 }
  0xed   :  { %v307_v29 = vpop.f32.mrb[0].mxu0 }
  0xee   :  { %598 = vrot.lane.b32.xlu1 %v307_v29, %s5603_s18  ;;  %v5696_v30 = vpop.f32.mrb[1].mxu0  ;;  %4776 = vmatprep.mubr.msk.f32.mxu1 %vm151_vm0, %v307_v29 }
  0xf1   :  { %v313_v31 = vpop.f32.mrb[2].mxu0 }
  0xf2   :  { %600 = vrot.lane.b32.xlu1 %v313_v31, %s5603_s18  ;;  %v5700_v32 = vpop.f32.mrb[3].mxu0  ;;  %v5455_v33 = vpack.i.bf16 %v313_v31, %v307_v29  ;;  %v514_v29 = vld [vmem:[%s5742_s28 + $0x18] sm:$0xff] }
  0xf3   :  { %v5465_v34 = vpack.i.bf16 %v5700_v32, %v5696_v30  ;;  %v5134_v35 = vpack.c.bf16 %v5700_v32, %v5696_v30 }
  0xf4   :  { %5456 = vrot.lane.b32.xlu0 %v5455_v33, %s5604_s19 }
  0xf8   :  { %5461 = vrot.lane.b32.xlu0 %v5455_v33, %s5605_s20  ;;  %v5142_v33 = vpack.c.bf16 %v514_v29, %v513_v26 }
 0x160   :  { %v599_v36 = vpop.permute.xlu1 %598 }
 0x161   :  { %4801 = vmatprep.mubr.msk.f32.mxu0 %vm151_vm0, %v599_v36 }
 0x164   :  { %v601_v46 = vpop.permute.xlu1 %600 }
 0x166   :  { %v5457_v37 = vpop.permute.xlu0 %5456 }
 0x167   :  { %v5459_v38 = vunpack.i.h.bf16 %v5457_v37  ;;  %v5458_v39 = vunpack.i.l.bf16 %v5457_v37 }
 0x169   :  { %v5128_v41 = vpack.c.bf16 %v5459_v38, %v5458_v39 }
 0x16a   :  { %v5462_v42 = vpop.permute.xlu0 %5461 }
 0x16b   :  { %v5464_v43 = vunpack.i.h.bf16 %v5462_v42  ;;  %v5463_v44 = vunpack.i.l.bf16 %v5462_v42  ;;  %5130 = vmatprep.subr.msk.bf16.mxu1 %vm5711_vm1, %v5128_v41  ;;  %v801_v42 = vld [vmem:[%s5742_s28 + $0x28] sm:$0xff] }
 0x16c   :  { %5133 = vmatpush3.bf16.xpose.msk.msra.mxu1 %vm5711_vm1, %v5128_v41  ;;  %v800_v41 = vld [vmem:[%s5742_s28 + $0x20] sm:$0xff] }
 0x16d   :  { %v5146_v45 = vpack.c.bf16 %v5464_v43, %v5463_v44  ;;  %5135 = vmatprep.subr.bf16.mxu1 %v5134_v35 }
 0x16f   :  { %5148 = vmatprep.subr.msk.bf16.mxu0 %vm5711_vm1, %v5146_v45 }
 0x170   :  { %5151 = vmatpush3.bf16.xpose.msk.msra.mxu0 %vm5711_vm1, %v5146_v45 }
 0x173   :  { %4777 = vmatmul.mubr.msk.f32.vlgmr.msra.gmra.mrb[0].mxu1 %vm151_vm0, %v313_v31 }
 0x174   :  { %5137 = vmatpush3.bf16.msra.mxu1 %v5134_v35 }
 0x175   :  { %5139 = vmatprep.subr.bf16.mxu1 %v5138_v15 }
 0x177   :  { %4802 = vmatmul.mubr.msk.f32.vlgmr.msra.gmra.mrb[4].mxu0 %vm151_vm0, %v601_v46  ;;  %v5156_v46 = vpack.c.bf16 %v801_v42, %v800_v41  ;;  %v1013_v42 = vld [vmem:[%s5800_s16 + $0x10] sm:$0xff] }
 0x246   :  { %v4778_v49 = vpop.f32.mrb[0].mxu1 }
 0x247   :  { %v404_v50 = vadd.f32 %v4778_v49, %v128_v47  ;;  %v398_v51 = vpop.f32.mrb[1].mxu1  ;;  %v802_v49 = vld [vmem:[%s5742_s28 + $0x30] sm:$0xff] }
 0x248   :  { %v399_v52 = vadd.f32 %v398_v51, %v127_v48 }
 0x249   :  { %v411_v53 = vsel %vm407_vm2, %v404_v50, -inf }
 0x24a   :  { %412 = vmax.xlane.f32.xlu1 %v411_v53  ;;  %v4803_v54 = vpop.f32.mrb[4].mxu0  ;;  %v408_v55 = vsel %vm407_vm2, %v399_v52, -inf }
 0x24b   :  { %v686_v56 = vadd.f32 %v4803_v54, %v128_v47  ;;  %409 = vmax.xlane.f32.xlu0 %v408_v55  ;;  %v680_v57 = vpop.f32.mrb[5].mxu0  ;;  %v133_v55 = vadd.f32 %v5670_v20, %v5686_v27 }
 0x24c   :  { %v681_v58 = vadd.f32 %v680_v57, %v127_v48 }
 0x24d   :  { %v692_v12 = vsel %vm407_vm2, %v686_v56, -inf }
 0x24e   :  { %v689_v59 = vsel %vm407_vm2, %v681_v58, -inf }
 0x24f   :  { %690 = vmax.xlane.f32.xlu1 %v689_v59 }
 0x2d7   :  { %v413_v60 = vpop.xlane.xlu1 %412 }
 0x2d8   :  { %v415_v61 = vsub.f32 %v404_v50, %v413_v60  ;;  %v410_v62 = vpop.xlane.xlu0 %409  ;;  %v803_v50 = vld [vmem:[%s5742_s28 + $0x38] sm:$0xff] }
 0x2d9   :  { %v414_v63 = vsub.f32 %v399_v52, %v410_v62  ;;  %v5160_v52 = vpack.c.bf16 %v803_v50, %v802_v49  ;;  %v5839_v50 = vld [vmem:[%s4400_s27 + $0x8] sm:$0xff] }
 0x2da   :  { %v418_v1 = vmul.f32 1.442695, %v415_v61 }
 0x2db   :  { %v416_v2 = vmul.f32 1.442695, %v414_v63 }
 0x2dc   :  { %v691_v3 = vpop.xlane.xlu1 %690 }
 0x2dd   :  { %5485 = vpow2.f32 %v416_v2  ;;  %v695_v4 = vsub.f32 %v681_v58, %v691_v3 }
 0x2de   :  { %5487 = vpow2.f32 %v418_v1 }
 0x2df   :  { %v697_v5 = vmul.f32 1.442695, %v695_v4 }
 0x2e1   :  { %5489 = vpow2.f32 %v697_v5 }
 0x2e7   :  { %v5486_v6 = vpop.eup %5485 }
 0x2e8   :  { %v420_v7 = vsel %vm407_vm2, %v5486_v6, 0.0  ;;  %v5488_v8 = vpop.eup %5487 }
 0x2e9   :  { %421 = vadd.xlane.f32.xlu0 %v420_v7  ;;  %v423_v10 = vsel %vm407_vm2, %v5488_v8, 0.0  ;;  %v927_v7 = vld [vmem:[%s5772_s2 + $0x8] sm:$0xff] }
 0x2eb   :  { %v5490_v9 = vpop.eup %5489 }
 0x2ec   :  { %v701_v11 = vsel %vm407_vm2, %v5490_v9, 0.0 }
 0x2ed   :  { %424 = vadd.xlane.f32.xlu0 %v423_v10  ;;  %702 = vadd.xlane.f32.xlu1 %v701_v11  ;;  %v929_v10 = vld [vmem:[%s5772_s2 + $0x18] sm:$0xff] }
 0x2f1   :  { %693 = vmax.xlane.f32.xlu0 %v692_v12  ;;  %v5609_v12 = vmov 0.0|0.0  }
 0x2fe   :  { %5466 = vrot.lane.b32.xlu1 %v5465_v34, %s5603_s18 }
 0x376   :  { %v422_v16 = vpop.xlane.xlu0 %421 }
 0x377   :  { %5491 = vrcp.f32 %v422_v16 }
 0x37a   :  { %v425_v17 = vpop.xlane.xlu0 %424  ;;  %v703_v19 = vpop.xlane.xlu1 %702 }
 0x37b   :  { %5493 = vrcp.f32 %v425_v17 }
 0x37e   :  { %v694_v18 = vpop.xlane.xlu0 %693  ;;  %v5467_v31 = vpop.permute.xlu1 %5466 }
 0x37f   :  { %v696_v21 = vsub.f32 %v686_v56, %v694_v18  ;;  %v5469_v34 = vunpack.i.h.bf16 %v5467_v31  ;;  %v5468_v35 = vunpack.i.l.bf16 %v5467_v31  ;;  %v134_v56 = vadd.f32 %v5681_v25, %v5691_v28 }
 0x381   :  { %v5492_v22 = vpop.eup %5491  ;;  %v699_v23 = vmul.f32 1.442695, %v696_v21  ;;  %v5152_v36 = vpack.c.bf16 %v5469_v34, %v5468_v35 }
 0x382   :  { %v428_v24 = vmul.f32 %v5492_v22, %v5486_v6  ;;  %v926_v6 = vld [vmem:[%s5772_s2] sm:$0xff] }
 0x383   :  { %5495 = vpow2.f32 %v699_v23  ;;  %v5795_v23 = vld [vmem:[%s5782_s7] sm:$0x7] }
 0x384   :  { %4783 = vmatprep.mubr.msk.f32.mxu1 %vm407_vm2, %v428_v24  ;;  %5497 = vrcp.f32 %v703_v19  ;;  %v5803_v24 = vld [vmem:[%s5787_s12] sm:$0x7] }
 0x385   :  { %v5494_v30 = vpop.eup %5493 }
 0x386   :  { %v429_v32 = vmul.f32 %v5494_v30, %v5488_v8  ;;  %v5164_v8 = vpack.c.bf16 %v927_v7, %v926_v6  ;;  %v1282_v6 = vld [vmem:[%s5858_s3 + $0x18] sm:$0xff] }
 0x388   :  { %4784 = vmatmul.mubr.msk.f32.vlgmr.msra.gmra.mrb[2].mxu1 %vm407_vm2, %v429_v32  ;;  %5165 = vmatprep.subr.bf16.mxu0 %v5164_v8 }
 0x389   :  { %5141 = vmatpush3.bf16.msra.mxu1 %v5138_v15  ;;  %5167 = vmatpush3.bf16.msra.mxu0 %v5164_v8  ;;  %v914_v15 = vlaneseq }
 0x38a   :  { %5143 = vmatprep.subr.bf16.mxu1 %v5142_v33 }
 0x38b   :  { %v5789_v19 = vshrl.u32 %v914_v15, 7 }
 0x38d   :  { %v5496_v37 = vpop.eup %5495  ;;  %5145 = vmatpush3.bf16.msra.mxu1 %v5142_v33  ;;  %v5792_v22 = vsub.s32 0, %v5789_v19 }
 0x38e   :  { %5153 = vmatprep.subr.bf16.mxu1 %v5152_v36  ;;  %v704_v38 = vsel %vm407_vm2, %v5496_v37, 0.0  ;;  %v5498_v43 = vpop.eup %5497 }
 0x38f   :  { %705 = vadd.xlane.f32.xlu0 %v704_v38  ;;  %v709_v48 = vmul.f32 %v5498_v43, %v5490_v9  ;;  %v928_v9 = vld [vmem:[%s5772_s2 + $0x10] sm:$0xff]  ;;  %v917_v26 = vrot.slane %v5795_v23, %v5792_v22  ;;  %v923_v31 = vrot.slane %v5803_v24, %v5792_v22  ;;  %v1014_v43 = vld [vmem:[%s5800_s16 + $0x18] sm:$0xff] }
 0x390   :  { %v5168_v11 = vpack.c.bf16 %v929_v10, %v928_v9 }
 0x392   :  { %5169 = vmatprep.subr.bf16.mxu0 %v5168_v11 }
 0x393   :  { %5171 = vmatpush3.bf16.msra.mxu0 %v5168_v11 }
 0x394   :  { %5172 = vmatprep.subr.bf16.mxu0 %v5609_v12 }
 0x41c   :  { %v706_v39 = vpop.xlane.xlu0 %705 }
 0x41d   :  { %5499 = vrcp.f32 %v706_v39 }
 0x427   :  { %v5500_v47 = vpop.eup %5499 }
 0x428   :  { %v710_v51 = vmul.f32 %v5500_v47, %v5496_v37  ;;  %v1012_v37 = vld [vmem:[%s5800_s16 + $0x8] sm:$0xff] }
 0x45b   :  { %v4785_v44 = vpop.f32.mrb[2].mxu1 }
 0x45c   :  { %v502_v45 = vpop.f32.mrb[3].mxu1 }
 0x45d   :  { %4794 = vmatprep.mubr.msk.f32.mxu1 %vm151_vm0, %v502_v45  ;;  %v126_v45 = vld [vmem:[%s4399_s23] sm:$0xff]  ;;  %s4402_s23 = sld [smem:[%s6290_s0 + %s5619_s17]]   ;;  %s5632_s17 = smov 27  }
 0x45e   :  { %4795 = vmatmul.mubr.msk.f32.vlgmr.msra.gmra.mrb[4].mxu1 %vm151_vm0, %v4785_v44  ;;  %v5176_v44 = vpack.c.bf16 %v1014_v43, %v1013_v42 }
 0x45f   :  { %5155 = vmatpush3.bf16.msra.mxu1 %v5152_v36  ;;  %4808 = vmatprep.mubr.msk.f32.mxu1 %vm407_vm2, %v709_v48  ;;  %v1011_v36 = vld [vmem:[%s5800_s16] sm:$0xff] }
 0x460   :  { %5157 = vmatprep.subr.bf16.mxu1 %v5156_v46  ;;  %v5173_v39 = vpack.c.bf16 %v1012_v37, %v1011_v36 }
 0x462   :  { %4809 = vmatmul.mubr.msk.f32.vlgmr.msra.gmra.mrb[6].mxu1 %vm407_vm2, %v710_v51  ;;  %v5841_v51 = vld [vmem:[%s4400_s27] sm:$0xff] }
 0x463   :  { %5159 = vmatpush3.bf16.msra.mxu1 %v5156_v46 }
 0x464   :  { %5161 = vmatprep.subr.bf16.mxu1 %v5160_v52 }
 0x467   :  { %5163 = vmatpush3.bf16.msra.mxu1 %v5160_v52 }
 0x535   :  { %v4810_v53 = vpop.f32.mrb[6].mxu1 }
 0x536   :  { %v791_v54 = vpop.f32.mrb[7].mxu1 }
 0x537   :  { %4819 = vmatprep.mubr.msk.f32.mxu1 %vm151_vm0, %v791_v54 }
 0x538   :  { %4820 = vmatmul.mubr.msk.f32.vlgmr.msra.gmra.mrb[4].mxu1 %vm151_vm0, %v4810_v53 }
 0x60b   :  { %v4821_v57 = vpop.f32.mrb[4].mxu1 }
 0x60c   :  { %v876_v58 = vpop.f32.mrb[5].mxu1  ;;  %v5388_v60 = vadd.f32 %v4821_v57, %v134_v56 }
 0x60d   :  { %v5389_v59 = vadd.f32 %v876_v58, %v133_v55 }
 0x60e   :  { %v890_v62 = vsel %vm151_vm0, %v5388_v60, 0.0 }
 0x60f   :  { %v887_v61 = vsel %vm151_vm0, %v5389_v59, 0.0 }
 0x610   :  { %888 = vadd.xlane.f32.xlu0 %v887_v61 }
 0x614   :  { %891 = vadd.xlane.f32.xlu0 %v890_v62 }
 0x69d   :  { %v889_v63 = vpop.xlane.xlu0 %888 }
 0x69e   :  { %v894_v1 = vmul.f32 0.03125, %v889_v63 }
 0x6a0   :  { %v896_v2 = vsub.f32 %v5389_v59, %v894_v1 }
 0x6a1   :  { %v892_v3 = vpop.xlane.xlu0 %891 }
 0x6a2   :  { %v895_v4 = vmul.f32 0.03125, %v892_v3  ;;  %v898_v5 = vmul.f32 %v896_v2, %v896_v2 }
 0x6a4   :  { %v897_v20 = vsub.f32 %v5388_v60, %v895_v4  ;;  %v900_v27 = vsel %vm151_vm0, %v898_v5, 0.0 }
 0x6a5   :  { %901 = vadd.xlane.f32.xlu0 %v900_v27  ;;  %v1280_v27 = vld [vmem:[%s5858_s3 + $0x8] sm:$0xff] }
 0x6a6   :  { %v899_v25 = vmul.f32 %v897_v20, %v897_v20 }
 0x6a8   :  { %v903_v28 = vsel %vm151_vm0, %v899_v25, 0.0  ;;  %v1281_v25 = vld [vmem:[%s5858_s3 + $0x10] sm:$0xff] }
 0x6a9   :  { %904 = vadd.xlane.f32.xlu0 %v903_v28  ;;  %v5182_v7 = vpack.c.bf16 %v1282_v6, %v1281_v25 }
 0x732   :  { %v902_v13 = vpop.xlane.xlu0 %901 }
 0x733   :  { %v906_v14 = vmul.f32 0.03125, %v902_v13 }
 0x735   :  { %v908_v16 = vadd.f32 1e-06, %v906_v14 }
 0x736   :  { %v905_v17 = vpop.xlane.xlu0 %904 }
 0x737   :  { %5501 = vrsqrt.f32 %v908_v16  ;;  %v907_v18 = vmul.f32 0.03125, %v905_v17 }
 0x739   :  { %v909_v21 = vadd.f32 1e-06, %v907_v18 }
 0x73b   :  { %5503 = vrsqrt.f32 %v909_v21 }
 0x741   :  { %v5502_v29 = vpop.eup %5501 }
 0x742   :  { %v912_v30 = vmul.f32 %v5502_v29, %v896_v2 }
 0x744   :  { %v918_v32 = vmul.f32 %v917_v26, %v912_v30 }
 0x745   :  { %v5504_v33 = vpop.eup %5503 }
 0x746   :  { %v913_v34 = vmul.f32 %v5504_v33, %v897_v20  ;;  %v5809_v35 = vadd.f32 %v923_v31, %v918_v32  ;;  %v1279_v20 = vld [vmem:[%s5858_s3] sm:$0xff] }
 0x747   :  { %v5178_v28 = vpack.c.bf16 %v1280_v27, %v1279_v20 }
 0x748   :  { %v919_v38 = vmul.f32 %v917_v26, %v913_v34  ;;  %4830 = vmatprep.mubr.msk.f32.mxu0 %vm151_vm0, %v5809_v35 }
 0x74a   :  { %v5818_v41 = vadd.f32 %v923_v31, %v919_v38 }
 0x74c   :  { %4831 = vmatmul.mubr.msk.f32.vlgmr.msra.gmra.mrb[6].mxu0 %vm151_vm0, %v5818_v41 }
 0x74d   :  { %5174 = vmatpush3.bf16.msra.mxu0 %v5173_v39  ;;  %4841 = vmatprep.mubr.msk.f32.mxu0 %vm5614_vm3, %v5600_v0 }
 0x74e   :  { %5175 = vmatprep.subr.bf16.mxu0 %v5609_v12 }
 0x751   :  { %5177 = vmatpush3.bf16.msra.mxu0 %v5176_v44 }
 0x752   :  { %5179 = vmatprep.subr.bf16.mxu0 %v5178_v28 }
 0x754   :  { %4842 = vmatmul.mubr.msk.f32.vlgmr.msra.gmra.mrb[8].mxu0 %vm151_vm0, %v126_v45 }
 0x755   :  { %5181 = vmatpush3.bf16.msra.mxu0 %v5178_v28 }
 0x756   :  { %5183 = vmatprep.subr.bf16.mxu0 %v5182_v7 }
 0x759   :  { %5185 = vmatpush3.bf16.msra.mxu0 %v5182_v7 }
 0x81f   :  { %v4832_v46 = vpop.f32.mrb[6].mxu0 }
 0x820   :  { %v1002_v47 = vpop.f32.mrb[7].mxu0 }
 0x821   :  { %4846 = vmatprep.mubr.msk.f32.mxu1 %vm151_vm0, %v1002_v47 }
 0x827   :  { %v5829_v48 = vpop.f32.mrb[8].mxu0 }
 0x828   :  { %v4843_v49 = vpop.f32.mrb[9].mxu0  ;;  %4844 = vmatprep.subr.msk.mxu1 %vm151_vm0, %v5829_v48 }
 0x829   :  { %4845 = vmatpush3.xpose.msk.msra.mxu1 %vm151_vm0, %v5829_v48  ;;  %v1560_v49 = vld [vmem:[%s5858_s3 + $0x28] sm:$0xff] }
 0x82c   :  { %4847 = vmatmul.mubr.msk.f32.vlgmr.msra.gmra.mrb[8].mxu1 %vm151_vm0, %v4832_v46 }
 0x8ff   :  { %v4848_v52 = vpop.f32.mrb[8].mxu1 }
 0x900   :  { %v1169_v53 = vadd.f32 %v4848_v52, %v5839_v50  ;;  %v1163_v54 = vpop.f32.mrb[9].mxu1  ;;  %v1562_v52 = vld [vmem:[%s5858_s3 + $0x38] sm:$0xff] }
 0x901   :  { %v1164_v55 = vadd.f32 %v1163_v54, %v5841_v51 }
 0x902   :  { %v1176_v56 = vsel %vm1172_vm4, %v1169_v53, -inf }
 0x903   :  { %1177 = vmax.xlane.f32.xlu0 %v1176_v56  ;;  %v1173_v57 = vsel %vm1172_vm4, %v1164_v55, -inf }
 0x904   :  { %1174 = vmax.xlane.f32.xlu1 %v1173_v57 }
 0x915   :  { %1366 = vrot.lane.b32.xlu1 %v1002_v47, %s5603_s18  ;;  %v1559_v47 = vld [vmem:[%s5858_s3 + $0x20] sm:$0xff] }
 0x919   :  { %1195 = vrot.lane.b32.xlu0 %v5829_v48, %s5604_s19 }
 0x990   :  { %v1178_v58 = vpop.xlane.xlu0 %1177 }
 0x991   :  { %v1180_v59 = vsub.f32 %v1169_v53, %v1178_v58  ;;  %v1175_v60 = vpop.xlane.xlu1 %1174 }
 0x992   :  { %v1179_v61 = vsub.f32 %v1164_v55, %v1175_v60 }
 0x993   :  { %v1183_v62 = vmul.f32 1.442695, %v1180_v59 }
 0x994   :  { %v1181_v63 = vmul.f32 1.442695, %v1179_v61  ;;  %v1196_v1 = vpop.permute.xlu0 %1195 }
 0x995   :  { %5505 = vpow2.f32 %v1183_v62  ;;  %4849 = vmatprep.subr.mxu1 %v1196_v1  ;;  %v1367_v16 = vpop.permute.xlu1 %1366 }
 0x996   :  { %4850 = vmatpush3.msra.mxu1 %v1196_v1  ;;  %5507 = vpow2.f32 %v1181_v63 }
 0x99f   :  { %v5506_v2 = vpop.eup %5505 }
 0x9a0   :  { %v1188_v3 = vsel %vm1172_vm4, %v5506_v2, 0.0  ;;  %v5508_v4 = vpop.eup %5507 }
 0x9a1   :  { %1189 = vadd.xlane.f32.xlu0 %v1188_v3  ;;  %v1185_v5 = vsel %vm1172_vm4, %v5508_v4, 0.0 }
 0x9a5   :  { %1186 = vadd.xlane.f32.xlu0 %v1185_v5 }
 0x9bb   :  { %1370 = vrot.lane.b32.xlu0 %v5829_v48, %s5603_s18 }
 0x9bf   :  { %1368 = vrot.lane.b32.xlu0 %v4832_v46, %s5603_s18 }
 0xa2e   :  { %v1190_v8 = vpop.xlane.xlu0 %1189 }
 0xa2f   :  { %5509 = vrcp.f32 %v1190_v8 }
 0xa32   :  { %v1187_v9 = vpop.xlane.xlu0 %1186 }
 0xa33   :  { %5511 = vrcp.f32 %v1187_v9  ;;  %v1684_v9 = vld [vmem:[%s5897_s9] sm:$0xff] }
 0xa36   :  { %v1371_v10 = vpop.permute.xlu0 %1370 }
 0xa37   :  { %4865 = vmatprep.subr.msk.mxu1 %vm151_vm0, %v1371_v10 }
 0xa39   :  { %v5510_v11 = vpop.eup %5509 }
 0xa3a   :  { %v1194_v15 = vmul.f32 %v5510_v11, %v5506_v2  ;;  %v1369_v17 = vpop.permute.xlu0 %1368 }
 0xa3d   :  { %v5512_v13 = vpop.eup %5511 }
 0xa3e   :  { %v1193_v14 = vmul.f32 %v5512_v13, %v5508_v4  ;;  %v1686_v13 = vld [vmem:[%s5897_s9 + $0x10] sm:$0xff] }
 0xa40   :  { %4851 = vmatprep.mubr.msk.f32.mxu1 %vm1172_vm4, %v1193_v14  ;;  %v1687_v14 = vld [vmem:[%s5897_s9 + $0x18] sm:$0xff] }
 0xa41   :  { %4852 = vmatmul.mubr.msk.f32.vlgmr.msra.gmra.mrb[10].mxu1 %vm1172_vm4, %v1194_v15  ;;  %v5198_v15 = vpack.c.bf16 %v1687_v14, %v1686_v13 }
 0xa42   :  { %4866 = vmatpush3.xpose.msk.msra.mxu1 %vm151_vm0, %v1371_v10  ;;  %4867 = vmatprep.mubr.msk.f32.mxu1 %vm151_vm0, %v1367_v16  ;;  %v1685_v10 = vld [vmem:[%s5897_s9 + $0x8] sm:$0xff] }
 0xa43   :  { %v5194_v11 = vpack.c.bf16 %v1685_v10, %v1684_v9  ;;  %v4480_v16 = vld [vmem:[%s5642_s6 + $0x48] sm:$0xff]  ;;  %v1784_v10 = vld [vmem:[%s5908_s15 + $0x30] sm:$0xff] }
 0xa45   :  { %4868 = vmatmul.mubr.msk.f32.vlgmr.msra.gmra.mrb[12].mxu1 %vm151_vm0, %v1369_v17  ;;  %v4482_v17 = vld [vmem:[%s5642_s6 + $0x58] sm:$0xff] }
 0xb14   :  { %v4853_v18 = vpop.f32.mrb[10].mxu1 }
 0xb15   :  { %v1270_v21 = vpop.f32.mrb[11].mxu1 }
 0xb16   :  { %4862 = vmatprep.mubr.msk.f32.mxu0 %vm151_vm0, %v1270_v21  ;;  %v1778_v21 = vld [vmem:[%s5908_s15] sm:$0xff] }
 0xb17   :  { %4863 = vmatmul.mubr.msk.f32.vlgmr.msra.gmra.mrb[10].mxu0 %vm151_vm0, %v4853_v18  ;;  %v5218_v18 = vpack.c.bf16 %v4482_v17, %v4480_v16 }
 0xb18   :  { %v4869_v26 = vpop.f32.mrb[12].mxu1 }
 0xb19   :  { %v1450_v29 = vadd.f32 %v4869_v26, %v5839_v50  ;;  %v1444_v30 = vpop.f32.mrb[13].mxu1  ;;  %v1561_v50 = vld [vmem:[%s5858_s3 + $0x30] sm:$0xff]  ;;  %v1779_v26 = vld [vmem:[%s5908_s15 + $0x8] sm:$0xff] }
 0xb1a   :  { %v1445_v31 = vadd.f32 %v1444_v30, %v5841_v51  ;;  %v5186_v51 = vpack.c.bf16 %v1560_v49, %v1559_v47  ;;  %v5190_v53 = vpack.c.bf16 %v1562_v52, %v1561_v50  ;;  %v5202_v30 = vpack.c.bf16 %v1779_v26, %v1778_v21 }
 0xb1b   :  { %v1456_v32 = vsel %vm1172_vm4, %v1450_v29, -inf }
 0xb1c   :  { %1457 = vmax.xlane.f32.xlu1 %v1456_v32  ;;  %v1453_v33 = vsel %vm1172_vm4, %v1445_v31, -inf  ;;  %5187 = vmatprep.subr.bf16.mxu0 %v5186_v51 }
 0xb1d   :  { %1454 = vmax.xlane.f32.xlu0 %v1453_v33  ;;  %5189 = vmatpush3.bf16.msra.mxu0 %v5186_v51  ;;  %v1782_v33 = vld [vmem:[%s5908_s15 + $0x20] sm:$0xff] }
 0xb1e   :  { %5191 = vmatprep.subr.bf16.mxu0 %v5190_v53 }
 0xb21   :  { %5193 = vmatpush3.bf16.msra.mxu0 %v5190_v53 }
 0xb22   :  { %5203 = vmatprep.subr.bf16.mxu0 %v5202_v30 }
 0xba9   :  { %v1458_v34 = vpop.xlane.xlu1 %1457 }
 0xbaa   :  { %v1460_v36 = vsub.f32 %v1450_v29, %v1458_v34  ;;  %v1455_v37 = vpop.xlane.xlu0 %1454  ;;  %v1780_v29 = vld [vmem:[%s5908_s15 + $0x10] sm:$0xff]  ;;  %v1783_v34 = vld [vmem:[%s5908_s15 + $0x28] sm:$0xff] }
 0xbab   :  { %v1459_v38 = vsub.f32 %v1445_v31, %v1455_v37  ;;  %v1781_v31 = vld [vmem:[%s5908_s15 + $0x18] sm:$0xff] }
 0xbac   :  { %v1463_v39 = vmul.f32 1.442695, %v1460_v36  ;;  %v5206_v32 = vpack.c.bf16 %v1781_v31, %v1780_v29  ;;  %v5210_v36 = vpack.c.bf16 %v1783_v34, %v1782_v33 }
 0xbad   :  { %v1461_v42 = vmul.f32 1.442695, %v1459_v38 }
 0xbae   :  { %5513 = vpow2.f32 %v1463_v39 }
 0xbaf   :  { %5515 = vpow2.f32 %v1461_v42 }
 0xbb8   :  { %v5514_v43 = vpop.eup %5513 }
 0xbb9   :  { %v1468_v44 = vsel %vm1172_vm4, %v5514_v43, 0.0  ;;  %v5516_v45 = vpop.eup %5515 }
 0xbba   :  { %1469 = vadd.xlane.f32.xlu0 %v1468_v44  ;;  %v1465_v46 = vsel %vm1172_vm4, %v5516_v45, 0.0 }
 0xbbe   :  { %1466 = vadd.xlane.f32.xlu0 %v1465_v46 }
 0xbd4   :  { %1475 = vrot.lane.b32.xlu0 %v5829_v48, %s5605_s20 }
 0xc47   :  { %v1470_v54 = vpop.xlane.xlu0 %1469 }
 0xc48   :  { %5517 = vrcp.f32 %v1470_v54 }
 0xc4b   :  { %v1467_v55 = vpop.xlane.xlu0 %1466 }
 0xc4c   :  { %5519 = vrcp.f32 %v1467_v55  ;;  %v4479_v55 = vld [vmem:[%s5642_s6 + $0x40] sm:$0xff] }
 0xc4f   :  { %v1476_v56 = vpop.permute.xlu0 %1475 }
 0xc50   :  { %4870 = vmatprep.subr.mxu1 %v1476_v56 }
 0xc51   :  { %4871 = vmatpush3.msra.mxu1 %v1476_v56  ;;  %v4481_v56 = vld [vmem:[%s5642_s6 + $0x50] sm:$0xff] }
 0xc52   :  { %v5518_v57 = vpop.eup %5517  ;;  %5195 = vmatprep.subr.bf16.mxu1 %v5194_v11 }
 0xc53   :  { %v1474_v59 = vmul.f32 %v5518_v57, %v5514_v43  ;;  %v4484_v57 = vld [vmem:[%s5642_s6 + $0x68] sm:$0xff] }
 0xc56   :  { %v5520_v58 = vpop.eup %5519 }
 0xc57   :  { %v1473_v48 = vmul.f32 %v5520_v58, %v5516_v45  ;;  %v5917_v45 = vsub.s32 1, %v5789_v19  ;;  %v4486_v58 = vld [vmem:[%s5642_s6 + $0x78] sm:$0xff] }
 0xc59   :  { %4872 = vmatprep.mubr.msk.f32.mxu1 %vm1172_vm4, %v1473_v48  ;;  %v1675_v46 = vrot.slane %v5795_v23, %v5917_v45  ;;  %v1681_v50 = vrot.slane %v5803_v24, %v5917_v45  ;;  %v5220_v23 = vpack.c.bf16 %v4481_v56, %v4479_v55 }
 0xc5a   :  { %4873 = vmatmul.mubr.msk.f32.vlgmr.msra.gmra.mrb[14].mxu1 %vm1172_vm4, %v1474_v59  ;;  %v5222_v59 = vpack.c.bf16 %v4486_v58, %v4484_v57 }
 0xc5b   :  { %5197 = vmatpush3.bf16.msra.mxu1 %v5194_v11  ;;  %v1785_v11 = vld [vmem:[%s5908_s15 + $0x38] sm:$0xff] }
 0xc5c   :  { %5199 = vmatprep.subr.bf16.mxu1 %v5198_v15  ;;  %v5214_v13 = vpack.c.bf16 %v1785_v11, %v1784_v10 }
 0xc5f   :  { %5201 = vmatpush3.bf16.msra.mxu1 %v5198_v15 }
 0xc60   :  { %5219 = vmatprep.subr.bf16.mxu1 %v5218_v18 }
 0xd2d   :  { %v4874_v60 = vpop.f32.mrb[14].mxu1 }
 0xd2e   :  { %v1550_v61 = vpop.f32.mrb[15].mxu1 }
 0xd2f   :  { %4883 = vmatprep.mubr.msk.f32.mxu0 %vm151_vm0, %v1550_v61  ;;  %v4485_v61 = vld [vmem:[%s5642_s6 + $0x70] sm:$0xff] }
 0xd30   :  { %4884 = vmatmul.mubr.msk.f32.vlgmr.msra.gmra.mrb[10].mxu0 %vm151_vm0, %v4874_v60  ;;  %v4483_v60 = vld [vmem:[%s5642_s6 + $0x60] sm:$0xff]  ;;  %s5620_s6 = smov 5  }
 0xd31   :  { %5205 = vmatpush3.bf16.msra.mxu0 %v5202_v30  ;;  %s4401_s26 = sld [smem:[%s6290_s0 + %s5620_s6]]  }
 0xd32   :  { %5207 = vmatprep.subr.bf16.mxu0 %v5206_v32 }
 0xd35   :  { %5209 = vmatpush3.bf16.msra.mxu0 %v5206_v32 }
 0xd36   :  { %5211 = vmatprep.subr.bf16.mxu0 %v5210_v36 }
 0xd37   :  { %v5967_v9 = vld [vmem:[%s4401_s26 + $0x8] sm:$0xff] }
 0xd39   :  { %5213 = vmatpush3.bf16.msra.mxu0 %v5210_v36 }
 0xd3a   :  { %5215 = vmatprep.subr.bf16.mxu0 %v5214_v13 }
 0xd3d   :  { %5217 = vmatpush3.bf16.msra.mxu0 %v5214_v13 }
 0xe03   :  { %v4885_v62 = vpop.f32.mrb[10].mxu0 }
 0xe04   :  { %v1635_v63 = vpop.f32.mrb[11].mxu0  ;;  %v5390_v2 = vadd.f32 %v4885_v62, %v5818_v41  ;;  %v4472_v62 = vld [vmem:[%s5648_s10 + $0x48] sm:$0xff] }
 0xe05   :  { %v5391_v1 = vadd.f32 %v1635_v63, %v5809_v35  ;;  %v4474_v63 = vld [vmem:[%s5648_s10 + $0x58] sm:$0xff] }
 0xe06   :  { %v1649_v4 = vsel %vm151_vm0, %v5390_v2, 0.0 }
 0xe07   :  { %v1646_v3 = vsel %vm151_vm0, %v5391_v1, 0.0 }
 0xe08   :  { %1647 = vadd.xlane.f32.xlu1 %v1646_v3  ;;  %v4471_v3 = vld [vmem:[%s5648_s10 + $0x40] sm:$0xff] }
 0xe0c   :  { %1650 = vadd.xlane.f32.xlu1 %v1649_v4  ;;  %v4473_v4 = vld [vmem:[%s5648_s10 + $0x50] sm:$0xff] }
 0xe95   :  { %v1648_v5 = vpop.xlane.xlu1 %1647 }
 0xe96   :  { %v1652_v20 = vmul.f32 0.03125, %v1648_v5  ;;  %v4476_v5 = vld [vmem:[%s5648_s10 + $0x68] sm:$0xff] }
 0xe98   :  { %v1654_v27 = vsub.f32 %v5391_v1, %v1652_v20  ;;  %v5224_v1 = vpack.c.bf16 %v4485_v61, %v4483_v60  ;;  %v4478_v20 = vld [vmem:[%s5648_s10 + $0x78] sm:$0xff] }
 0xe99   :  { %v1651_v25 = vpop.xlane.xlu1 %1650 }
 0xe9a   :  { %v1653_v28 = vmul.f32 0.03125, %v1651_v25  ;;  %v1656_v6 = vmul.f32 %v1654_v27, %v1654_v27  ;;  %v5228_v25 = vpack.c.bf16 %v4473_v4, %v4471_v3 }
 0xe9c   :  { %v1655_v7 = vsub.f32 %v5390_v2, %v1653_v28  ;;  %v1658_v8 = vsel %vm151_vm0, %v1656_v6, 0.0  ;;  %v5226_v2 = vpack.c.bf16 %v4474_v63, %v4472_v62  ;;  %v5230_v28 = vpack.c.bf16 %v4478_v20, %v4476_v5  ;;  %v4475_v6 = vld [vmem:[%s5648_s10 + $0x60] sm:$0xff]  ;;  %v4498_v20 = vld [vmem:[%s5742_s28 + $0x48] sm:$0xff] }
 0xe9d   :  { %1659 = vadd.xlane.f32.xlu1 %v1658_v8  ;;  %v5957_v8 = vld [vmem:[%s4402_s23 + $0x8] sm:$0xff]  ;;  %v4497_v5 = vld [vmem:[%s5742_s28 + $0x40] sm:$0xff] }
 0xe9e   :  { %v1657_v35 = vmul.f32 %v1655_v7, %v1655_v7 }
 0xea0   :  { %v1661_v41 = vsel %vm151_vm0, %v1657_v35, 0.0 }
 0xea1   :  { %1662 = vadd.xlane.f32.xlu1 %v1661_v41  ;;  %v5962_v41 = vld [vmem:[%s4401_s26] sm:$0xff]  ;;  %s5628_s26 = smov 24  }
 0xea2   :  { %s6210_s29 = sld [smem:[%s6290_s0 + %s5628_s26]]  }
 0xf2a   :  { %v1660_v37 = vpop.xlane.xlu1 %1659 }
 0xf2b   :  { %v1664_v38 = vmul.f32 0.03125, %v1660_v37 }
 0xf2d   :  { %v1666_v39 = vadd.f32 1e-06, %v1664_v38 }
 0xf2e   :  { %v1663_v42 = vpop.xlane.xlu1 %1662 }
 0xf2f   :  { %5521 = vrsqrt.f32 %v1666_v39  ;;  %v1665_v43 = vmul.f32 0.03125, %v1663_v42 }
 0xf31   :  { %v1667_v44 = vadd.f32 1e-06, %v1665_v43 }
 0xf33   :  { %5523 = vrsqrt.f32 %v1667_v44 }
 0xf39   :  { %v5522_v47 = vpop.eup %5521 }
 0xf3a   :  { %v1670_v49 = vmul.f32 %v5522_v47, %v1654_v27  ;;  %v5947_v27 = vld [vmem:[%s4402_s23] sm:$0xff] }
 0xf3b   :  { %v6003_v47 = vld [vmem:[%s4403_s8] sm:$0xff] }
 0xf3c   :  { %v1676_v51 = vmul.f32 %v1675_v46, %v1670_v49 }
 0xf3d   :  { %v5524_v52 = vpop.eup %5523 }
 0xf3e   :  { %v1671_v53 = vmul.f32 %v5524_v52, %v1655_v7  ;;  %v5923_v54 = vadd.f32 %v1681_v50, %v1676_v51  ;;  %v4477_v7 = vld [vmem:[%s5648_s10 + $0x70] sm:$0xff]  ;;  %s5621_s10 = smov 17  }
 0xf3f   :  { %v5232_v35 = vpack.c.bf16 %v4477_v7, %v4475_v6  ;;  %s5976_s30 = sld [smem:[%s6290_s0 + %s5621_s10]]   ;;  %v4500_v6 = vld [vmem:[%s5742_s28 + $0x58] sm:$0xff] }
 0xf40   :  { %v1677_v48 = vmul.f32 %v1675_v46, %v1671_v53  ;;  %4894 = vmatprep.mubr.msk.f32.mxu1 %vm151_vm0, %v5923_v54  ;;  %v1921_v46 = vld [vmem:[%s4403_s8 + $0x8] sm:$0xff]  ;;  %s5630_s8 = smov 25  }
 0xf41   :  { %s4421_s11 = sld [smem:[%s6290_s0 + %s5630_s8]]  }
 0xf42   :  { %v5934_v24 = vadd.f32 %v1681_v50, %v1677_v48 }
 0xf44   :  { %4895 = vmatmul.mubr.msk.f32.vlgmr.msra.gmra.mrb[16].mxu1 %vm151_vm0, %v5934_v24 }
 0xf45   :  { %5221 = vmatpush1.bf16.msra.mxu1 %v5220_v23  ;;  %2018 = vmatprep.mubr.f32.mxu1 %v5600_v0  ;;  %v4463_v14 = vld [vmem:[%s5976_s30] ss:$0 sm:$0xff] }
 0xf46   :  { %5223 = vmatprep.subr.bf16.mxu1 %v5222_v59 }
 0xf49   :  { %5225 = vmatpush1.bf16.msra.mxu1 %v5224_v1 }
 0xf4a   :  { %5227 = vmatprep.subr.bf16.mxu1 %v5226_v2 }
 0xf4c   :  { %4487 = vmatmul.mubr.msk.f32.vlgmr.msra.gmra.mrb[18].mxu1 %vm151_vm0, %v5947_v27 }
 0xf4d   :  { %5229 = vmatpush1.bf16.msra.mxu1 %v5228_v25  ;;  %2024 = vmatprep.mubr.f32.mxu1 %v5600_v0  ;;  %v4499_v25 = vld [vmem:[%s5742_s28 + $0x50] sm:$0xff] }
 0xf4e   :  { %5231 = vmatprep.subr.bf16.mxu1 %v5230_v28  ;;  %v5244_v28 = vpack.c.bf16 %v4498_v20, %v4497_v5  ;;  %v5248_v7 = vpack.c.bf16 %v4500_v6, %v4499_v25  ;;  %v1928_v5 = vadd.f32 %v5947_v27, %v5962_v41 }
 0xf50   :  { %4488 = vmatmul.mubr.msk.f32.gmra.mrb[20].mxu1 %vm151_vm0, %v5957_v8 }
 0xf51   :  { %5233 = vmatpush1.bf16.msra.mxu1 %v5232_v35  ;;  %2101 = vmatprep.mubr.f32.mxu1 %v5600_v0 }
 0xf54   :  { %4489 = vmatmul.mubr.msk.f32.vlgmr.msra.gmra.mrb[18].mxu1 %vm151_vm0, %v5962_v41 }
 0xf55   :  { %2107 = vmatprep.mubr.f32.mxu1 %v5600_v0 }
 0xf58   :  { %4490 = vmatmul.mubr.msk.f32.gmra.mrb[20].mxu1 %vm151_vm0, %v5967_v9 }
0x1017   :  { %v4896_v15 = vpop.f32.mrb[16].mxu1 }
0x1018   :  { %v1773_v16 = vadd.f32 %v4896_v15, %v4463_v14  ;;  %v1767_v17 = vpop.f32.mrb[17].mxu1 }
0x1019   :  { %v1768_v18 = vadd.f32 %v4463_v14, %v1767_v17 }
0x101a   :  { %v1777_v26 = vmax.f32 %v1773_v16, 0.0 }
0x101b   :  { %v1776_v21 = vmax.f32 %v1768_v18, 0.0 }
0x101d   :  { %4913 = vmatprep.mubr.msk.f32.mxu0 %vm1793_vm5, %v1776_v21 }
0x101e   :  { %4914 = vmatmul.mubr.msk.f32.vlgmr.msra.gmra.mrb[12].mxu0 %vm1793_vm5, %v1777_v26 }
0x1027   :  { %v2103_v29 = vpop.f32.mrb[18].mxu1 }
0x1028   :  { %v5981_v30 = vpop.f32.mrb[19].mxu1  ;;  %4920 = vmatprep.mubr.msk.f32.mxu0 %vm151_vm0, %v2103_v29 }
0x102b   :  { %v2109_v31 = vpop.f32.mrb[20].mxu1 }
0x102c   :  { %v5984_v32 = vpop.f32.mrb[21].mxu1  ;;  %v5470_v33 = vpack.i.bf16 %v2109_v31, %v2103_v29 }
0x102d   :  { %v5480_v34 = vpack.i.bf16 %v5984_v32, %v5981_v30  ;;  %v5240_v36 = vpack.c.bf16 %v5984_v32, %v5981_v30 }
0x102e   :  { %5471 = vrot.lane.b32.xlu0 %v5470_v33, %s5604_s19 }
0x102f   :  { %5241 = vmatprep.subr.bf16.mxu1 %v5240_v36 }
0x1030   :  { %5243 = vmatpush3.bf16.msra.mxu1 %v5240_v36 }
0x10a0   :  { %v5472_v37 = vpop.permute.xlu0 %5471 }
0x10a1   :  { %v5474_v38 = vunpack.i.h.bf16 %v5472_v37  ;;  %v5473_v39 = vunpack.i.l.bf16 %v5472_v37 }
0x10a3   :  { %v5234_v42 = vpack.c.bf16 %v5474_v38, %v5473_v39 }
0x10a5   :  { %5236 = vmatprep.subr.msk.bf16.mxu0 %vm5711_vm1, %v5234_v42 }
0x10a6   :  { %5239 = vmatpush3.bf16.xpose.msk.msra.mxu0 %vm5711_vm1, %v5234_v42 }
0x10a7   :  { %5245 = vmatprep.subr.bf16.mxu0 %v5244_v28 }
0x10ad   :  { %4921 = vmatmul.mubr.msk.f32.vlgmr.msra.gmra.mrb[14].mxu0 %vm151_vm0, %v2109_v31 }
0x10ae   :  { %5247 = vmatpush3.bf16.msra.mxu0 %v5244_v28 }
0x10af   :  { %5249 = vmatprep.subr.bf16.mxu0 %v5248_v7 }
0x10b2   :  { %5251 = vmatpush3.bf16.msra.mxu0 %v5248_v7 }
0x10f1   :  { %v5996_v43 = vpop.f32.mrb[12].mxu0 }
0x10f2   :  { %v5998_v44 = vpop.f32.mrb[13].mxu0 }
0x1180   :  { %v4922_v49 = vpop.f32.mrb[14].mxu0 }
0x1181   :  { %v2200_v50 = vadd.f32 %v4922_v49, %v1921_v46  ;;  %v2194_v51 = vpop.f32.mrb[15].mxu0 }
0x1182   :  { %v2195_v52 = vadd.f32 %v2194_v51, %v6003_v47 }
0x1183   :  { %v2206_v53 = vsel %vm407_vm2, %v2200_v50, -inf }
0x1184   :  { %2207 = vmax.xlane.f32.xlu0 %v2206_v53  ;;  %v2203_v55 = vsel %vm407_vm2, %v2195_v52, -inf }
0x1185   :  { %2204 = vmax.xlane.f32.xlu1 %v2203_v55 }
0x1196   :  { %5476 = vrot.lane.b32.xlu1 %v5470_v33, %s5605_s20 }
0x119a   :  { %2394 = vrot.lane.b32.xlu1 %v2103_v29, %s5603_s18 }
0x1211   :  { %v2208_v56 = vpop.xlane.xlu0 %2207 }
0x1212   :  { %v2210_v57 = vsub.f32 %v2200_v50, %v2208_v56  ;;  %v2205_v58 = vpop.xlane.xlu1 %2204 }
0x1213   :  { %v2209_v48 = vsub.f32 %v2195_v52, %v2205_v58  ;;  %v4510_v58 = vld [vmem:[%s5742_s28 + $0x68] sm:$0xff] }
0x1214   :  { %v2213_v23 = vmul.f32 1.442695, %v2210_v57  ;;  %v4509_v57 = vld [vmem:[%s5742_s28 + $0x60] sm:$0xff] }
0x1215   :  { %v2211_v59 = vmul.f32 1.442695, %v2209_v48 }
0x1216   :  { %5525 = vpow2.f32 %v2213_v23  ;;  %v5477_v60 = vpop.permute.xlu1 %5476 }
0x1217   :  { %v5479_v61 = vunpack.i.h.bf16 %v5477_v60  ;;  %v5478_v62 = vunpack.i.l.bf16 %v5477_v60  ;;  %5527 = vpow2.f32 %v2211_v59  ;;  %v5262_v60 = vpack.c.bf16 %v4510_v58, %v4509_v57  ;;  %v4521_v57 = vld [vmem:[%s5800_s16 + $0x20] sm:$0xff]  ;;  %v4522_v58 = vld [vmem:[%s5800_s16 + $0x28] sm:$0xff] }
0x1219   :  { %v5252_v63 = vpack.c.bf16 %v5479_v61, %v5478_v62  ;;  %v4511_v62 = vld [vmem:[%s5742_s28 + $0x70] sm:$0xff] }
0x121a   :  { %v2395_v35 = vpop.permute.xlu1 %2394 }
0x121b   :  { %5254 = vmatprep.subr.msk.bf16.mxu1 %vm5711_vm1, %v5252_v63 }
0x1220   :  { %v5526_v1 = vpop.eup %5525 }
0x1221   :  { %v2218_v2 = vsel %vm407_vm2, %v5526_v1, 0.0  ;;  %v5528_v3 = vpop.eup %5527 }
0x1222   :  { %2219 = vadd.xlane.f32.xlu1 %v2218_v2  ;;  %v2215_v4 = vsel %vm407_vm2, %v5528_v3, 0.0 }
0x1226   :  { %2216 = vadd.xlane.f32.xlu1 %v2215_v4  ;;  %v1929_v4 = vadd.f32 %v5957_v8, %v5967_v9 }
0x1237   :  { %2396 = vrot.lane.b32.xlu1 %v2109_v31, %s5603_s18 }
0x12af   :  { %v2220_v10 = vpop.xlane.xlu1 %2219 }
0x12b0   :  { %5529 = vrcp.f32 %v2220_v10 }
0x12b3   :  { %v2217_v11 = vpop.xlane.xlu1 %2216 }
0x12b4   :  { %5531 = vrcp.f32 %v2217_v11 }
0x12b7   :  { %v2397_v17 = vpop.permute.xlu1 %2396 }
0x12ba   :  { %v5530_v13 = vpop.eup %5529 }
0x12bb   :  { %v2224_v16 = vmul.f32 %v5530_v13, %v5526_v1 }
0x12be   :  { %v5532_v14 = vpop.eup %5531 }
0x12bf   :  { %v2223_v15 = vmul.f32 %v5532_v14, %v5528_v3 }
0x12c1   :  { %4927 = vmatprep.mubr.msk.f32.mxu1 %vm407_vm2, %v2223_v15 }
0x12c2   :  { %4928 = vmatmul.mubr.msk.f32.vlgmr.msra.gmra.mrb[22].mxu1 %vm407_vm2, %v2224_v16 }
0x12c3   :  { %5257 = vmatpush3.bf16.xpose.msk.msra.mxu1 %vm5711_vm1, %v5252_v63  ;;  %4945 = vmatprep.mubr.msk.f32.mxu1 %vm151_vm0, %v2395_v35  ;;  %v4512_v63 = vld [vmem:[%s5742_s28 + $0x78] sm:$0xff]  ;;  %s5623_s28 = smov 8  }
0x12c4   :  { %v5266_v1 = vpack.c.bf16 %v4512_v63, %v4511_v62  ;;  %s4404_s13 = sld [smem:[%s6290_s0 + %s5623_s28]]  }
0x12ca   :  { %4946 = vmatmul.mubr.msk.f32.vlgmr.msra.gmra.mrb[24].mxu1 %vm151_vm0, %v2397_v17  ;;  %v4515_v17 = vld [vmem:[%s5772_s2 + $0x20] sm:$0xff] }
0x12cb   :  { %v1919_v62 = vld [vmem:[%s4404_s13] sm:$0xff] }
0x1395   :  { %v4929_v18 = vpop.f32.mrb[22].mxu1 }
0x1396   :  { %v2297_v21 = vpop.f32.mrb[23].mxu1 }
0x1397   :  { %4938 = vmatprep.mubr.msk.f32.mxu0 %vm151_vm0, %v2297_v21 }
0x1398   :  { %4939 = vmatmul.mubr.msk.f32.vlgmr.msra.gmra.mrb[16].mxu0 %vm151_vm0, %v4929_v18  ;;  %v4516_v18 = vld [vmem:[%s5772_s2 + $0x28] sm:$0xff] }
0x1399   :  { %v5270_v21 = vpack.c.bf16 %v4516_v18, %v4515_v17  ;;  %v4533_v17 = vld [vmem:[%s5858_s3 + $0x50] sm:$0xff] }
0x139b   :  { %5271 = vmatprep.subr.bf16.mxu1 %v5270_v21 }
0x139c   :  { %5273 = vmatpush3.bf16.msra.mxu1 %v5270_v21  ;;  %v4534_v21 = vld [vmem:[%s5858_s3 + $0x58] sm:$0xff] }
0x139d   :  { %v4947_v26 = vpop.f32.mrb[24].mxu1 }
0x139e   :  { %v2482_v29 = vadd.f32 %v4947_v26, %v1921_v46  ;;  %v2476_v31 = vpop.f32.mrb[25].mxu1  ;;  %v4517_v26 = vld [vmem:[%s5772_s2 + $0x30] sm:$0xff] }
0x139f   :  { %v2477_v33 = vadd.f32 %v2476_v31, %v6003_v47 }
0x13a0   :  { %v2488_v36 = vsel %vm407_vm2, %v2482_v29, -inf }
0x13a1   :  { %2489 = vmax.xlane.f32.xlu1 %v2488_v36  ;;  %v2485_v40 = vsel %vm407_vm2, %v2477_v33, -inf }
0x13a2   :  { %2486 = vmax.xlane.f32.xlu0 %v2485_v40 }
0x142e   :  { %v2490_v37 = vpop.xlane.xlu1 %2489 }
0x142f   :  { %v2492_v38 = vsub.f32 %v2482_v29, %v2490_v37  ;;  %v2487_v39 = vpop.xlane.xlu0 %2486  ;;  %v4518_v29 = vld [vmem:[%s5772_s2 + $0x38] sm:$0xff] }
0x1430   :  { %v2491_v42 = vsub.f32 %v2477_v33, %v2487_v39  ;;  %v5274_v31 = vpack.c.bf16 %v4518_v29, %v4517_v26  ;;  %v5288_v26 = vpack.c.bf16 %v4534_v21, %v4533_v17 }
0x1431   :  { %v2495_v49 = vmul.f32 1.442695, %v2492_v38 }
0x1432   :  { %v2493_v50 = vmul.f32 1.442695, %v2491_v42  ;;  %5275 = vmatprep.subr.bf16.mxu1 %v5274_v31  ;;  %v6058_v42 = vld [vmem:[%s5782_s7 + $0x4] sm:$0x7] }
0x1433   :  { %5533 = vpow2.f32 %v2495_v49  ;;  %5277 = vmatpush3.bf16.msra.mxu1 %v5274_v31  ;;  %v6061_v49 = vld [vmem:[%s5787_s12 + $0x4] sm:$0x7] }
0x1434   :  { %5535 = vpow2.f32 %v2493_v50  ;;  %5278 = vmatprep.subr.bf16.mxu1 %v5609_v12  ;;  %v2712_v50 = vrot.slane %v6058_v42, %v5792_v22 }
0x143d   :  { %v5534_v46 = vpop.eup %5533 }
0x143e   :  { %v2500_v51 = vsel %vm407_vm2, %v5534_v46, 0.0  ;;  %v5536_v47 = vpop.eup %5535 }
0x143f   :  { %2501 = vadd.xlane.f32.xlu0 %v2500_v51  ;;  %v2497_v52 = vsel %vm407_vm2, %v5536_v47, 0.0 }
0x1443   :  { %2498 = vadd.xlane.f32.xlu0 %v2497_v52 }
0x1459   :  { %5481 = vrot.lane.b32.xlu0 %v5480_v34, %s5603_s18 }
0x14cc   :  { %v2502_v53 = vpop.xlane.xlu0 %2501 }
0x14cd   :  { %5537 = vrcp.f32 %v2502_v53 }
0x14d0   :  { %v2499_v55 = vpop.xlane.xlu0 %2498 }
0x14d1   :  { %5539 = vrcp.f32 %v2499_v55 }
0x14d4   :  { %v5482_v56 = vpop.permute.xlu0 %5481 }
0x14d5   :  { %v5484_v48 = vunpack.i.h.bf16 %v5482_v56  ;;  %v5483_v23 = vunpack.i.l.bf16 %v5482_v56 }
0x14d7   :  { %v5258_v59 = vpack.c.bf16 %v5484_v48, %v5483_v23  ;;  %v5538_v61 = vpop.eup %5537  ;;  %v5279_v23 = vpack.c.bf16 %v4522_v58, %v4521_v57 }
0x14d8   :  { %v2506_v34 = vmul.f32 %v5538_v61, %v5534_v46 }
0x14d9   :  { %5259 = vmatprep.subr.bf16.mxu0 %v5258_v59 }
0x14da   :  { %5261 = vmatpush3.bf16.msra.mxu0 %v5258_v59 }
0x14db   :  { %v5540_v30 = vpop.eup %5539  ;;  %5263 = vmatprep.subr.bf16.mxu0 %v5262_v60 }
0x14dc   :  { %v2505_v32 = vmul.f32 %v5540_v30, %v5536_v47  ;;  %v2718_v47 = vrot.slane %v6061_v49, %v5792_v22  ;;  %v4523_v22 = vld [vmem:[%s5800_s16 + $0x30] sm:$0xff] }
0x14de   :  { %4952 = vmatprep.mubr.msk.f32.mxu0 %vm407_vm2, %v2505_v32 }
0x14df   :  { %4953 = vmatmul.mubr.msk.f32.vlgmr.msra.gmra.mrb[18].mxu0 %vm407_vm2, %v2506_v34 }
0x14e0   :  { %5265 = vmatpush3.bf16.msra.mxu0 %v5262_v60  ;;  %v4524_v60 = vld [vmem:[%s5800_s16 + $0x38] sm:$0xff]  ;;  %s5624_s16 = smov 9  }
0x14e1   :  { %5267 = vmatprep.subr.bf16.mxu0 %v5266_v1  ;;  %v5282_v61 = vpack.c.bf16 %v4524_v60, %v4523_v22  ;;  %s4405_s21 = sld [smem:[%s6290_s0 + %s5624_s16]]  }
0x14e4   :  { %5269 = vmatpush3.bf16.msra.mxu0 %v5266_v1 }
0x14e7   :  { %v1922_v1 = vld [vmem:[%s4405_s21] sm:$0xff] }
0x15b2   :  { %v4954_v2 = vpop.f32.mrb[18].mxu0 }
0x15b3   :  { %v2587_v3 = vpop.f32.mrb[19].mxu0 }
0x15b4   :  { %4963 = vmatprep.mubr.msk.f32.mxu0 %vm151_vm0, %v2587_v3  ;;  %v1923_v3 = vld [vmem:[%s4405_s21 + $0x8] sm:$0xff] }
0x15b5   :  { %4964 = vmatmul.mubr.msk.f32.vlgmr.msra.gmra.mrb[16].mxu0 %vm151_vm0, %v4954_v2 }
0x1688   :  { %v4965_v20 = vpop.f32.mrb[16].mxu0 }
0x1689   :  { %v5392_v25 = vadd.f32 %v4965_v20, %v1929_v4  ;;  %v2672_v28 = vpop.f32.mrb[17].mxu0 }
0x168a   :  { %v5393_v6 = vadd.f32 %v2672_v28, %v1928_v5 }
0x168b   :  { %v2686_v7 = vsel %vm151_vm0, %v5392_v25, 0.0 }
0x168c   :  { %2687 = vadd.xlane.f32.xlu1 %v2686_v7  ;;  %v2683_v35 = vsel %vm151_vm0, %v5393_v6, 0.0 }
0x168d   :  { %2684 = vadd.xlane.f32.xlu0 %v2683_v35 }
0x1719   :  { %v2688_v10 = vpop.xlane.xlu1 %2687 }
0x171a   :  { %v2690_v11 = vmul.f32 0.03125, %v2688_v10  ;;  %v2685_v13 = vpop.xlane.xlu0 %2684 }
0x171b   :  { %v2689_v8 = vmul.f32 0.03125, %v2685_v13 }
0x171c   :  { %v2692_v9 = vsub.f32 %v5392_v25, %v2690_v11 }
0x171d   :  { %v2691_v27 = vsub.f32 %v5393_v6, %v2689_v8 }
0x171e   :  { %v2694_v15 = vmul.f32 %v2692_v9, %v2692_v9 }
0x171f   :  { %v2693_v41 = vmul.f32 %v2691_v27, %v2691_v27 }
0x1720   :  { %v2698_v16 = vsel %vm151_vm0, %v2694_v15, 0.0  ;;  %v4531_v15 = vld [vmem:[%s5858_s3 + $0x40] sm:$0xff] }
0x1721   :  { %v2695_v14 = vsel %vm151_vm0, %v2693_v41, 0.0 }
0x1722   :  { %2696 = vadd.xlane.f32.xlu1 %v2695_v14 }
0x1726   :  { %2699 = vadd.xlane.f32.xlu1 %v2698_v16  ;;  %v4532_v16 = vld [vmem:[%s5858_s3 + $0x48] sm:$0xff] }
0x1727   :  { %v5284_v18 = vpack.c.bf16 %v4532_v16, %v4531_v15 }
0x17af   :  { %v2697_v33 = vpop.xlane.xlu1 %2696 }
0x17b0   :  { %v2701_v36 = vmul.f32 0.03125, %v2697_v33 }
0x17b2   :  { %v2703_v40 = vadd.f32 1e-06, %v2701_v36 }
0x17b3   :  { %v2700_v37 = vpop.xlane.xlu1 %2699 }
0x17b4   :  { %5541 = vrsqrt.f32 %v2703_v40  ;;  %v2702_v38 = vmul.f32 0.03125, %v2700_v37 }
0x17b6   :  { %v2704_v39 = vadd.f32 1e-06, %v2702_v38 }
0x17b8   :  { %5543 = vrsqrt.f32 %v2704_v39 }
0x17be   :  { %v5542_v46 = vpop.eup %5541 }
0x17bf   :  { %v2707_v51 = vmul.f32 %v5542_v46, %v2691_v27 }
0x17c1   :  { %v2713_v52 = vmul.f32 %v2712_v50, %v2707_v51 }
0x17c2   :  { %v5544_v53 = vpop.eup %5543 }
0x17c3   :  { %v2708_v55 = vmul.f32 %v5544_v53, %v2692_v9  ;;  %v6067_v56 = vadd.f32 %v2718_v47, %v2713_v52 }
0x17c5   :  { %v2714_v48 = vmul.f32 %v2712_v50, %v2708_v55  ;;  %4974 = vmatprep.mubr.msk.f32.mxu1 %vm151_vm0, %v6067_v56 }
0x17c7   :  { %v6076_v59 = vadd.f32 %v2718_v47, %v2714_v48 }
0x17c9   :  { %4975 = vmatmul.mubr.msk.f32.vlgmr.msra.gmra.mrb[26].mxu1 %vm151_vm0, %v6076_v59 }
0x17ca   :  { %5280 = vmatpush3.bf16.msra.mxu1 %v5279_v23  ;;  %4985 = vmatprep.mubr.msk.f32.mxu1 %vm5614_vm3, %v5600_v0 }
0x17cb   :  { %5281 = vmatprep.subr.bf16.mxu1 %v5609_v12 }
0x17ce   :  { %5283 = vmatpush3.bf16.msra.mxu1 %v5282_v61 }
0x17cf   :  { %5285 = vmatprep.subr.bf16.mxu1 %v5284_v18 }
0x17d1   :  { %4986 = vmatmul.mubr.msk.f32.vlgmr.msra.gmra.mrb[28].mxu1 %vm151_vm0, %v1919_v62 }
0x17d2   :  { %5287 = vmatpush3.bf16.msra.mxu1 %v5284_v18 }
0x17d3   :  { %5289 = vmatprep.subr.bf16.mxu1 %v5288_v26 }
0x17d6   :  { %5291 = vmatpush3.bf16.msra.mxu1 %v5288_v26 }
0x189c   :  { %v4976_v63 = vpop.f32.mrb[26].mxu1 }
0x189d   :  { %v2798_v30 = vpop.f32.mrb[27].mxu1 }
0x189e   :  { %4990 = vmatprep.mubr.msk.f32.mxu0 %vm151_vm0, %v2798_v30 }
0x18a4   :  { %v6087_v32 = vpop.f32.mrb[28].mxu1 }
0x18a5   :  { %2991 = vrot.lane.b32.xlu0 %v6087_v32, %s5604_s19  ;;  %v4987_v34 = vpop.f32.mrb[29].mxu1  ;;  %4988 = vmatprep.subr.msk.mxu0 %vm151_vm0, %v6087_v32  ;;  %s4423_s19 = sld [smem:[%s6290_s0 + %s5632_s17]]  }
0x18a6   :  { %4989 = vmatpush3.xpose.msk.msra.mxu0 %vm151_vm0, %v6087_v32 }
0x18a9   :  { %3165 = vrot.lane.b32.xlu0 %v4976_v63, %s5603_s18  ;;  %4991 = vmatmul.mubr.msk.f32.vlgmr.msra.gmra.mrb[20].mxu0 %vm151_vm0, %v4976_v63 }
0x1917   :  { %v2992_v12 = vpop.permute.xlu0 %2991 }
0x1918   :  { %4993 = vmatprep.subr.mxu0 %v2992_v12 }
0x1919   :  { %4994 = vmatpush3.msra.mxu0 %v2992_v12  ;;  %v4542_v12 = vld [vmem:[%s5858_s3 + $0x60] sm:$0xff] }
0x191b   :  { %v3166_v39 = vpop.permute.xlu0 %3165 }
0x197c   :  { %v4992_v2 = vpop.f32.mrb[20].mxu0 }
0x197d   :  { %v2960_v4 = vpop.f32.mrb[21].mxu0  ;;  %v2966_v20 = vadd.f32 %v4992_v2, %v1923_v3  ;;  %v4544_v2 = vld [vmem:[%s5858_s3 + $0x70] sm:$0xff] }
0x197e   :  { %v2961_v5 = vadd.f32 %v2960_v4, %v1922_v1  ;;  %v4545_v4 = vld [vmem:[%s5858_s3 + $0x78] sm:$0xff] }
0x197f   :  { %v2972_v28 = vsel %vm1172_vm4, %v2966_v20, -inf }
0x1980   :  { %v2969_v25 = vsel %vm1172_vm4, %v2961_v5, -inf }
0x1981   :  { %2970 = vmax.xlane.f32.xlu1 %v2969_v25 }
0x1985   :  { %2973 = vmax.xlane.f32.xlu1 %v2972_v28 }
0x1996   :  { %3167 = vrot.lane.b32.xlu1 %v6087_v32, %s5603_s18 }
0x1a0e   :  { %v2971_v6 = vpop.xlane.xlu1 %2970 }
0x1a0f   :  { %v2975_v7 = vsub.f32 %v2961_v5, %v2971_v6  ;;  %v5296_v5 = vpack.c.bf16 %v4545_v4, %v4544_v2  ;;  %v3478_v2 = vrot.slane %v6061_v49, %v5917_v45 }
0x1a11   :  { %v2977_v11 = vmul.f32 1.442695, %v2975_v7 }
0x1a12   :  { %v2974_v35 = vpop.xlane.xlu1 %2973 }
0x1a13   :  { %v2976_v10 = vsub.f32 %v2966_v20, %v2974_v35 }
0x1a15   :  { %v2979_v13 = vmul.f32 1.442695, %v2976_v10 }
0x1a16   :  { %v3168_v8 = vpop.permute.xlu1 %3167 }
0x1a17   :  { %5545 = vpow2.f32 %v2979_v13  ;;  %5009 = vmatprep.subr.msk.mxu0 %vm151_vm0, %v3168_v8 }
0x1a18   :  { %5547 = vpow2.f32 %v2977_v11 }
0x1a21   :  { %v5546_v9 = vpop.eup %5545 }
0x1a22   :  { %v2984_v27 = vsel %vm1172_vm4, %v5546_v9, 0.0  ;;  %v5548_v41 = vpop.eup %5547 }
0x1a23   :  { %2985 = vadd.xlane.f32.xlu1 %v2984_v27  ;;  %v2981_v14 = vsel %vm1172_vm4, %v5548_v41, 0.0 }
0x1a27   :  { %2982 = vadd.xlane.f32.xlu1 %v2981_v14 }
0x1a38   :  { %3163 = vrot.lane.b32.xlu1 %v2798_v30, %s5603_s18  ;;  %s5625_s18 = smov 19  }
0x1a39   :  { %s6140_s22 = sld [smem:[%s6290_s0 + %s5625_s18]]  }
0x1a3f   :  { %v4466_v18 = vld [vmem:[%s6140_s22] ss:$0 sm:$0xff] }
0x1a40   :  { %v1867_v26 = vadd.f32 %v4466_v18, %v5998_v44 }
0x1ab0   :  { %v2986_v29 = vpop.xlane.xlu1 %2985 }
0x1ab1   :  { %5549 = vrcp.f32 %v2986_v29 }
0x1ab4   :  { %v2983_v31 = vpop.xlane.xlu1 %2982 }
0x1ab5   :  { %5551 = vrcp.f32 %v2983_v31 }
0x1ab8   :  { %v3164_v38 = vpop.permute.xlu1 %3163 }
0x1abb   :  { %v5550_v33 = vpop.eup %5549 }
0x1abc   :  { %v2990_v37 = vmul.f32 %v5550_v33, %v5546_v9 }
0x1abf   :  { %v5552_v36 = vpop.eup %5551 }
0x1ac0   :  { %v2989_v40 = vmul.f32 %v5552_v36, %v5548_v41  ;;  %v1872_v36 = vadd.f32 %v5996_v43, %v4466_v18  ;;  %v4551_v43 = vld [vmem:[%s5897_s9 + $0x38] sm:$0xff] }
0x1ac2   :  { %4995 = vmatprep.mubr.msk.f32.mxu0 %vm1172_vm4, %v2989_v40 }
0x1ac3   :  { %4996 = vmatmul.mubr.msk.f32.vlgmr.msra.gmra.mrb[22].mxu0 %vm1172_vm4, %v2990_v37  ;;  %v1875_v37 = vadd.f32 %v1867_v26, %v5923_v54 }
0x1ac4   :  { %5010 = vmatpush3.xpose.msk.msra.mxu0 %vm151_vm0, %v3168_v8  ;;  %5011 = vmatprep.mubr.msk.f32.mxu0 %vm151_vm0, %v3164_v38 }
0x1ac5   :  { %v1877_v38 = vsel %vm151_vm0, %v1875_v37, 0.0 }
0x1ac7   :  { %5012 = vmatmul.mubr.msk.f32.vlgmr.msra.gmra.mrb[24].mxu0 %vm151_vm0, %v3166_v39  ;;  %v1876_v39 = vadd.f32 %v1872_v36, %v5934_v24  ;;  %v5597_v36 = vld [vmem:[%s5782_s7] sm:$0x7]  ;;  %s5627_s7 = smov 23  }
0x1ac8   :  { %s4419_s25 = sld [smem:[%s6290_s0 + %s5627_s7]]  }
0x1ac9   :  { %v1880_v44 = vsel %vm151_vm0, %v1876_v39, 0.0 }
0x1b96   :  { %v4997_v50 = vpop.f32.mrb[22].mxu0 }
0x1b97   :  { %v3066_v46 = vpop.f32.mrb[23].mxu0 }
0x1b98   :  { %5006 = vmatprep.mubr.msk.f32.mxu1 %vm151_vm0, %v3066_v46  ;;  %v4549_v46 = vld [vmem:[%s5897_s9 + $0x28] sm:$0xff] }
0x1b99   :  { %5007 = vmatmul.mubr.msk.f32.vlgmr.msra.gmra.mrb[30].mxu1 %vm151_vm0, %v4997_v50  ;;  %v4548_v50 = vld [vmem:[%s5897_s9 + $0x20] sm:$0xff] }
0x1b9a   :  { %v5013_v51 = vpop.f32.mrb[24].mxu0 }
0x1b9b   :  { %v3247_v47 = vadd.f32 %v5013_v51, %v1923_v3  ;;  %v3241_v52 = vpop.f32.mrb[25].mxu0  ;;  %v5300_v51 = vpack.c.bf16 %v4549_v46, %v4548_v50 }
0x1b9c   :  { %v3242_v53 = vadd.f32 %v3241_v52, %v1922_v1  ;;  %v4543_v1 = vld [vmem:[%s5858_s3 + $0x68] sm:$0xff]  ;;  %s5633_s3 = smov 29  }
0x1b9d   :  { %v3253_v55 = vsel %vm1172_vm4, %v3247_v47, -inf  ;;  %v5292_v3 = vpack.c.bf16 %v4543_v1, %v4542_v12  ;;  %s4425_s23 = sld [smem:[%s6290_s0 + %s5633_s3]]  }
0x1b9e   :  { %3254 = vmax.xlane.f32.xlu0 %v3253_v55  ;;  %v3250_v57 = vsel %vm1172_vm4, %v3242_v53, -inf }
0x1b9f   :  { %3251 = vmax.xlane.f32.xlu1 %v3250_v57  ;;  %5293 = vmatprep.subr.bf16.mxu1 %v5292_v3 }
0x1ba0   :  { %5295 = vmatpush3.bf16.msra.mxu1 %v5292_v3 }
0x1ba1   :  { %5297 = vmatprep.subr.bf16.mxu1 %v5296_v5 }
0x1ba4   :  { %5299 = vmatpush3.bf16.msra.mxu1 %v5296_v5 }
0x1c2b   :  { %v3255_v58 = vpop.xlane.xlu0 %3254 }
0x1c2c   :  { %v3257_v48 = vsub.f32 %v3247_v47, %v3255_v58  ;;  %v3252_v23 = vpop.xlane.xlu1 %3251  ;;  %v4550_v47 = vld [vmem:[%s5897_s9 + $0x30] sm:$0xff]  ;;  %s5626_s9 = smov 22  }
0x1c2d   :  { %v3256_v22 = vsub.f32 %v3242_v53, %v3252_v23  ;;  %v5304_v52 = vpack.c.bf16 %v4551_v43, %v4550_v47  ;;  %s6172_s24 = sld [smem:[%s6290_s0 + %s5626_s9]]  }
0x1c2e   :  { %v3260_v60 = vmul.f32 1.442695, %v3257_v48 }
0x1c2f   :  { %v3258_v61 = vmul.f32 1.442695, %v3256_v22 }
0x1c30   :  { %5553 = vpow2.f32 %v3260_v60 }
0x1c31   :  { %5555 = vpow2.f32 %v3258_v61 }
0x1c3a   :  { %v5554_v62 = vpop.eup %5553 }
0x1c3b   :  { %v5556_v63 = vpop.eup %5555  ;;  %v3265_v30 = vsel %vm1172_vm4, %v5554_v62, 0.0 }
0x1c3c   :  { %3266 = vadd.xlane.f32.xlu1 %v3265_v30  ;;  %v3262_v34 = vsel %vm1172_vm4, %v5556_v63, 0.0 }
0x1c3d   :  { %3263 = vadd.xlane.f32.xlu0 %v3262_v34 }
0x1c53   :  { %3272 = vrot.lane.b32.xlu0 %v6087_v32, %s5605_s20 }
0x1cc9   :  { %v3267_v20 = vpop.xlane.xlu1 %3266 }
0x1cca   :  { %5557 = vrcp.f32 %v3267_v20  ;;  %v3264_v25 = vpop.xlane.xlu0 %3263 }
0x1ccb   :  { %5559 = vrcp.f32 %v3264_v25 }
0x1cce   :  { %v3273_v28 = vpop.permute.xlu0 %3272 }
0x1ccf   :  { %5014 = vmatprep.subr.mxu0 %v3273_v28 }
0x1cd0   :  { %5015 = vmatpush3.msra.mxu0 %v3273_v28 }
0x1cd1   :  { %5301 = vmatprep.subr.bf16.mxu0 %v5300_v51 }
0x1cd4   :  { %v5558_v6 = vpop.eup %5557 }
0x1cd5   :  { %v5560_v7 = vpop.eup %5559  ;;  %v3271_v35 = vmul.f32 %v5558_v6, %v5554_v62 }
0x1cd6   :  { %v3270_v32 = vmul.f32 %v5560_v7, %v5556_v63  ;;  %v3472_v63 = vrot.slane %v6058_v42, %v5917_v45  ;;  %v3715_v7 = vld [vmem:[%s6172_s24] sm:$0xff] }
0x1cd8   :  { %5016 = vmatprep.mubr.msk.f32.mxu0 %vm1172_vm4, %v3270_v32  ;;  %v4556_v32 = vld [vmem:[%s5908_s15 + $0x40] sm:$0xff] }
0x1cd9   :  { %5017 = vmatmul.mubr.msk.f32.vlgmr.msra.gmra.mrb[26].mxu0 %vm1172_vm4, %v3271_v35  ;;  %v4557_v35 = vld [vmem:[%s5908_s15 + $0x48] sm:$0xff] }
0x1cda   :  { %5303 = vmatpush3.bf16.msra.mxu0 %v5300_v51 }
0x1cdb   :  { %5305 = vmatprep.subr.bf16.mxu0 %v5304_v52 }
0x1cde   :  { %5307 = vmatpush3.bf16.msra.mxu0 %v5304_v52  ;;  %v4553_v52 = vld [vmem:[%s5976_s30 + $0x1] ss:$0 sm:$0xff]  ;;  %s5629_s30 = smov 26  }
0x1cdf   :  { %s6256_s5 = sld [smem:[%s6290_s0 + %s5629_s30]]  }
0x1dac   :  { %v5018_v10 = vpop.f32.mrb[26].mxu0 }
0x1dad   :  { %v3347_v11 = vpop.f32.mrb[27].mxu0 }
0x1dae   :  { %5027 = vmatprep.mubr.msk.f32.mxu1 %vm151_vm0, %v3347_v11  ;;  %v5308_v11 = vpack.c.bf16 %v4557_v35, %v4556_v32  ;;  %v3893_v35 = vld [vmem:[%s6210_s29 + $0x60] sm:$0xff] }
0x1daf   :  { %5028 = vmatmul.mubr.msk.f32.vlgmr.msra.gmra.mrb[30].mxu1 %vm151_vm0, %v5018_v10  ;;  %v4558_v10 = vld [vmem:[%s5908_s15 + $0x50] sm:$0xff] }
0x1db0   :  { %5309 = vmatprep.subr.bf16.mxu1 %v5308_v11 }
0x1db1   :  { %5311 = vmatpush3.bf16.msra.mxu1 %v5308_v11  ;;  %v3882_v11 = vld [vmem:[%s6210_s29 + $0x8] sm:$0xff] }
0x1e82   :  { %v5029_v13 = vpop.f32.mrb[30].mxu1 }
0x1e83   :  { %v3432_v8 = vpop.f32.mrb[31].mxu1  ;;  %v5394_v27 = vadd.f32 %v5029_v13, %v6076_v59  ;;  %v4559_v13 = vld [vmem:[%s5908_s15 + $0x58] sm:$0xff] }
0x1e84   :  { %v5395_v9 = vadd.f32 %v3432_v8, %v6067_v56  ;;  %v5312_v8 = vpack.c.bf16 %v4559_v13, %v4558_v10  ;;  %v3895_v10 = vld [vmem:[%s6210_s29 + $0x70] sm:$0xff]  ;;  %v3884_v13 = vld [vmem:[%s6210_s29 + $0x18] sm:$0xff] }
0x1e85   :  { %v3446_v14 = vsel %vm151_vm0, %v5394_v27, 0.0 }
0x1e86   :  { %v3443_v41 = vsel %vm151_vm0, %v5395_v9, 0.0  ;;  %5313 = vmatprep.subr.bf16.mxu1 %v5312_v8 }
0x1e87   :  { %3444 = vadd.xlane.f32.xlu1 %v3443_v41  ;;  %5315 = vmatpush3.bf16.msra.mxu1 %v5312_v8  ;;  %v5338_v8 = vpack.c.bf16 %v3895_v10, %v3893_v35  ;;  %v4202_v35 = vld [vmem:[%s6256_s5 + $0x30] sm:$0xff]  ;;  %v4203_v10 = vld [vmem:[%s6256_s5 + $0x38] sm:$0xff] }
0x1e8b   :  { %3447 = vadd.xlane.f32.xlu1 %v3446_v14  ;;  %v4562_v14 = vld [vmem:[%s5908_s15 + $0x70] sm:$0xff] }
0x1f14   :  { %v3445_v15 = vpop.xlane.xlu1 %3444 }
0x1f15   :  { %v3449_v16 = vmul.f32 0.03125, %v3445_v15  ;;  %v4563_v15 = vld [vmem:[%s5908_s15 + $0x78] sm:$0xff] }
0x1f17   :  { %v3451_v17 = vsub.f32 %v5395_v9, %v3449_v16  ;;  %v4560_v9 = vld [vmem:[%s5908_s15 + $0x60] sm:$0xff]  ;;  %v5320_v16 = vpack.c.bf16 %v4563_v15, %v4562_v14  ;;  %v3886_v14 = vld [vmem:[%s6210_s29 + $0x28] sm:$0xff]  ;;  %v3888_v15 = vld [vmem:[%s6210_s29 + $0x38] sm:$0xff] }
0x1f18   :  { %v3448_v56 = vpop.xlane.xlu1 %3447 }
0x1f19   :  { %v3450_v21 = vmul.f32 0.03125, %v3448_v56  ;;  %v3453_v59 = vmul.f32 %v3451_v17, %v3451_v17 }
0x1f1b   :  { %v3452_v29 = vsub.f32 %v5394_v27, %v3450_v21  ;;  %v3455_v31 = vsel %vm151_vm0, %v3453_v59, 0.0  ;;  %v4561_v27 = vld [vmem:[%s5908_s15 + $0x68] sm:$0xff] }
0x1f1c   :  { %3456 = vadd.xlane.f32.xlu1 %v3455_v31  ;;  %v5316_v41 = vpack.c.bf16 %v4561_v27, %v4560_v9  ;;  %v5340_v9 = vpack.c.bf16 %v3884_v13, %v3882_v11  ;;  %v3881_v27 = vld [vmem:[%s6210_s29] sm:$0xff]  ;;  %v5368_v11 = vpack.c.bf16 %v4203_v10, %v4202_v35 }
0x1f1d   :  { %v3454_v33 = vmul.f32 %v3452_v29, %v3452_v29 }
0x1f1e   :  { %5317 = vmatprep.subr.bf16.mxu1 %v5316_v41 }
0x1f1f   :  { %v3458_v40 = vsel %vm151_vm0, %v3454_v33, 0.0  ;;  %5319 = vmatpush3.bf16.msra.mxu1 %v5316_v41  ;;  %v3883_v41 = vld [vmem:[%s6210_s29 + $0x10] sm:$0xff] }
0x1f20   :  { %3459 = vadd.xlane.f32.xlu1 %v3458_v40  ;;  %5321 = vmatprep.subr.bf16.mxu1 %v5320_v16 }
0x1f23   :  { %5323 = vmatpush3.bf16.msra.mxu1 %v5320_v16  ;;  %v5342_v16 = vpack.c.bf16 %v3883_v41, %v3881_v27  ;;  %v4205_v27 = vld [vmem:[%s6256_s5 + $0x48] sm:$0xff] }
0x1f24   :  { %1878 = vadd.xlane.f32.xlu1 %v1877_v38 }
0x1f28   :  { %1881 = vadd.xlane.f32.xlu1 %v1880_v44  ;;  %v5598_v44 = vld [vmem:[%s5787_s12] sm:$0x7] }
0x1fa9   :  { %v3457_v54 = vpop.xlane.xlu1 %3456 }
0x1faa   :  { %v3461_v53 = vmul.f32 0.03125, %v3457_v54 }
0x1fac   :  { %v3463_v55 = vadd.f32 1e-06, %v3461_v53 }
0x1fad   :  { %v3460_v57 = vpop.xlane.xlu1 %3459 }
0x1fae   :  { %5561 = vrsqrt.f32 %v3463_v55  ;;  %v3462_v24 = vmul.f32 0.03125, %v3460_v57 }
0x1fb0   :  { %v3464_v58 = vadd.f32 1e-06, %v3462_v24 }
0x1fb1   :  { %v1879_v48 = vpop.xlane.xlu1 %1878 }
0x1fb2   :  { %5563 = vrsqrt.f32 %v3464_v58  ;;  %v1883_v23 = vmul.f32 0.03125, %v1879_v48  ;;  %v3798_v48 = vld [vmem:[%s4419_s25] sm:$0xff] }
0x1fb4   :  { %v1885_v22 = vsub.f32 %v1875_v37, %v1883_v23  ;;  %v3799_v23 = vld [vmem:[%s4419_s25 + $0x8] sm:$0xff] }
0x1fb5   :  { %v1882_v60 = vpop.xlane.xlu1 %1881 }
0x1fb6   :  { %v1884_v61 = vmul.f32 0.03125, %v1882_v60  ;;  %v1887_v62 = vmul.f32 %v1885_v22, %v1885_v22 }
0x1fb8   :  { %v5562_v30 = vpop.eup %5561  ;;  %v1886_v34 = vsub.f32 %v1876_v39, %v1884_v61  ;;  %v1889_v12 = vsel %vm151_vm0, %v1887_v62, 0.0 }
0x1fb9   :  { %1890 = vadd.xlane.f32.xlu0 %v1889_v12  ;;  %v3467_v1 = vmul.f32 %v5562_v30, %v3451_v17 }
0x1fba   :  { %v1888_v3 = vmul.f32 %v1886_v34, %v1886_v34 }
0x1fbb   :  { %v3473_v4 = vmul.f32 %v3472_v63, %v3467_v1 }
0x1fbc   :  { %v5564_v5 = vpop.eup %5563  ;;  %v1892_v20 = vsel %vm151_vm0, %v1888_v3, 0.0 }
0x1fbd   :  { %v3468_v25 = vmul.f32 %v5564_v5, %v3452_v29  ;;  %1893 = vadd.xlane.f32.xlu1 %v1892_v20  ;;  %v6161_v28 = vadd.f32 %v3478_v2, %v3473_v4  ;;  %v6185_v29 = vsub.s32 2, %v5789_v19  ;;  %v3716_v19 = vld [vmem:[%s6172_s24 + $0x8] sm:$0xff]  ;;  %v3892_v5 = vld [vmem:[%s6210_s29 + $0x58] sm:$0xff]  ;;  %v3889_v20 = vld [vmem:[%s6210_s29 + $0x40] sm:$0xff] }
0x1fbe   :  { %v3890_v4 = vld [vmem:[%s6210_s29 + $0x48] sm:$0xff] }
0x1fbf   :  { %v3474_v6 = vmul.f32 %v3472_v63, %v3468_v25  ;;  %5038 = vmatprep.mubr.msk.f32.mxu0 %vm151_vm0, %v6161_v28  ;;  %v1906_v40 = vrot.slane %v5597_v36, %v6185_v29  ;;  %v1912_v50 = vrot.slane %v5598_v44, %v6185_v29  ;;  %v5332_v25 = vpack.c.bf16 %v3892_v5, %v3890_v4 }
0x1fc1   :  { %v6165_v45 = vadd.f32 %v3478_v2, %v3474_v6  ;;  %v3894_v6 = vld [vmem:[%s6210_s29 + $0x68] sm:$0xff] }
0x1fc3   :  { %5039 = vmatmul.mubr.msk.f32.vlgmr.msra.gmra.mrb[28].mxu0 %vm151_vm0, %v6165_v45 }
0x1fc4   :  { %5064 = vmatprep.mubr.msk.f32.mxu0 %vm407_vm2, %v3715_v7 }
0x2046   :  { %v1891_v17 = vpop.xlane.xlu0 %1890 }
0x2047   :  { %v1895_v18 = vmul.f32 0.03125, %v1891_v17 }
0x2049   :  { %v1897_v56 = vadd.f32 1e-06, %v1895_v18  ;;  %v5344_v18 = vpack.c.bf16 %v3888_v15, %v3886_v14 }
0x204a   :  { %v1894_v21 = vpop.xlane.xlu1 %1893 }
0x204b   :  { %5565 = vrsqrt.f32 %v1897_v56  ;;  %v1896_v59 = vmul.f32 0.03125, %v1894_v21  ;;  %v3885_v56 = vld [vmem:[%s6210_s29 + $0x20] sm:$0xff]  ;;  %v3887_v21 = vld [vmem:[%s6210_s29 + $0x30] sm:$0xff] }
0x204d   :  { %v1898_v26 = vadd.f32 1e-06, %v1896_v59 }
0x204f   :  { %5567 = vrsqrt.f32 %v1898_v26  ;;  %v5346_v26 = vpack.c.bf16 %v3887_v21, %v3885_v56 }
0x2055   :  { %v5566_v31 = vpop.eup %5565 }
0x2056   :  { %v1901_v33 = vmul.f32 %v5566_v31, %v1885_v22  ;;  %v4565_v22 = vld [vmem:[%s6140_s22 + $0x1] ss:$0 sm:$0xff] }
0x2058   :  { %v1907_v39 = vmul.f32 %v1906_v40, %v1901_v33 }
0x2059   :  { %v5568_v37 = vpop.eup %5567 }
0x205a   :  { %v1902_v38 = vmul.f32 %v5568_v37, %v1886_v34  ;;  %v1913_v51 = vadd.f32 %v1912_v50, %v1907_v39 }
0x205c   :  { %v1908_v46 = vmul.f32 %v1906_v40, %v1902_v38 }
0x205e   :  { %v1914_v47 = vadd.f32 %v1912_v50, %v1908_v46 }
0x2060   :  { %v5324_v43 = vpack.c.bf16 %v1914_v47, %v1913_v51  ;;  %v4064_v51 = vld [vmem:[%s6210_s29 + $0x88] sm:$0xff]  ;;  %v4066_v47 = vld [vmem:[%s6210_s29 + $0x98] sm:$0xff] }
0x2062   :  { %5325 = vmatprep.subr.bf16.mxu0 %v5324_v43 }
0x2063   :  { %5327 = vmatpush3.bf16.msra.mxu0 %v5324_v43 }
0x2064   :  { %5329 = vmatprep.subr.bf16.mxu0 %v5324_v43 }
0x2066   :  { %5065 = vmatmul.mubr.msk.f32.vlgmr.msra.gmra.mrb[30].mxu0 %vm407_vm2, %v3716_v19  ;;  %v4063_v19 = vld [vmem:[%s6210_s29 + $0x80] sm:$0xff] }
0x2067   :  { %5331 = vmatpush3.bf16.msra.mxu0 %v5324_v43  ;;  %5071 = vmatprep.mubr.msk.f32.mxu0 %vm407_vm2, %v3798_v48  ;;  %v5348_v43 = vpack.c.bf16 %v4066_v47, %v4064_v51 }
0x2068   :  { %5333 = vmatprep.subr.bf16.mxu0 %v5332_v25 }
0x206a   :  { %5072 = vmatmul.mubr.msk.f32.vlgmr.msra.gmra.mrb[32].mxu0 %vm407_vm2, %v3799_v23 }
0x206b   :  { %3967 = vmatprep.mubr.f32.mxu0 %v5600_v0 }
0x2096   :  { %v5040_v54 = vpop.f32.mrb[28].mxu0 }
0x2097   :  { %v3572_v53 = vadd.f32 %v5040_v54, %v4553_v52  ;;  %v3566_v55 = vpop.f32.mrb[29].mxu0 }
0x2098   :  { %v3567_v57 = vadd.f32 %v4553_v52, %v3566_v55  ;;  %v4065_v52 = vld [vmem:[%s6210_s29 + $0x90] sm:$0xff]  ;;  %v4070_v55 = vld [vmem:[%s6210_s29 + $0xb8] sm:$0xff] }
0x2099   :  { %v3576_v58 = vmax.f32 %v3572_v53, 0.0  ;;  %v5350_v54 = vpack.c.bf16 %v4065_v52, %v4063_v19  ;;  %v4068_v53 = vld [vmem:[%s6210_s29 + $0xa8] sm:$0xff] }
0x209a   :  { %v3575_v24 = vmax.f32 %v3567_v57, 0.0  ;;  %v5352_v57 = vpack.c.bf16 %v4070_v55, %v4068_v53  ;;  %v4193_v53 = vld [vmem:[%s4421_s11 + $0x8] sm:$0xff] }
0x209c   :  { %5057 = vmatprep.mubr.msk.f32.mxu1 %vm1793_vm5, %v3575_v24  ;;  %v4067_v24 = vld [vmem:[%s6210_s29 + $0xa0] sm:$0xff] }
0x209d   :  { %5058 = vmatmul.mubr.msk.f32.vlgmr.msra.gmra.mrb[32].mxu1 %vm1793_vm5, %v3576_v58  ;;  %v4069_v58 = vld [vmem:[%s6210_s29 + $0xb0] sm:$0xff] }
0x209e   :  { %v5354_v48 = vpack.c.bf16 %v4069_v58, %v4067_v24 }
0x2139   :  { %v5066_v2 = vpop.f32.mrb[30].mxu0 }
0x213a   :  { %v3789_v3 = vpop.f32.mrb[31].mxu0 }
0x213d   :  { %v5073_v17 = vpop.f32.mrb[32].mxu0 }
0x213e   :  { %v3872_v59 = vpop.f32.mrb[33].mxu0 }
0x2170   :  { %v5059_v60 = vpop.f32.mrb[32].mxu1 }
0x2171   :  { %v3666_v61 = vpop.f32.mrb[33].mxu1  ;;  %v3672_v62 = vadd.f32 %v5059_v60, %v4565_v22 }
0x2172   :  { %v3667_v63 = vadd.f32 %v4565_v22, %v3666_v61 }
0x2173   :  { %v3676_v12 = vadd.f32 %v3672_v62, %v6165_v45  ;;  %v3896_v45 = vld [vmem:[%s6210_s29 + $0x78] sm:$0xff] }
0x2174   :  { %v3675_v30 = vadd.f32 %v3667_v63, %v6161_v28  ;;  %v3891_v28 = vld [vmem:[%s6210_s29 + $0x50] sm:$0xff]  ;;  %v5336_v32 = vpack.c.bf16 %v3896_v45, %v3894_v6  ;;  %v4200_v45 = vld [vmem:[%s6256_s5 + $0x20] sm:$0xff] }
0x2175   :  { %v3680_v1 = vsel %vm151_vm0, %v3676_v12, 0.0  ;;  %v5334_v7 = vpack.c.bf16 %v3891_v28, %v3889_v20  ;;  %v4199_v28 = vld [vmem:[%s6256_s5 + $0x18] sm:$0xff] }
0x2176   :  { %v3677_v34 = vsel %vm151_vm0, %v3675_v30, 0.0 }
0x2177   :  { %3678 = vadd.xlane.f32.xlu1 %v3677_v34  ;;  %5335 = vmatpush1.bf16.msra.mxu0 %v5334_v7  ;;  %v4201_v7 = vld [vmem:[%s6256_s5 + $0x28] sm:$0xff] }
0x2178   :  { %5337 = vmatprep.subr.bf16.mxu0 %v5336_v32  ;;  %v5364_v32 = vpack.c.bf16 %v4201_v7, %v4200_v45 }
0x217b   :  { %3681 = vadd.xlane.f32.xlu1 %v3680_v1  ;;  %5339 = vmatpush1.bf16.msra.mxu0 %v5338_v8 }
0x217c   :  { %5341 = vmatprep.subr.bf16.mxu0 %v5340_v9  ;;  %v4204_v9 = vld [vmem:[%s6256_s5 + $0x40] sm:$0xff] }
0x217d   :  { %v5372_v41 = vpack.c.bf16 %v4205_v27, %v4204_v9 }
0x217e   :  { %4572 = vmatmul.mubr.msk.f32.vlgmr.msra.gmra.mrb[34].mxu0 %vm151_vm0, %v3872_v59 }
0x217f   :  { %5343 = vmatpush1.bf16.msra.mxu0 %v5342_v16  ;;  %3973 = vmatprep.mubr.f32.mxu0 %v5600_v0  ;;  %v4206_v16 = vld [vmem:[%s6256_s5 + $0x50] sm:$0xff] }
0x2180   :  { %5345 = vmatprep.subr.bf16.mxu0 %v5344_v18 }
0x2182   :  { %4573 = vmatmul.mubr.msk.f32.gmra.mrb[36].mxu0 %vm151_vm0, %v5073_v17  ;;  %v4207_v17 = vld [vmem:[%s6256_s5 + $0x58] sm:$0xff] }
0x2183   :  { %5347 = vmatpush1.bf16.msra.mxu0 %v5346_v26  ;;  %4050 = vmatprep.mubr.f32.mxu0 %v5600_v0  ;;  %v5376_v18 = vpack.c.bf16 %v4207_v17, %v4206_v16 }
0x2184   :  { %5349 = vmatprep.subr.bf16.mxu0 %v5348_v43 }
0x2186   :  { %4574 = vmatmul.mubr.msk.f32.vlgmr.msra.gmra.mrb[34].mxu0 %vm151_vm0, %v3789_v3 }
0x2187   :  { %4056 = vmatprep.mubr.f32.mxu0 %v5600_v0  ;;  %5351 = vmatpush1.bf16.msra.mxu0 %v5350_v54 }
0x2188   :  { %5353 = vmatprep.subr.bf16.mxu0 %v5352_v57 }
0x218a   :  { %4575 = vmatmul.mubr.msk.f32.gmra.mrb[36].mxu0 %vm151_vm0, %v5066_v2 }
0x218b   :  { %4141 = vmatprep.mubr.f32.mxu0 %v5600_v0  ;;  %5355 = vmatpush1.bf16.msra.mxu0 %v5354_v48 }
0x2204   :  { %v3679_v31 = vpop.xlane.xlu1 %3678 }
0x2205   :  { %v3683_v33 = vmul.f32 0.03125, %v3679_v31 }
0x2207   :  { %v3685_v36 = vsub.f32 %v3675_v30, %v3683_v33  ;;  %v3706_v30 = vrot.slane %v6058_v42, %v6185_v29  ;;  %v4196_v42 = vld [vmem:[%s6256_s5] sm:$0xff] }
0x2208   :  { %v3682_v40 = vpop.xlane.xlu1 %3681 }
0x2209   :  { %v3684_v37 = vmul.f32 0.03125, %v3682_v40  ;;  %v3687_v38 = vmul.f32 %v3685_v36, %v3685_v36 }
0x220b   :  { %v3686_v39 = vsub.f32 %v3676_v12, %v3684_v37  ;;  %v3689_v44 = vsel %vm151_vm0, %v3687_v38, 0.0  ;;  %v3712_v12 = vrot.slane %v6061_v49, %v6185_v29  ;;  %v4197_v49 = vld [vmem:[%s6256_s5 + $0x8] sm:$0xff] }
0x220c   :  { %3690 = vadd.xlane.f32.xlu1 %v3689_v44  ;;  %v5356_v29 = vpack.c.bf16 %v4197_v49, %v4196_v42 }
0x220d   :  { %v3688_v50 = vmul.f32 %v3686_v39, %v3686_v39 }
0x220e   :  { %5357 = vmatprep.subr.bf16.mxu1 %v5356_v29 }
0x220f   :  { %v3692_v46 = vsel %vm151_vm0, %v3688_v50, 0.0  ;;  %5359 = vmatpush3.bf16.msra.mxu1 %v5356_v29 }
0x2210   :  { %3693 = vadd.xlane.f32.xlu1 %v3692_v46  ;;  %v4192_v46 = vld [vmem:[%s4421_s11] sm:$0xff] }
0x2299   :  { %v3691_v23 = vpop.xlane.xlu1 %3690 }
0x229a   :  { %v3695_v22 = vmul.f32 0.03125, %v3691_v23 }
0x229c   :  { %v3697_v60 = vadd.f32 1e-06, %v3695_v22 }
0x229d   :  { %v3694_v61 = vpop.xlane.xlu1 %3693 }
0x229e   :  { %5569 = vrsqrt.f32 %v3697_v60  ;;  %v3696_v62 = vmul.f32 0.03125, %v3694_v61 }
0x22a0   :  { %v3698_v63 = vadd.f32 1e-06, %v3696_v62 }
0x22a2   :  { %5571 = vrsqrt.f32 %v3698_v63 }
0x22a8   :  { %v5570_v34 = vpop.eup %5569 }
0x22a9   :  { %v3701_v1 = vmul.f32 %v5570_v34, %v3685_v36 }
0x22ab   :  { %v3707_v2 = vmul.f32 %v3706_v30, %v3701_v1 }
0x22ac   :  { %v5572_v3 = vpop.eup %5571 }
0x22ad   :  { %v3713_v4 = vadd.f32 %v3712_v12, %v3707_v2  ;;  %v3702_v5 = vmul.f32 %v5572_v3, %v3686_v39 }
0x22af   :  { %4576 = vmatmul.mubr.msk.f32.vlgmr.msra.gmra.mrb[34].mxu0 %vm151_vm0, %v3713_v4  ;;  %v3708_v20 = vmul.f32 %v3706_v30, %v3702_v5  ;;  %v4302_v4 = vld [vmem:[%s4423_s19] sm:$0xff] }
0x22b0   :  { %4147 = vmatprep.mubr.f32.mxu0 %v5600_v0  ;;  %v4198_v0 = vld [vmem:[%s6256_s5 + $0x10] sm:$0xff] }
0x22b1   :  { %v3714_v25 = vadd.f32 %v3712_v12, %v3708_v20  ;;  %v5360_v6 = vpack.c.bf16 %v4199_v28, %v4198_v0  ;;  %v4303_v20 = vld [vmem:[%s4423_s19 + $0x8] sm:$0xff] }
0x22b3   :  { %4577 = vmatmul.mubr.msk.f32.gmra.mrb[36].mxu0 %vm151_vm0, %v3714_v25  ;;  %5361 = vmatprep.subr.bf16.mxu1 %v5360_v6 }
0x22b4   :  { %5363 = vmatpush3.bf16.msra.mxu1 %v5360_v6 }
0x22b5   :  { %5365 = vmatprep.subr.bf16.mxu1 %v5364_v32 }
0x22b8   :  { %5367 = vmatpush3.bf16.msra.mxu1 %v5364_v32 }
0x22b9   :  { %5369 = vmatprep.subr.bf16.mxu1 %v5368_v11 }
0x22bc   :  { %5371 = vmatpush3.bf16.msra.mxu1 %v5368_v11 }
0x22bd   :  { %5373 = vmatprep.subr.bf16.mxu1 %v5372_v41 }
0x22c0   :  { %5375 = vmatpush3.bf16.msra.mxu1 %v5372_v41 }
0x22c1   :  { %5377 = vmatprep.subr.bf16.mxu1 %v5376_v18 }
0x22c4   :  { %5379 = vmatpush3.bf16.msra.mxu1 %v5376_v18 }
0x2382   :  { %v4143_v13 = vpop.f32.mrb[34].mxu0 }
0x2383   :  { %5573 = vtanh.f32 %v4143_v13  ;;  %v4145_v8 = vpop.f32.mrb[35].mxu0  ;;  %v4578_v31 = vmul.f32 -1.442695, %v4143_v13 }
0x2384   :  { %5575 = vtanh.f32 %v4145_v8 }
0x2386   :  { %v4149_v14 = vpop.f32.mrb[36].mxu0 }
0x2387   :  { %5577 = vtanh.f32 %v4149_v14  ;;  %v4151_v15 = vpop.f32.mrb[37].mxu0  ;;  %v4579_v33 = vmul.f32 -1.442695, %v4149_v14 }
0x2388   :  { %5579 = vtanh.f32 %v4151_v15 }
0x2389   :  { %5581 = vpow2.f32 %v4578_v31 }
0x238a   :  { %5583 = vpow2.f32 %v4579_v33 }
0x238d   :  { %v5574_v56 = vpop.eup %5573 }
0x238e   :  { %v5576_v21 = vpop.eup %5575  ;;  %4178 = vrot.lane.b32.xlu1 %v5574_v56, %s5605_s20 }
0x238f   :  { %4180 = vrot.lane.b32.xlu0 %v5576_v21, %s5605_s20 }
0x2391   :  { %v5578_v59 = vpop.eup %5577 }
0x2392   :  { %4182 = vrot.lane.b32.xlu1 %v5578_v59, %s5605_s20  ;;  %v5580_v26 = vpop.eup %5579 }
0x2393   :  { %v5582_v36 = vpop.eup %5581 }
0x2394   :  { %v4164_v40 = vadd.f32 1.0, %v5582_v36  ;;  %v5584_v37 = vpop.eup %5583 }
0x2395   :  { %v4165_v38 = vadd.f32 1.0, %v5584_v37 }
0x2396   :  { %4184 = vrot.lane.b32.xlu1 %v5580_v26, %s5605_s20  ;;  %5585 = vrcp.f32 %v4164_v40  ;;  %s5631_s20 = smov 28  }
0x2397   :  { %5587 = vrcp.f32 %v4165_v38  ;;  %s4424_s14 = sld [smem:[%s6290_s0 + %s5631_s20]]  }
0x239d   :  { %v4306_v58 = vld [vmem:[%s4424_s14] sm:$0xff]  ;;  %v4307_v48 = vld [vmem:[%s4424_s14 + $0x8] sm:$0xff]  ;;  %v4308_v23 = vld [vmem:[%s4424_s14 + $0x10] sm:$0xff] }
0x239e   :  { %v5380_v22 = vpack.c.bf16 %v4307_v48, %v4306_v58  ;;  %v4309_v60 = vld [vmem:[%s4424_s14 + $0x18] sm:$0xff] }
0x239f   :  { %v5384_v61 = vpack.c.bf16 %v4309_v60, %v4308_v23 }
0x23a0   :  { %v5586_v50 = vpop.eup %5585  ;;  %5381 = vmatprep.subr.bf16.mxu0 %v5380_v22 }
0x23a1   :  { %v5588_v54 = vpop.eup %5587  ;;  %5383 = vmatpush3.bf16.msra.mxu0 %v5380_v22 }
0x23a2   :  { %5385 = vmatprep.subr.bf16.mxu0 %v5384_v61 }
0x23a5   :  { %5387 = vmatpush3.bf16.msra.mxu0 %v5384_v61 }
0x2400   :  { %v4179_v39 = vpop.permute.xlu1 %4178 }
0x2401   :  { %v4181_v44 = vpop.permute.xlu0 %4180 }
0x2402   :  { %v4186_v51 = vsel %vm151_vm0, %v4179_v39, %v4181_v44 }
0x2403   :  { %v4190_v47 = vmul.f32 %v5586_v50, %v4186_v51 }
0x2404   :  { %v4183_v43 = vpop.permute.xlu1 %4182 }
0x2405   :  { %v4194_v19 = vmul.f32 %v4192_v46, %v4190_v47 }
0x2407   :  { %5098 = vmatprep.mubr.msk.f32.mxu1 %vm4208_vm6, %v4194_v19 }
0x2408   :  { %v4185_v52 = vpop.permute.xlu1 %4184 }
0x2409   :  { %v4187_v55 = vsel %vm151_vm0, %v4183_v43, %v4185_v52 }
0x240a   :  { %v4191_v57 = vmul.f32 %v5588_v54, %v4187_v55 }
0x240c   :  { %v4195_v24 = vmul.f32 %v4193_v53, %v4191_v57 }
0x240e   :  { %5099 = vmatmul.mubr.msk.f32.vlgmr.msra.gmra.mrb[34].mxu1 %vm4208_vm6, %v4195_v24 }
0x24e1   :  { %v5100_v62 = vpop.f32.mrb[34].mxu1 }
0x24e2   :  { %v4583_v63 = vmul.f32 -1.442695, %v5100_v62  ;;  %v4281_v30 = vpop.f32.mrb[35].mxu1 }
0x24e3   :  { %v4582_v34 = vmul.f32 -1.442695, %v4281_v30 }
0x24e4   :  { %5589 = vpow2.f32 %v4583_v63 }
0x24e5   :  { %5591 = vpow2.f32 %v4582_v34 }
0x24ee   :  { %v5590_v12 = vpop.eup %5589 }
0x24ef   :  { %v5592_v1 = vpop.eup %5591  ;;  %v4297_v2 = vadd.f32 1.0, %v5590_v12 }
0x24f0   :  { %v4296_v3 = vadd.f32 1.0, %v5592_v1 }
0x24f1   :  { %5593 = vrcp.f32 %v4297_v2 }
0x24f2   :  { %5595 = vrcp.f32 %v4296_v3 }
0x24fb   :  { %v5594_v5 = vpop.eup %5593 }
0x24fc   :  { %v5596_v25 = vpop.eup %5595  ;;  %v4305_v49 = vadd.f32 %v5594_v5, %v4303_v20 }
0x24fd   :  { %v4304_v42 = vadd.f32 %v5596_v25, %v4302_v4 }
0x24ff   :  { %5109 = vmatprep.mubr.msk.f32.mxu0 %vm151_vm0, %v4304_v42 }
0x2500   :  { %5110 = vmatmul.mubr.msk.f32.vlgmr.msra.gmra.mrb[38].mxu0 %vm151_vm0, %v4305_v49 }
0x25d3   :  { %v5111_v0 = vpop.f32.mrb[38].mxu0 }
0x25d4   :  { %4392 = vst [vmem:[%s4425_s23 + $0x8] sm:$0xff] %v5111_v0  ;;  %v4382_v29 = vpop.f32.mrb[39].mxu0 }
0x25d5   :  { %4391 = vst [vmem:[%s4425_s23] sm:$0xff] %v4382_v29 }

</bundles_post_ra>
